<compile_context>
chip_gen: v5e
topology: v5e:2x2
jax: 0.10.0
libtpu: 0.0.40
codegen_flags: <defaults>
</compile_context>

<pallas_src>
import functools
import math

import numpy as np

import jax
import jax.numpy as jnp
from jax.experimental import pallas as pl
from jax.experimental.pallas import tpu as pltpu

# ----------------------------- model config ---------------------------------
IDIM = 16        # input feature dim
ODIM = 12        # output vocab (sos = eos = ODIM - 1)
ADIM = 32        # attention dim
AHEADS = 4       # attention heads
DK = ADIM // AHEADS
EUNITS = 64      # encoder FFN hidden
DUNITS = 64      # decoder FFN hidden
ELAYERS = 2
DLAYERS = 2
IGNORE_ID = -1
LSM_WEIGHT = 0.1
LN_EPS = 1e-12                         # espnet LayerNorm eps
XSCALE = math.sqrt(ADIM)               # PositionalEncoding xscale
NEG_INF = float(jnp.finfo(jnp.float32).min)   # torch masked_fill with dtype min


# ----------------------------- fused forward kernel --------------------------
def _e2e_kernel(layout, ilens_ref, xs_ref, d0_ref, tdist_ref, w_ref, o_ref):
    b = pl.program_id(0)
    ilen = ilens_ref[b]                        # source length of this batch elem

    T = xs_ref.shape[1]
    L1 = d0_ref.shape[1]

    # ---- packed-parameter access: static slices of the single VMEM slab ----
    def P(name):
        off, r, c = layout[name]
        return w_ref[off:off + r, :c]

    def lin(x, name):
        return jnp.dot(x, P(name + ".w"),
                       preferred_element_type=jnp.float32) + P(name + ".b")

    def ln(x, name):
        mu = jnp.mean(x, axis=-1, keepdims=True)
        var = jnp.mean((x - mu) ** 2, axis=-1, keepdims=True)
        return (x - mu) * jax.lax.rsqrt(var + LN_EPS) * P(name + ".g") + P(name + ".b")

    def ffn(x, name):
        return lin(jnp.maximum(lin(x, name + ".w1"), 0.0), name + ".w2")

    # ---- head-stacking constants (hoisted; iota + compares only) -------------
    def head_consts(tq):
        # rep : (H*tq, tq)   rep[r, t]   = 1  iff t == r mod tq   (replicate q per head)
        r = jax.lax.broadcasted_iota(jnp.int32, (AHEADS * tq, tq), 0)
        c = jax.lax.broadcasted_iota(jnp.int32, (AHEADS * tq, tq), 1)
        rep = (r == c)
        for h in range(1, AHEADS):
            rep = jnp.logical_or(rep, r == c + h * tq)
        # sel : (tq, H*tq)   sel[t, r]   = 1  iff r mod tq == t   (fold heads back)
        r = jax.lax.broadcasted_iota(jnp.int32, (tq, AHEADS * tq), 0)
        c = jax.lax.broadcasted_iota(jnp.int32, (tq, AHEADS * tq), 1)
        sel = (c == r)
        for h in range(1, AHEADS):
            sel = jnp.logical_or(sel, c == r + h * tq)
        # dia : (H*tq, ADIM) dia[r, c]   = (r // tq) == (c // DK)  (block diagonal)
        r = jax.lax.broadcasted_iota(jnp.int32, (AHEADS * tq, ADIM), 0)
        c = jax.lax.broadcasted_iota(jnp.int32, (AHEADS * tq, ADIM), 1)
        rg = jnp.zeros((AHEADS * tq, ADIM), jnp.int32)
        cg = jnp.zeros((AHEADS * tq, ADIM), jnp.int32)
        for h in range(1, AHEADS):
            rg = rg + (r >= h * tq).astype(jnp.int32)
            cg = cg + (c >= h * DK).astype(jnp.int32)
        dia = rg == cg
        # qpos: (H*tq, 1)    query position within its head block (for causal mask)
        rr = jax.lax.broadcasted_iota(jnp.int32, (AHEADS * tq, 1), 0)
        gg = jnp.zeros((AHEADS * tq, 1), jnp.int32)
        for h in range(1, AHEADS):
            gg = gg + (rr >= h * tq).astype(jnp.int32)
        qpos = rr - tq * gg
        return rep.astype(jnp.float32), sel.astype(jnp.float32), dia, qpos

    rep_T, sel_T, dia_T, _ = head_consts(T)
    rep_L, sel_L, dia_L, qpos_L = head_consts(L1)

    # attention masks (bool), built from the scalar-prefetched source length
    enc_mask = jax.lax.broadcasted_iota(jnp.int32, (AHEADS * T, T), 1) < ilen
    causal_mask = jax.lax.broadcasted_iota(jnp.int32, (AHEADS * L1, L1), 1) <= qpos_L
    mem_mask = jax.lax.broadcasted_iota(jnp.int32, (AHEADS * L1, T), 1) < ilen

    scale = 1.0 / math.sqrt(DK)

    def attend(q, k, v, mask, rep, dia, sel, o_name):
        """Head-fused multi-head attention.

        q: (Tq, ADIM) values, k, v: (Tk, ADIM) values, mask: (H*Tq, Tk) bool.
        Heads are stacked along sublanes: one matmul for all head scores, one
        softmax, one matmul for all head contexts, one fold matmul, one output
        projection.
        """
        qd = jnp.where(dia, jnp.dot(rep, q, preferred_element_type=jnp.float32), 0.0)
        s = jax.lax.dot_general(qd, k, (((1,), (1,)), ((), ())),
                                preferred_element_type=jnp.float32) * scale
        s = jnp.where(mask, s, NEG_INF)
        e = jnp.exp(s - jnp.max(s, axis=-1, keepdims=True))
        p = e * pl.reciprocal(jnp.sum(e, axis=-1, keepdims=True), approx=False)
        p = jnp.where(mask, p, 0.0)                 # masked_fill(mask==0, 0.0)
        c = jnp.where(dia, jnp.dot(p, v, preferred_element_type=jnp.float32), 0.0)
        ctx = jnp.dot(sel, c, preferred_element_type=jnp.float32)    # (Tq, ADIM)
        return jnp.dot(ctx, P(o_name + ".w"),
                       preferred_element_type=jnp.float32) + P(o_name + ".b")

    # ---------------- encoder (input_layer="linear", pre-norm layers) ---------
    xs = xs_ref[0]                                  # (T, IDIM)
    h = lin(xs, "enc.embed")
    h = ln(h, "enc.embed_ln")                       # xscale folded into gamma/beta
    h = jnp.maximum(h, 0.0) + P("enc.pe")           # Dropout(0)=id; PosEnc add
    for i in range(ELAYERS):
        pre = "enc.%d." % i
        xn = ln(h, pre + "n1")
        qkv = lin(xn, pre + "qkv")                  # fused Q/K/V projection
        h = h + attend(qkv[:, :ADIM], qkv[:, ADIM:2 * ADIM], qkv[:, 2 * ADIM:],
                       enc_mask, rep_T, dia_T, sel_T, pre + "o")
        xn = ln(h, pre + "n2")
        h = h + ffn(xn, pre + "ff")
    memory = ln(h, "enc.after_norm")                # (T, ADIM)

    # ---------------- decoder ("embed" input layer, pre-norm layers) ----------
    d = d0_ref[0]                                   # xscale*emb + PE, done on host
    for i in range(DLAYERS):
        pre = "dec.%d." % i
        xn = ln(d, pre + "n1")
        qkv = lin(xn, pre + "qkv")
        d = d + attend(qkv[:, :ADIM], qkv[:, ADIM:2 * ADIM], qkv[:, 2 * ADIM:],
                       causal_mask, rep_L, dia_L, sel_L, pre + "self_o")
        xn = ln(d, pre + "n2")
        q = lin(xn, pre + "src_q")
        kv = lin(memory, pre + "src_kv")            # fused K/V projection of memory
        d = d + attend(q, kv[:, :ADIM], kv[:, ADIM:], mem_mask,
                       rep_L, dia_L, sel_L, pre + "src_o")
        xn = ln(d, pre + "n3")
        d = d + ffn(xn, pre + "ff")
    d = ln(d, "dec.after_norm")
    logits = lin(d, "dec.out")                      # (L1, ODIM)

    # ---------------- cross-entropy part of the label-smoothing KL ------------
    # Invalid rows of tdist were zeroed host-side; the constant entropy term
    # sum(t*log t) is added on the host.
    td = tdist_ref[0]                               # (L1, ODIM)
    m = jnp.max(logits, axis=-1, keepdims=True)
    lse = jnp.log(jnp.sum(jnp.exp(logits - m), axis=-1, keepdims=True)) + m
    ce = -jnp.sum(td * (logits - lse))
    # lane-dense broadcast store of the per-batch scalar.
    o_ref[...] = jnp.full((1, 1, 128), ce, jnp.float32)


# ----------------------------- JAX glue ---------------------------------------
def _pe_table(length, d):
    pos = jnp.arange(length, dtype=jnp.float32)[:, None]
    div = jnp.exp(jnp.arange(0, d, 2, dtype=jnp.float32) * (-math.log(10000.0) / d))
    pe = jnp.zeros((length, d), jnp.float32)
    pe = pe.at[:, 0::2].set(jnp.sin(pos * div))
    pe = pe.at[:, 1::2].set(jnp.cos(pos * div))
    return pe


def pack_params(params, T):
    """Pack all weights (+ encoder PE, xscale folds) into one (ROWS, 128) slab."""
    layout = {}
    chunks = []
    off = [0]

    def add(name, arr):
        a = np.asarray(arr, np.float32)
        if a.ndim == 1:
            a = a[None, :]
        r, c = a.shape
        r8 = ((r + 7) // 8) * 8                    # 8-sublane aligned rows
        buf = np.zeros((r8, 128), np.float32)
        buf[:r, :c] = a
        layout[name] = (off[0], r, c)
        chunks.append(buf)
        off[0] += r8

    def add_lin(name, p):
        add(name + ".w", p["w"])
        add(name + ".b", p["b"])

    def add_ln(name, p, scale=1.0):
        add(name + ".g", np.asarray(p["g"]) * scale)
        add(name + ".b", np.asarray(p["b"]) * scale)

    enc, dec = params["encoder"], params["decoder"]
    add_lin("enc.embed", enc["embed"])
    add_ln("enc.embed_ln", enc["embed_ln"], scale=XSCALE)   # fold PosEnc xscale
    add("enc.pe", _pe_table(T, ADIM))
    for i, lp in enumerate(enc["layers"]):
        pre = "enc.%d." % i
        add_ln(pre + "n1", lp["n1"])
        add_lin(pre + "qkv", lp["qkv"])
        add_lin(pre + "o", lp["o"])
        add_ln(pre + "n2", lp["n2"])
        add_lin(pre + "ff.w1", lp["ff_w1"])
        add_lin(pre + "ff.w2", lp["ff_w2"])
    add_ln("enc.after_norm", enc["after_norm"])
    for i, lp in enumerate(dec["layers"]):
        pre = "dec.%d." % i
        add_ln(pre + "n1", lp["n1"])
        add_lin(pre + "qkv", lp["qkv"])
        add_lin(pre + "self_o", lp["self_o"])
        add_ln(pre + "n2", lp["n2"])
        add_lin(pre + "src_q", lp["src_q"])
        add_lin(pre + "src_kv", lp["src_kv"])
        add_lin(pre + "src_o", lp["src_o"])
        add_ln(pre + "n3", lp["n3"])
        add_lin(pre + "ff.w1", lp["ff_w1"])
        add_lin(pre + "ff.w2", lp["ff_w2"])
    add_ln("dec.after_norm", dec["after_norm"])
    add_lin("dec.out", dec["out"])

    slab = jnp.asarray(np.concatenate(chunks, axis=0))
    return slab, layout


def e2e_forward(layout, slab, embed_scaled, xs_pad, ilens, ys_pad, ys_pad_src):
    """Mirrors E2E.forward with asr_weight=0, mt_weight=0, mtlalpha=0.

    xs_pad is constructed so Tmax == max(ilens) (static shapes), i.e. the
    `xs_pad[:, :max(ilens)]` slice is already applied.
    """
    del ys_pad_src  # unused: asr_weight == 0 -> forward_asr returns zeros
    B, T, _ = xs_pad.shape
    L = ys_pad.shape[1]
    L1 = L + 1
    sos = eos = ODIM - 1

    # ---- add_sos_eos (glue) ----
    lens = jnp.sum(ys_pad != IGNORE_ID, axis=1).astype(jnp.int32)
    ys_in = jnp.concatenate(
        [jnp.full((B, 1), sos, jnp.int32),
         jnp.where(ys_pad != IGNORE_ID, ys_pad, eos)], axis=1)      # padded with eos
    cols = jnp.arange(L1)[None, :]
    ys_ext = jnp.concatenate([ys_pad, jnp.full((B, 1), IGNORE_ID, jnp.int32)], axis=1)
    ys_out = jnp.where(cols < lens[:, None], ys_ext,
                       jnp.where(cols == lens[:, None], eos, IGNORE_ID))

    # decoder input: scaled embedding gather + positional encoding (host glue)
    d0 = embed_scaled[ys_in] + _pe_table(L1, ADIM)[None]            # (B, L1, ADIM)

    # label-smoothed target distribution; entropy term hoisted to the host and
    # invalid rows zeroed so the kernel computes just -sum(t * log_softmax).
    valid = ys_out != IGNORE_ID                                     # (B, L1)
    tt = jnp.where(valid, ys_out, 0)
    onehot = jax.nn.one_hot(tt, ODIM, dtype=jnp.float32)
    confidence = 1.0 - LSM_WEIGHT
    smooth = LSM_WEIGHT / (ODIM - 1)
    td_raw = onehot * confidence + (1.0 - onehot) * smooth          # no zeros
    ent = jnp.sum(jnp.where(valid[..., None], td_raw * jnp.log(td_raw), 0.0))
    true_dist = td_raw * valid[..., None].astype(jnp.float32)       # (B, L1, ODIM)

    grid_spec = pltpu.PrefetchScalarGridSpec(
        num_scalar_prefetch=1,                      # ilens -> SMEM scalars
        grid=(B,),
        in_specs=[
            pl.BlockSpec((1, T, IDIM), lambda b, *_: (b, 0, 0)),    # xs
            pl.BlockSpec((1, L1, ADIM), lambda b, *_: (b, 0, 0)),   # decoder input
            pl.BlockSpec((1, L1, ODIM), lambda b, *_: (b, 0, 0)),   # target dist
            pl.BlockSpec(slab.shape, lambda b, *_: (0, 0)),         # packed weights
        ],
        out_specs=pl.BlockSpec((1, 1, 128), lambda b, *_: (b, 0, 0)),
    )

    per_batch = pl.pallas_call(
        functools.partial(_e2e_kernel, layout),
        out_shape=jax.ShapeDtypeStruct((B, 1, 128), jnp.float32),
        grid_spec=grid_spec,
        compiler_params=pltpu.CompilerParams(dimension_semantics=("parallel",)),
    )(ilens.astype(jnp.int32), xs_pad, d0, true_dist, slab)

    # LabelSmoothingLoss with normalize_length=False -> denominator = batch size.
    loss_att = (jnp.sum(per_batch[:, 0, 0]) + ent) / B
    # self.loss = (1 - asr_weight - mt_weight) * loss_att + ... = loss_att
    return loss_att


# ----------------------------- parameter init --------------------------------
def _init_lin(key, din, dout):
    w = jax.random.normal(key, (din, dout), jnp.float32) * (1.0 / math.sqrt(din))
    return {"w": w, "b": jnp.zeros((1, dout), jnp.float32)}


def _init_ln(d=ADIM):
    return {"g": jnp.ones((1, d), jnp.float32), "b": jnp.zeros((1, d), jnp.float32)}


def init_params(key):
    keys = jax.random.split(key, 64)
    it = iter(keys)

    def lin(din, dout):
        return _init_lin(next(it), din, dout)

    enc = {
        "embed": lin(IDIM, ADIM),
        "embed_ln": _init_ln(),
        "layers": [
            {"n1": _init_ln(), "qkv": lin(ADIM, 3 * ADIM), "o": lin(ADIM, ADIM),
             "n2": _init_ln(), "ff_w1": lin(ADIM, EUNITS), "ff_w2": lin(EUNITS, ADIM)}
            for _ in range(ELAYERS)
        ],
        "after_norm": _init_ln(),
    }
    dec = {
        "embed": jax.random.normal(next(it), (ODIM, ADIM), jnp.float32) * (ADIM ** -0.5),
        "layers": [
            {"n1": _init_ln(), "qkv": lin(ADIM, 3 * ADIM), "self_o": lin(ADIM, ADIM),
             "n2": _init_ln(), "src_q": lin(ADIM, ADIM), "src_kv": lin(ADIM, 2 * ADIM),
             "src_o": lin(ADIM, ADIM), "n3": _init_ln(),
             "ff_w1": lin(ADIM, DUNITS), "ff_w2": lin(DUNITS, ADIM)}
            for _ in range(DLAYERS)
        ],
        "after_norm": _init_ln(),
        "out": lin(ADIM, ODIM),
    }
    return {"encoder": enc, "decoder": dec}


# ----------------------------- main -------------------------------------------
if __name__ == "__main__":
    key = jax.random.PRNGKey(0)
    kp, kx, ky, kys = jax.random.split(key, 4)

    params = init_params(kp)

    B, T, L = 2, 10, 8
    xs_pad = jax.random.normal(kx, (B, T, IDIM), jnp.float32)
    ilens = jnp.array([10, 7], jnp.int32)          # Tmax == max(ilens)
    # zero out padded frames (as padded speech features would be)
    xs_pad = xs_pad * (jnp.arange(T)[None, :, None] < ilens[:, None, None])

    def make_tokens(k, lengths):
        toks = jax.random.randint(k, (B, L), 0, ODIM - 1, dtype=jnp.int32)
        valid = jnp.arange(L)[None, :] < jnp.array(lengths)[:, None]
        return jnp.where(valid, toks, IGNORE_ID)

    ys_pad = make_tokens(ky, [8, 5])
    ys_pad_src = make_tokens(kys, [7, 6])

    # one-time host-side packing of all weights into a single VMEM slab
    slab, layout = pack_params(params, T)
    embed_scaled = params["decoder"]["embed"] * XSCALE   # fold PosEnc xscale

    fwd = jax.jit(functools.partial(e2e_forward, layout))
    loss = jax.block_until_ready(fwd(slab, embed_scaled, xs_pad, ilens, ys_pad, ys_pad_src))
    assert loss.shape == () and bool(jnp.isfinite(loss))
    print("KERNEL_OK")
</pallas_src>

<mosaic_0001>
module attributes {stable_mosaic.version = 11 : i64} {
  func.func @_e2e_kernel(%arg0: i32, %arg1: memref<2xi32, #tpu.memory_space<smem>>, %arg2: memref<1x10x16xf32, #tpu.memory_space<vmem>>, %arg3: memref<1x9x32xf32, #tpu.memory_space<vmem>>, %arg4: memref<1x9x12xf32, #tpu.memory_space<vmem>>, %arg5: memref<1296x128xf32, #tpu.memory_space<vmem>>, %arg6: memref<1x1x128xf32, #tpu.memory_space<vmem>>) attributes {dimension_semantics = [#tpu.dimension_semantics<parallel>], iteration_bounds = array<i64: 2>, scalar_prefetch = 1 : i64, scratch_operands = 0 : i64, tpu.core_type = #tpu.core_type<tc>, window_params = [{transform_indices = @transform_0, window_bounds = array<i64: 1, 10, 16>}, {transform_indices = @transform_1, window_bounds = array<i64: 1, 9, 32>}, {transform_indices = @transform_2, window_bounds = array<i64: 1, 9, 12>}, {pipeline_mode = #tpu.pipeline_mode<synchronous>, transform_indices = @transform_3, window_bounds = array<i64: 1296, 128>}, {transform_indices = @transform_4, window_bounds = array<i64: 1, 1, 128>}]} {
    %0 = arith.index_cast %arg0 : i32 to index
    %1 = memref.load %arg1[%0] : memref<2xi32, #tpu.memory_space<smem>>
    %2 = tpu.iota {dimensions = array<i32: 0>} : vector<40x10xi32>
    %3 = tpu.iota {dimensions = array<i32: 1>} : vector<40x10xi32>
    %4 = arith.cmpi eq, %2, %3 : vector<40x10xi32>
    %c10_i32 = arith.constant 10 : i32
    %5 = vector.broadcast %c10_i32 : i32 to vector<40x10xi32>
    %6 = arith.addi %3, %5 : vector<40x10xi32>
    %7 = arith.cmpi eq, %2, %6 : vector<40x10xi32>
    %8 = arith.ori %4, %7 : vector<40x10xi1>
    %c20_i32 = arith.constant 20 : i32
    %9 = vector.broadcast %c20_i32 : i32 to vector<40x10xi32>
    %10 = arith.addi %3, %9 : vector<40x10xi32>
    %11 = arith.cmpi eq, %2, %10 : vector<40x10xi32>
    %12 = arith.ori %8, %11 : vector<40x10xi1>
    %c30_i32 = arith.constant 30 : i32
    %13 = vector.broadcast %c30_i32 : i32 to vector<40x10xi32>
    %14 = arith.addi %3, %13 : vector<40x10xi32>
    %15 = arith.cmpi eq, %2, %14 : vector<40x10xi32>
    %16 = arith.ori %12, %15 : vector<40x10xi1>
    %17 = tpu.iota {dimensions = array<i32: 0>} : vector<10x40xi32>
    %18 = tpu.iota {dimensions = array<i32: 1>} : vector<10x40xi32>
    %19 = arith.cmpi eq, %18, %17 : vector<10x40xi32>
    %c10_i32_0 = arith.constant 10 : i32
    %20 = vector.broadcast %c10_i32_0 : i32 to vector<10x40xi32>
    %21 = arith.addi %17, %20 : vector<10x40xi32>
    %22 = arith.cmpi eq, %18, %21 : vector<10x40xi32>
    %23 = arith.ori %19, %22 : vector<10x40xi1>
    %c20_i32_1 = arith.constant 20 : i32
    %24 = vector.broadcast %c20_i32_1 : i32 to vector<10x40xi32>
    %25 = arith.addi %17, %24 : vector<10x40xi32>
    %26 = arith.cmpi eq, %18, %25 : vector<10x40xi32>
    %27 = arith.ori %23, %26 : vector<10x40xi1>
    %c30_i32_2 = arith.constant 30 : i32
    %28 = vector.broadcast %c30_i32_2 : i32 to vector<10x40xi32>
    %29 = arith.addi %17, %28 : vector<10x40xi32>
    %30 = arith.cmpi eq, %18, %29 : vector<10x40xi32>
    %31 = arith.ori %27, %30 : vector<10x40xi1>
    %32 = tpu.iota {dimensions = array<i32: 0>} : vector<40x32xi32>
    %33 = tpu.iota {dimensions = array<i32: 1>} : vector<40x32xi32>
    %c0_i32 = arith.constant 0 : i32
    %34 = vector.broadcast %c0_i32 : i32 to vector<40x32xi32>
    %c0_i32_3 = arith.constant 0 : i32
    %35 = vector.broadcast %c0_i32_3 : i32 to vector<40x32xi32>
    %c10_i32_4 = arith.constant 10 : i32
    %36 = vector.broadcast %c10_i32_4 : i32 to vector<40x32xi32>
    %37 = arith.cmpi sge, %32, %36 : vector<40x32xi32>
    %38 = arith.extui %37 : vector<40x32xi1> to vector<40x32xi32>
    %39 = arith.addi %34, %38 : vector<40x32xi32>
    %c8_i32 = arith.constant 8 : i32
    %40 = vector.broadcast %c8_i32 : i32 to vector<40x32xi32>
    %41 = arith.cmpi sge, %33, %40 : vector<40x32xi32>
    %42 = arith.extui %41 : vector<40x32xi1> to vector<40x32xi32>
    %43 = arith.addi %35, %42 : vector<40x32xi32>
    %c20_i32_5 = arith.constant 20 : i32
    %44 = vector.broadcast %c20_i32_5 : i32 to vector<40x32xi32>
    %45 = arith.cmpi sge, %32, %44 : vector<40x32xi32>
    %46 = arith.extui %45 : vector<40x32xi1> to vector<40x32xi32>
    %47 = arith.addi %39, %46 : vector<40x32xi32>
    %c16_i32 = arith.constant 16 : i32
    %48 = vector.broadcast %c16_i32 : i32 to vector<40x32xi32>
    %49 = arith.cmpi sge, %33, %48 : vector<40x32xi32>
    %50 = arith.extui %49 : vector<40x32xi1> to vector<40x32xi32>
    %51 = arith.addi %43, %50 : vector<40x32xi32>
    %c30_i32_6 = arith.constant 30 : i32
    %52 = vector.broadcast %c30_i32_6 : i32 to vector<40x32xi32>
    %53 = arith.cmpi sge, %32, %52 : vector<40x32xi32>
    %54 = arith.extui %53 : vector<40x32xi1> to vector<40x32xi32>
    %55 = arith.addi %47, %54 : vector<40x32xi32>
    %c24_i32 = arith.constant 24 : i32
    %56 = vector.broadcast %c24_i32 : i32 to vector<40x32xi32>
    %57 = arith.cmpi sge, %33, %56 : vector<40x32xi32>
    %58 = arith.extui %57 : vector<40x32xi1> to vector<40x32xi32>
    %59 = arith.addi %51, %58 : vector<40x32xi32>
    %60 = arith.cmpi eq, %55, %59 : vector<40x32xi32>
    %61 = arith.extui %16 : vector<40x10xi1> to vector<40x10xi32>
    %62 = arith.sitofp %61 : vector<40x10xi32> to vector<40x10xf32>
    %63 = arith.extui %31 : vector<10x40xi1> to vector<10x40xi32>
    %64 = arith.sitofp %63 : vector<10x40xi32> to vector<10x40xf32>
    %65 = tpu.iota {dimensions = array<i32: 0>} : vector<36x9xi32>
    %66 = tpu.iota {dimensions = array<i32: 1>} : vector<36x9xi32>
    %67 = arith.cmpi eq, %65, %66 : vector<36x9xi32>
    %c9_i32 = arith.constant 9 : i32
    %68 = vector.broadcast %c9_i32 : i32 to vector<36x9xi32>
    %69 = arith.addi %66, %68 : vector<36x9xi32>
    %70 = arith.cmpi eq, %65, %69 : vector<36x9xi32>
    %71 = arith.ori %67, %70 : vector<36x9xi1>
    %c18_i32 = arith.constant 18 : i32
    %72 = vector.broadcast %c18_i32 : i32 to vector<36x9xi32>
    %73 = arith.addi %66, %72 : vector<36x9xi32>
    %74 = arith.cmpi eq, %65, %73 : vector<36x9xi32>
    %75 = arith.ori %71, %74 : vector<36x9xi1>
    %c27_i32 = arith.constant 27 : i32
    %76 = vector.broadcast %c27_i32 : i32 to vector<36x9xi32>
    %77 = arith.addi %66, %76 : vector<36x9xi32>
    %78 = arith.cmpi eq, %65, %77 : vector<36x9xi32>
    %79 = arith.ori %75, %78 : vector<36x9xi1>
    %80 = tpu.iota {dimensions = array<i32: 0>} : vector<9x36xi32>
    %81 = tpu.iota {dimensions = array<i32: 1>} : vector<9x36xi32>
    %82 = arith.cmpi eq, %81, %80 : vector<9x36xi32>
    %c9_i32_7 = arith.constant 9 : i32
    %83 = vector.broadcast %c9_i32_7 : i32 to vector<9x36xi32>
    %84 = arith.addi %80, %83 : vector<9x36xi32>
    %85 = arith.cmpi eq, %81, %84 : vector<9x36xi32>
    %86 = arith.ori %82, %85 : vector<9x36xi1>
    %c18_i32_8 = arith.constant 18 : i32
    %87 = vector.broadcast %c18_i32_8 : i32 to vector<9x36xi32>
    %88 = arith.addi %80, %87 : vector<9x36xi32>
    %89 = arith.cmpi eq, %81, %88 : vector<9x36xi32>
    %90 = arith.ori %86, %89 : vector<9x36xi1>
    %c27_i32_9 = arith.constant 27 : i32
    %91 = vector.broadcast %c27_i32_9 : i32 to vector<9x36xi32>
    %92 = arith.addi %80, %91 : vector<9x36xi32>
    %93 = arith.cmpi eq, %81, %92 : vector<9x36xi32>
    %94 = arith.ori %90, %93 : vector<9x36xi1>
    %95 = tpu.iota {dimensions = array<i32: 0>} : vector<36x32xi32>
    %96 = tpu.iota {dimensions = array<i32: 1>} : vector<36x32xi32>
    %c0_i32_10 = arith.constant 0 : i32
    %97 = vector.broadcast %c0_i32_10 : i32 to vector<36x32xi32>
    %c0_i32_11 = arith.constant 0 : i32
    %98 = vector.broadcast %c0_i32_11 : i32 to vector<36x32xi32>
    %c9_i32_12 = arith.constant 9 : i32
    %99 = vector.broadcast %c9_i32_12 : i32 to vector<36x32xi32>
    %100 = arith.cmpi sge, %95, %99 : vector<36x32xi32>
    %101 = arith.extui %100 : vector<36x32xi1> to vector<36x32xi32>
    %102 = arith.addi %97, %101 : vector<36x32xi32>
    %c8_i32_13 = arith.constant 8 : i32
    %103 = vector.broadcast %c8_i32_13 : i32 to vector<36x32xi32>
    %104 = arith.cmpi sge, %96, %103 : vector<36x32xi32>
    %105 = arith.extui %104 : vector<36x32xi1> to vector<36x32xi32>
    %106 = arith.addi %98, %105 : vector<36x32xi32>
    %c18_i32_14 = arith.constant 18 : i32
    %107 = vector.broadcast %c18_i32_14 : i32 to vector<36x32xi32>
    %108 = arith.cmpi sge, %95, %107 : vector<36x32xi32>
    %109 = arith.extui %108 : vector<36x32xi1> to vector<36x32xi32>
    %110 = arith.addi %102, %109 : vector<36x32xi32>
    %c16_i32_15 = arith.constant 16 : i32
    %111 = vector.broadcast %c16_i32_15 : i32 to vector<36x32xi32>
    %112 = arith.cmpi sge, %96, %111 : vector<36x32xi32>
    %113 = arith.extui %112 : vector<36x32xi1> to vector<36x32xi32>
    %114 = arith.addi %106, %113 : vector<36x32xi32>
    %c27_i32_16 = arith.constant 27 : i32
    %115 = vector.broadcast %c27_i32_16 : i32 to vector<36x32xi32>
    %116 = arith.cmpi sge, %95, %115 : vector<36x32xi32>
    %117 = arith.extui %116 : vector<36x32xi1> to vector<36x32xi32>
    %118 = arith.addi %110, %117 : vector<36x32xi32>
    %c24_i32_17 = arith.constant 24 : i32
    %119 = vector.broadcast %c24_i32_17 : i32 to vector<36x32xi32>
    %120 = arith.cmpi sge, %96, %119 : vector<36x32xi32>
    %121 = arith.extui %120 : vector<36x32xi1> to vector<36x32xi32>
    %122 = arith.addi %114, %121 : vector<36x32xi32>
    %123 = arith.cmpi eq, %118, %122 : vector<36x32xi32>
    %124 = tpu.iota {dimensions = array<i32: 0>} : vector<36x1xi32>
    %c0_i32_18 = arith.constant 0 : i32
    %125 = vector.broadcast %c0_i32_18 : i32 to vector<36x1xi32>
    %c9_i32_19 = arith.constant 9 : i32
    %126 = vector.broadcast %c9_i32_19 : i32 to vector<36x1xi32>
    %127 = arith.cmpi sge, %124, %126 : vector<36x1xi32>
    %128 = arith.extui %127 : vector<36x1xi1> to vector<36x1xi32>
    %129 = arith.addi %125, %128 : vector<36x1xi32>
    %c18_i32_20 = arith.constant 18 : i32
    %130 = vector.broadcast %c18_i32_20 : i32 to vector<36x1xi32>
    %131 = arith.cmpi sge, %124, %130 : vector<36x1xi32>
    %132 = arith.extui %131 : vector<36x1xi1> to vector<36x1xi32>
    %133 = arith.addi %129, %132 : vector<36x1xi32>
    %c27_i32_21 = arith.constant 27 : i32
    %134 = vector.broadcast %c27_i32_21 : i32 to vector<36x1xi32>
    %135 = arith.cmpi sge, %124, %134 : vector<36x1xi32>
    %136 = arith.extui %135 : vector<36x1xi1> to vector<36x1xi32>
    %137 = arith.addi %133, %136 : vector<36x1xi32>
    %c9_i32_22 = arith.constant 9 : i32
    %138 = vector.broadcast %c9_i32_22 : i32 to vector<36x1xi32>
    %139 = arith.muli %138, %137 : vector<36x1xi32>
    %140 = arith.subi %124, %139 : vector<36x1xi32>
    %141 = arith.extui %79 : vector<36x9xi1> to vector<36x9xi32>
    %142 = arith.sitofp %141 : vector<36x9xi32> to vector<36x9xf32>
    %143 = arith.extui %94 : vector<9x36xi1> to vector<9x36xi32>
    %144 = arith.sitofp %143 : vector<9x36xi32> to vector<9x36xf32>
    %145 = tpu.iota {dimensions = array<i32: 1>} : vector<40x10xi32>
    %146 = vector.broadcast %1 : i32 to vector<40x10xi32>
    %147 = arith.cmpi slt, %145, %146 : vector<40x10xi32>
    %148 = tpu.iota {dimensions = array<i32: 1>} : vector<36x9xi32>
    %149 = vector.broadcast %140 : vector<36x1xi32> to vector<36x9xi32>
    %150 = arith.cmpi sle, %148, %149 : vector<36x9xi32>
    %151 = tpu.iota {dimensions = array<i32: 1>} : vector<36x10xi32>
    %152 = vector.broadcast %1 : i32 to vector<36x10xi32>
    %153 = arith.cmpi slt, %151, %152 : vector<36x10xi32>
    %c0 = arith.constant 0 : index
    %c0_23 = arith.constant 0 : index
    %c0_24 = arith.constant 0 : index
    %154 = vector.load %arg2[%c0, %c0_23, %c0_24] : memref<1x10x16xf32, #tpu.memory_space<vmem>>, vector<1x10x16xf32>
    %155 = vector.shape_cast %154 : vector<1x10x16xf32> to vector<10x16xf32>
    %c0_25 = arith.constant 0 : index
    %c0_26 = arith.constant 0 : index
    %156 = vector.load %arg5[%c0_25, %c0_26] : memref<1296x128xf32, #tpu.memory_space<vmem>>, vector<16x32xf32>
    %cst = arith.constant dense<0.000000e+00> : vector<10x32xf32>
    %157 = tpu.matmul %155, %156, %cst {dimension_numbers = #tpu.dot_dimension_numbers<[1], [0], [0], [1], [0, 0, 1, 1], [], []>} : vector<10x16xf32>, vector<16x32xf32>, vector<10x32xf32> -> vector<10x32xf32>
    %c16 = arith.constant 16 : index
    %c0_27 = arith.constant 0 : index
    %158 = vector.load %arg5[%c16, %c0_27] : memref<1296x128xf32, #tpu.memory_space<vmem>>, vector<1x32xf32>
    %159 = vector.broadcast %158 : vector<1x32xf32> to vector<10x32xf32>
    %160 = arith.addf %157, %159 : vector<10x32xf32>
    %cst_28 = arith.constant dense<0.000000e+00> : vector<10xf32>
    %161 = vector.multi_reduction <add>, %160, %cst_28 [1] : vector<10x32xf32> to vector<10xf32>
    %162 = vector.shape_cast %161 : vector<10xf32> to vector<10x1xf32>
    %cst_29 = arith.constant 3.200000e+01 : f32
    %163 = vector.broadcast %cst_29 : f32 to vector<10x1xf32>
    %164 = arith.divf %162, %163 : vector<10x1xf32>
    %165 = vector.broadcast %164 : vector<10x1xf32> to vector<10x32xf32>
    %166 = arith.subf %160, %165 : vector<10x32xf32>
    %167 = arith.mulf %166, %166 : vector<10x32xf32>
    %cst_30 = arith.constant dense<0.000000e+00> : vector<10xf32>
    %168 = vector.multi_reduction <add>, %167, %cst_30 [1] : vector<10x32xf32> to vector<10xf32>
    %169 = vector.shape_cast %168 : vector<10xf32> to vector<10x1xf32>
    %cst_31 = arith.constant 3.200000e+01 : f32
    %170 = vector.broadcast %cst_31 : f32 to vector<10x1xf32>
    %171 = arith.divf %169, %170 : vector<10x1xf32>
    %172 = vector.broadcast %164 : vector<10x1xf32> to vector<10x32xf32>
    %173 = arith.subf %160, %172 : vector<10x32xf32>
    %cst_32 = arith.constant 9.99999996E-13 : f32
    %174 = vector.broadcast %cst_32 : f32 to vector<10x1xf32>
    %175 = arith.addf %171, %174 : vector<10x1xf32>
    %176 = math.rsqrt %175 : vector<10x1xf32>
    %177 = vector.broadcast %176 : vector<10x1xf32> to vector<10x32xf32>
    %178 = arith.mulf %173, %177 : vector<10x32xf32>
    %c24 = arith.constant 24 : index
    %c0_33 = arith.constant 0 : index
    %179 = vector.load %arg5[%c24, %c0_33] : memref<1296x128xf32, #tpu.memory_space<vmem>>, vector<1x32xf32>
    %180 = vector.broadcast %179 : vector<1x32xf32> to vector<10x32xf32>
    %181 = arith.mulf %178, %180 : vector<10x32xf32>
    %c32 = arith.constant 32 : index
    %c0_34 = arith.constant 0 : index
    %182 = vector.load %arg5[%c32, %c0_34] : memref<1296x128xf32, #tpu.memory_space<vmem>>, vector<1x32xf32>
    %183 = vector.broadcast %182 : vector<1x32xf32> to vector<10x32xf32>
    %184 = arith.addf %181, %183 : vector<10x32xf32>
    %cst_35 = arith.constant 0.000000e+00 : f32
    %185 = vector.broadcast %cst_35 : f32 to vector<10x32xf32>
    %186 = arith.maximumf %184, %185 : vector<10x32xf32>
    %c40 = arith.constant 40 : index
    %c0_36 = arith.constant 0 : index
    %187 = vector.load %arg5[%c40, %c0_36] : memref<1296x128xf32, #tpu.memory_space<vmem>>, vector<10x32xf32>
    %188 = arith.addf %186, %187 : vector<10x32xf32>
    %cst_37 = arith.constant dense<0.000000e+00> : vector<10xf32>
    %189 = vector.multi_reduction <add>, %188, %cst_37 [1] : vector<10x32xf32> to vector<10xf32>
    %190 = vector.shape_cast %189 : vector<10xf32> to vector<10x1xf32>
    %cst_38 = arith.constant 3.200000e+01 : f32
    %191 = vector.broadcast %cst_38 : f32 to vector<10x1xf32>
    %192 = arith.divf %190, %191 : vector<10x1xf32>
    %193 = vector.broadcast %192 : vector<10x1xf32> to vector<10x32xf32>
    %194 = arith.subf %188, %193 : vector<10x32xf32>
    %195 = arith.mulf %194, %194 : vector<10x32xf32>
    %cst_39 = arith.constant dense<0.000000e+00> : vector<10xf32>
    %196 = vector.multi_reduction <add>, %195, %cst_39 [1] : vector<10x32xf32> to vector<10xf32>
    %197 = vector.shape_cast %196 : vector<10xf32> to vector<10x1xf32>
    %cst_40 = arith.constant 3.200000e+01 : f32
    %198 = vector.broadcast %cst_40 : f32 to vector<10x1xf32>
    %199 = arith.divf %197, %198 : vector<10x1xf32>
    %200 = vector.broadcast %192 : vector<10x1xf32> to vector<10x32xf32>
    %201 = arith.subf %188, %200 : vector<10x32xf32>
    %cst_41 = arith.constant 9.99999996E-13 : f32
    %202 = vector.broadcast %cst_41 : f32 to vector<10x1xf32>
    %203 = arith.addf %199, %202 : vector<10x1xf32>
    %204 = math.rsqrt %203 : vector<10x1xf32>
    %205 = vector.broadcast %204 : vector<10x1xf32> to vector<10x32xf32>
    %206 = arith.mulf %201, %205 : vector<10x32xf32>
    %c56 = arith.constant 56 : index
    %c0_42 = arith.constant 0 : index
    %207 = vector.load %arg5[%c56, %c0_42] : memref<1296x128xf32, #tpu.memory_space<vmem>>, vector<1x32xf32>
    %208 = vector.broadcast %207 : vector<1x32xf32> to vector<10x32xf32>
    %209 = arith.mulf %206, %208 : vector<10x32xf32>
    %c64 = arith.constant 64 : index
    %c0_43 = arith.constant 0 : index
    %210 = vector.load %arg5[%c64, %c0_43] : memref<1296x128xf32, #tpu.memory_space<vmem>>, vector<1x32xf32>
    %211 = vector.broadcast %210 : vector<1x32xf32> to vector<10x32xf32>
    %212 = arith.addf %209, %211 : vector<10x32xf32>
    %c72 = arith.constant 72 : index
    %c0_44 = arith.constant 0 : index
    %213 = vector.load %arg5[%c72, %c0_44] : memref<1296x128xf32, #tpu.memory_space<vmem>>, vector<32x96xf32>
    %cst_45 = arith.constant dense<0.000000e+00> : vector<10x96xf32>
    %214 = tpu.matmul %212, %213, %cst_45 {dimension_numbers = #tpu.dot_dimension_numbers<[1], [0], [0], [1], [0, 0, 1, 1], [], []>} : vector<10x32xf32>, vector<32x96xf32>, vector<10x96xf32> -> vector<10x96xf32>
    %c104 = arith.constant 104 : index
    %c0_46 = arith.constant 0 : index
    %215 = vector.load %arg5[%c104, %c0_46] : memref<1296x128xf32, #tpu.memory_space<vmem>>, vector<1x96xf32>
    %216 = vector.broadcast %215 : vector<1x96xf32> to vector<10x96xf32>
    %217 = arith.addf %214, %216 : vector<10x96xf32>
    %218 = vector.extract_strided_slice %217 {offsets = [0, 0], sizes = [10, 32], strides = [1, 1]} : vector<10x96xf32> to vector<10x32xf32>
    %219 = vector.extract_strided_slice %217 {offsets = [0, 32], sizes = [10, 32], strides = [1, 1]} : vector<10x96xf32> to vector<10x32xf32>
    %220 = vector.extract_strided_slice %217 {offsets = [0, 64], sizes = [10, 32], strides = [1, 1]} : vector<10x96xf32> to vector<10x32xf32>
    %cst_47 = arith.constant dense<0.000000e+00> : vector<40x32xf32>
    %221 = tpu.matmul %62, %218, %cst_47 {dimension_numbers = #tpu.dot_dimension_numbers<[1], [0], [0], [1], [0, 0, 1, 1], [], []>} : vector<40x10xf32>, vector<10x32xf32>, vector<40x32xf32> -> vector<40x32xf32>
    %cst_48 = arith.constant 0.000000e+00 : f32
    %222 = vector.broadcast %cst_48 : f32 to vector<40x32xf32>
    %223 = arith.select %60, %221, %222 : vector<40x32xi1>, vector<40x32xf32>
    %cst_49 = arith.constant dense<0.000000e+00> : vector<40x10xf32>
    %224 = tpu.matmul %223, %219, %cst_49 {dimension_numbers = #tpu.dot_dimension_numbers<[1], [1], [0], [0], [0, 0, 1, 0], [], []>} : vector<40x32xf32>, vector<10x32xf32>, vector<40x10xf32> -> vector<40x10xf32>
    %cst_50 = arith.constant 0.353553385 : f32
    %225 = vector.broadcast %cst_50 : f32 to vector<40x10xf32>
    %226 = arith.mulf %224, %225 : vector<40x10xf32>
    %cst_51 = arith.constant -3.40282347E+38 : f32
    %227 = vector.broadcast %cst_51 : f32 to vector<40x10xf32>
    %228 = arith.select %147, %226, %227 : vector<40x10xi1>, vector<40x10xf32>
    %cst_52 = arith.constant dense<0xFF800000> : vector<40xf32>
    %229 = vector.multi_reduction <maximumf>, %228, %cst_52 [1] : vector<40x10xf32> to vector<40xf32>
    %230 = vector.shape_cast %229 : vector<40xf32> to vector<40x1xf32>
    %231 = vector.broadcast %230 : vector<40x1xf32> to vector<40x10xf32>
    %232 = arith.subf %228, %231 : vector<40x10xf32>
    %233 = math.exp %232 : vector<40x10xf32>
    %cst_53 = arith.constant dense<0.000000e+00> : vector<40xf32>
    %234 = vector.multi_reduction <add>, %233, %cst_53 [1] : vector<40x10xf32> to vector<40xf32>
    %235 = vector.shape_cast %234 : vector<40xf32> to vector<40x1xf32>
    %236 = tpu.reciprocal %235 : vector<40x1xf32> -> vector<40x1xf32>
    %237 = vector.broadcast %236 : vector<40x1xf32> to vector<40x10xf32>
    %238 = arith.mulf %233, %237 : vector<40x10xf32>
    %cst_54 = arith.constant 0.000000e+00 : f32
    %239 = vector.broadcast %cst_54 : f32 to vector<40x10xf32>
    %240 = arith.select %147, %238, %239 : vector<40x10xi1>, vector<40x10xf32>
    %cst_55 = arith.constant dense<0.000000e+00> : vector<40x32xf32>
    %241 = tpu.matmul %240, %220, %cst_55 {dimension_numbers = #tpu.dot_dimension_numbers<[1], [0], [0], [1], [0, 0, 1, 1], [], []>} : vector<40x10xf32>, vector<10x32xf32>, vector<40x32xf32> -> vector<40x32xf32>
    %cst_56 = arith.constant 0.000000e+00 : f32
    %242 = vector.broadcast %cst_56 : f32 to vector<40x32xf32>
    %243 = arith.select %60, %241, %242 : vector<40x32xi1>, vector<40x32xf32>
    %cst_57 = arith.constant dense<0.000000e+00> : vector<10x32xf32>
    %244 = tpu.matmul %64, %243, %cst_57 {dimension_numbers = #tpu.dot_dimension_numbers<[1], [0], [0], [1], [0, 0, 1, 1], [], []>} : vector<10x40xf32>, vector<40x32xf32>, vector<10x32xf32> -> vector<10x32xf32>
    %c112 = arith.constant 112 : index
    %c0_58 = arith.constant 0 : index
    %245 = vector.load %arg5[%c112, %c0_58] : memref<1296x128xf32, #tpu.memory_space<vmem>>, vector<32x32xf32>
    %cst_59 = arith.constant dense<0.000000e+00> : vector<10x32xf32>
    %246 = tpu.matmul %244, %245, %cst_59 {dimension_numbers = #tpu.dot_dimension_numbers<[1], [0], [0], [1], [0, 0, 1, 1], [], []>} : vector<10x32xf32>, vector<32x32xf32>, vector<10x32xf32> -> vector<10x32xf32>
    %c144 = arith.constant 144 : index
    %c0_60 = arith.constant 0 : index
    %247 = vector.load %arg5[%c144, %c0_60] : memref<1296x128xf32, #tpu.memory_space<vmem>>, vector<1x32xf32>
    %248 = vector.broadcast %247 : vector<1x32xf32> to vector<10x32xf32>
    %249 = arith.addf %246, %248 : vector<10x32xf32>
    %250 = arith.addf %188, %249 : vector<10x32xf32>
    %cst_61 = arith.constant dense<0.000000e+00> : vector<10xf32>
    %251 = vector.multi_reduction <add>, %250, %cst_61 [1] : vector<10x32xf32> to vector<10xf32>
    %252 = vector.shape_cast %251 : vector<10xf32> to vector<10x1xf32>
    %cst_62 = arith.constant 3.200000e+01 : f32
    %253 = vector.broadcast %cst_62 : f32 to vector<10x1xf32>
    %254 = arith.divf %252, %253 : vector<10x1xf32>
    %255 = vector.broadcast %254 : vector<10x1xf32> to vector<10x32xf32>
    %256 = arith.subf %250, %255 : vector<10x32xf32>
    %257 = arith.mulf %256, %256 : vector<10x32xf32>
    %cst_63 = arith.constant dense<0.000000e+00> : vector<10xf32>
    %258 = vector.multi_reduction <add>, %257, %cst_63 [1] : vector<10x32xf32> to vector<10xf32>
    %259 = vector.shape_cast %258 : vector<10xf32> to vector<10x1xf32>
    %cst_64 = arith.constant 3.200000e+01 : f32
    %260 = vector.broadcast %cst_64 : f32 to vector<10x1xf32>
    %261 = arith.divf %259, %260 : vector<10x1xf32>
    %262 = vector.broadcast %254 : vector<10x1xf32> to vector<10x32xf32>
    %263 = arith.subf %250, %262 : vector<10x32xf32>
    %cst_65 = arith.constant 9.99999996E-13 : f32
    %264 = vector.broadcast %cst_65 : f32 to vector<10x1xf32>
    %265 = arith.addf %261, %264 : vector<10x1xf32>
    %266 = math.rsqrt %265 : vector<10x1xf32>
    %267 = vector.broadcast %266 : vector<10x1xf32> to vector<10x32xf32>
    %268 = arith.mulf %263, %267 : vector<10x32xf32>
    %c152 = arith.constant 152 : index
    %c0_66 = arith.constant 0 : index
    %269 = vector.load %arg5[%c152, %c0_66] : memref<1296x128xf32, #tpu.memory_space<vmem>>, vector<1x32xf32>
    %270 = vector.broadcast %269 : vector<1x32xf32> to vector<10x32xf32>
    %271 = arith.mulf %268, %270 : vector<10x32xf32>
    %c160 = arith.constant 160 : index
    %c0_67 = arith.constant 0 : index
    %272 = vector.load %arg5[%c160, %c0_67] : memref<1296x128xf32, #tpu.memory_space<vmem>>, vector<1x32xf32>
    %273 = vector.broadcast %272 : vector<1x32xf32> to vector<10x32xf32>
    %274 = arith.addf %271, %273 : vector<10x32xf32>
    %c168 = arith.constant 168 : index
    %c0_68 = arith.constant 0 : index
    %275 = vector.load %arg5[%c168, %c0_68] : memref<1296x128xf32, #tpu.memory_space<vmem>>, vector<32x64xf32>
    %cst_69 = arith.constant dense<0.000000e+00> : vector<10x64xf32>
    %276 = tpu.matmul %274, %275, %cst_69 {dimension_numbers = #tpu.dot_dimension_numbers<[1], [0], [0], [1], [0, 0, 1, 1], [], []>} : vector<10x32xf32>, vector<32x64xf32>, vector<10x64xf32> -> vector<10x64xf32>
    %c200 = arith.constant 200 : index
    %c0_70 = arith.constant 0 : index
    %277 = vector.load %arg5[%c200, %c0_70] : memref<1296x128xf32, #tpu.memory_space<vmem>>, vector<1x64xf32>
    %278 = vector.broadcast %277 : vector<1x64xf32> to vector<10x64xf32>
    %279 = arith.addf %276, %278 : vector<10x64xf32>
    %cst_71 = arith.constant 0.000000e+00 : f32
    %280 = vector.broadcast %cst_71 : f32 to vector<10x64xf32>
    %281 = arith.maximumf %279, %280 : vector<10x64xf32>
    %c208 = arith.constant 208 : index
    %c0_72 = arith.constant 0 : index
    %282 = vector.load %arg5[%c208, %c0_72] : memref<1296x128xf32, #tpu.memory_space<vmem>>, vector<64x32xf32>
    %cst_73 = arith.constant dense<0.000000e+00> : vector<10x32xf32>
    %283 = tpu.matmul %281, %282, %cst_73 {dimension_numbers = #tpu.dot_dimension_numbers<[1], [0], [0], [1], [0, 0, 1, 1], [], []>} : vector<10x64xf32>, vector<64x32xf32>, vector<10x32xf32> -> vector<10x32xf32>
    %c272 = arith.constant 272 : index
    %c0_74 = arith.constant 0 : index
    %284 = vector.load %arg5[%c272, %c0_74] : memref<1296x128xf32, #tpu.memory_space<vmem>>, vector<1x32xf32>
    %285 = vector.broadcast %284 : vector<1x32xf32> to vector<10x32xf32>
    %286 = arith.addf %283, %285 : vector<10x32xf32>
    %287 = arith.addf %250, %286 : vector<10x32xf32>
    %cst_75 = arith.constant dense<0.000000e+00> : vector<10xf32>
    %288 = vector.multi_reduction <add>, %287, %cst_75 [1] : vector<10x32xf32> to vector<10xf32>
    %289 = vector.shape_cast %288 : vector<10xf32> to vector<10x1xf32>
    %cst_76 = arith.constant 3.200000e+01 : f32
    %290 = vector.broadcast %cst_76 : f32 to vector<10x1xf32>
    %291 = arith.divf %289, %290 : vector<10x1xf32>
    %292 = vector.broadcast %291 : vector<10x1xf32> to vector<10x32xf32>
    %293 = arith.subf %287, %292 : vector<10x32xf32>
    %294 = arith.mulf %293, %293 : vector<10x32xf32>
    %cst_77 = arith.constant dense<0.000000e+00> : vector<10xf32>
    %295 = vector.multi_reduction <add>, %294, %cst_77 [1] : vector<10x32xf32> to vector<10xf32>
    %296 = vector.shape_cast %295 : vector<10xf32> to vector<10x1xf32>
    %cst_78 = arith.constant 3.200000e+01 : f32
    %297 = vector.broadcast %cst_78 : f32 to vector<10x1xf32>
    %298 = arith.divf %296, %297 : vector<10x1xf32>
    %299 = vector.broadcast %291 : vector<10x1xf32> to vector<10x32xf32>
    %300 = arith.subf %287, %299 : vector<10x32xf32>
    %cst_79 = arith.constant 9.99999996E-13 : f32
    %301 = vector.broadcast %cst_79 : f32 to vector<10x1xf32>
    %302 = arith.addf %298, %301 : vector<10x1xf32>
    %303 = math.rsqrt %302 : vector<10x1xf32>
    %304 = vector.broadcast %303 : vector<10x1xf32> to vector<10x32xf32>
    %305 = arith.mulf %300, %304 : vector<10x32xf32>
    %c280 = arith.constant 280 : index
    %c0_80 = arith.constant 0 : index
    %306 = vector.load %arg5[%c280, %c0_80] : memref<1296x128xf32, #tpu.memory_space<vmem>>, vector<1x32xf32>
    %307 = vector.broadcast %306 : vector<1x32xf32> to vector<10x32xf32>
    %308 = arith.mulf %305, %307 : vector<10x32xf32>
    %c288 = arith.constant 288 : index
    %c0_81 = arith.constant 0 : index
    %309 = vector.load %arg5[%c288, %c0_81] : memref<1296x128xf32, #tpu.memory_space<vmem>>, vector<1x32xf32>
    %310 = vector.broadcast %309 : vector<1x32xf32> to vector<10x32xf32>
    %311 = arith.addf %308, %310 : vector<10x32xf32>
    %c296 = arith.constant 296 : index
    %c0_82 = arith.constant 0 : index
    %312 = vector.load %arg5[%c296, %c0_82] : memref<1296x128xf32, #tpu.memory_space<vmem>>, vector<32x96xf32>
    %cst_83 = arith.constant dense<0.000000e+00> : vector<10x96xf32>
    %313 = tpu.matmul %311, %312, %cst_83 {dimension_numbers = #tpu.dot_dimension_numbers<[1], [0], [0], [1], [0, 0, 1, 1], [], []>} : vector<10x32xf32>, vector<32x96xf32>, vector<10x96xf32> -> vector<10x96xf32>
    %c328 = arith.constant 328 : index
    %c0_84 = arith.constant 0 : index
    %314 = vector.load %arg5[%c328, %c0_84] : memref<1296x128xf32, #tpu.memory_space<vmem>>, vector<1x96xf32>
    %315 = vector.broadcast %314 : vector<1x96xf32> to vector<10x96xf32>
    %316 = arith.addf %313, %315 : vector<10x96xf32>
    %317 = vector.extract_strided_slice %316 {offsets = [0, 0], sizes = [10, 32], strides = [1, 1]} : vector<10x96xf32> to vector<10x32xf32>
    %318 = vector.extract_strided_slice %316 {offsets = [0, 32], sizes = [10, 32], strides = [1, 1]} : vector<10x96xf32> to vector<10x32xf32>
    %319 = vector.extract_strided_slice %316 {offsets = [0, 64], sizes = [10, 32], strides = [1, 1]} : vector<10x96xf32> to vector<10x32xf32>
    %cst_85 = arith.constant dense<0.000000e+00> : vector<40x32xf32>
    %320 = tpu.matmul %62, %317, %cst_85 {dimension_numbers = #tpu.dot_dimension_numbers<[1], [0], [0], [1], [0, 0, 1, 1], [], []>} : vector<40x10xf32>, vector<10x32xf32>, vector<40x32xf32> -> vector<40x32xf32>
    %cst_86 = arith.constant 0.000000e+00 : f32
    %321 = vector.broadcast %cst_86 : f32 to vector<40x32xf32>
    %322 = arith.select %60, %320, %321 : vector<40x32xi1>, vector<40x32xf32>
    %cst_87 = arith.constant dense<0.000000e+00> : vector<40x10xf32>
    %323 = tpu.matmul %322, %318, %cst_87 {dimension_numbers = #tpu.dot_dimension_numbers<[1], [1], [0], [0], [0, 0, 1, 0], [], []>} : vector<40x32xf32>, vector<10x32xf32>, vector<40x10xf32> -> vector<40x10xf32>
    %cst_88 = arith.constant 0.353553385 : f32
    %324 = vector.broadcast %cst_88 : f32 to vector<40x10xf32>
    %325 = arith.mulf %323, %324 : vector<40x10xf32>
    %cst_89 = arith.constant -3.40282347E+38 : f32
    %326 = vector.broadcast %cst_89 : f32 to vector<40x10xf32>
    %327 = arith.select %147, %325, %326 : vector<40x10xi1>, vector<40x10xf32>
    %cst_90 = arith.constant dense<0xFF800000> : vector<40xf32>
    %328 = vector.multi_reduction <maximumf>, %327, %cst_90 [1] : vector<40x10xf32> to vector<40xf32>
    %329 = vector.shape_cast %328 : vector<40xf32> to vector<40x1xf32>
    %330 = vector.broadcast %329 : vector<40x1xf32> to vector<40x10xf32>
    %331 = arith.subf %327, %330 : vector<40x10xf32>
    %332 = math.exp %331 : vector<40x10xf32>
    %cst_91 = arith.constant dense<0.000000e+00> : vector<40xf32>
    %333 = vector.multi_reduction <add>, %332, %cst_91 [1] : vector<40x10xf32> to vector<40xf32>
    %334 = vector.shape_cast %333 : vector<40xf32> to vector<40x1xf32>
    %335 = tpu.reciprocal %334 : vector<40x1xf32> -> vector<40x1xf32>
    %336 = vector.broadcast %335 : vector<40x1xf32> to vector<40x10xf32>
    %337 = arith.mulf %332, %336 : vector<40x10xf32>
    %cst_92 = arith.constant 0.000000e+00 : f32
    %338 = vector.broadcast %cst_92 : f32 to vector<40x10xf32>
    %339 = arith.select %147, %337, %338 : vector<40x10xi1>, vector<40x10xf32>
    %cst_93 = arith.constant dense<0.000000e+00> : vector<40x32xf32>
    %340 = tpu.matmul %339, %319, %cst_93 {dimension_numbers = #tpu.dot_dimension_numbers<[1], [0], [0], [1], [0, 0, 1, 1], [], []>} : vector<40x10xf32>, vector<10x32xf32>, vector<40x32xf32> -> vector<40x32xf32>
    %cst_94 = arith.constant 0.000000e+00 : f32
    %341 = vector.broadcast %cst_94 : f32 to vector<40x32xf32>
    %342 = arith.select %60, %340, %341 : vector<40x32xi1>, vector<40x32xf32>
    %cst_95 = arith.constant dense<0.000000e+00> : vector<10x32xf32>
    %343 = tpu.matmul %64, %342, %cst_95 {dimension_numbers = #tpu.dot_dimension_numbers<[1], [0], [0], [1], [0, 0, 1, 1], [], []>} : vector<10x40xf32>, vector<40x32xf32>, vector<10x32xf32> -> vector<10x32xf32>
    %c336 = arith.constant 336 : index
    %c0_96 = arith.constant 0 : index
    %344 = vector.load %arg5[%c336, %c0_96] : memref<1296x128xf32, #tpu.memory_space<vmem>>, vector<32x32xf32>
    %cst_97 = arith.constant dense<0.000000e+00> : vector<10x32xf32>
    %345 = tpu.matmul %343, %344, %cst_97 {dimension_numbers = #tpu.dot_dimension_numbers<[1], [0], [0], [1], [0, 0, 1, 1], [], []>} : vector<10x32xf32>, vector<32x32xf32>, vector<10x32xf32> -> vector<10x32xf32>
    %c368 = arith.constant 368 : index
    %c0_98 = arith.constant 0 : index
    %346 = vector.load %arg5[%c368, %c0_98] : memref<1296x128xf32, #tpu.memory_space<vmem>>, vector<1x32xf32>
    %347 = vector.broadcast %346 : vector<1x32xf32> to vector<10x32xf32>
    %348 = arith.addf %345, %347 : vector<10x32xf32>
    %349 = arith.addf %287, %348 : vector<10x32xf32>
    %cst_99 = arith.constant dense<0.000000e+00> : vector<10xf32>
    %350 = vector.multi_reduction <add>, %349, %cst_99 [1] : vector<10x32xf32> to vector<10xf32>
    %351 = vector.shape_cast %350 : vector<10xf32> to vector<10x1xf32>
    %cst_100 = arith.constant 3.200000e+01 : f32
    %352 = vector.broadcast %cst_100 : f32 to vector<10x1xf32>
    %353 = arith.divf %351, %352 : vector<10x1xf32>
    %354 = vector.broadcast %353 : vector<10x1xf32> to vector<10x32xf32>
    %355 = arith.subf %349, %354 : vector<10x32xf32>
    %356 = arith.mulf %355, %355 : vector<10x32xf32>
    %cst_101 = arith.constant dense<0.000000e+00> : vector<10xf32>
    %357 = vector.multi_reduction <add>, %356, %cst_101 [1] : vector<10x32xf32> to vector<10xf32>
    %358 = vector.shape_cast %357 : vector<10xf32> to vector<10x1xf32>
    %cst_102 = arith.constant 3.200000e+01 : f32
    %359 = vector.broadcast %cst_102 : f32 to vector<10x1xf32>
    %360 = arith.divf %358, %359 : vector<10x1xf32>
    %361 = vector.broadcast %353 : vector<10x1xf32> to vector<10x32xf32>
    %362 = arith.subf %349, %361 : vector<10x32xf32>
    %cst_103 = arith.constant 9.99999996E-13 : f32
    %363 = vector.broadcast %cst_103 : f32 to vector<10x1xf32>
    %364 = arith.addf %360, %363 : vector<10x1xf32>
    %365 = math.rsqrt %364 : vector<10x1xf32>
    %366 = vector.broadcast %365 : vector<10x1xf32> to vector<10x32xf32>
    %367 = arith.mulf %362, %366 : vector<10x32xf32>
    %c376 = arith.constant 376 : index
    %c0_104 = arith.constant 0 : index
    %368 = vector.load %arg5[%c376, %c0_104] : memref<1296x128xf32, #tpu.memory_space<vmem>>, vector<1x32xf32>
    %369 = vector.broadcast %368 : vector<1x32xf32> to vector<10x32xf32>
    %370 = arith.mulf %367, %369 : vector<10x32xf32>
    %c384 = arith.constant 384 : index
    %c0_105 = arith.constant 0 : index
    %371 = vector.load %arg5[%c384, %c0_105] : memref<1296x128xf32, #tpu.memory_space<vmem>>, vector<1x32xf32>
    %372 = vector.broadcast %371 : vector<1x32xf32> to vector<10x32xf32>
    %373 = arith.addf %370, %372 : vector<10x32xf32>
    %c392 = arith.constant 392 : index
    %c0_106 = arith.constant 0 : index
    %374 = vector.load %arg5[%c392, %c0_106] : memref<1296x128xf32, #tpu.memory_space<vmem>>, vector<32x64xf32>
    %cst_107 = arith.constant dense<0.000000e+00> : vector<10x64xf32>
    %375 = tpu.matmul %373, %374, %cst_107 {dimension_numbers = #tpu.dot_dimension_numbers<[1], [0], [0], [1], [0, 0, 1, 1], [], []>} : vector<10x32xf32>, vector<32x64xf32>, vector<10x64xf32> -> vector<10x64xf32>
    %c424 = arith.constant 424 : index
    %c0_108 = arith.constant 0 : index
    %376 = vector.load %arg5[%c424, %c0_108] : memref<1296x128xf32, #tpu.memory_space<vmem>>, vector<1x64xf32>
    %377 = vector.broadcast %376 : vector<1x64xf32> to vector<10x64xf32>
    %378 = arith.addf %375, %377 : vector<10x64xf32>
    %cst_109 = arith.constant 0.000000e+00 : f32
    %379 = vector.broadcast %cst_109 : f32 to vector<10x64xf32>
    %380 = arith.maximumf %378, %379 : vector<10x64xf32>
    %c432 = arith.constant 432 : index
    %c0_110 = arith.constant 0 : index
    %381 = vector.load %arg5[%c432, %c0_110] : memref<1296x128xf32, #tpu.memory_space<vmem>>, vector<64x32xf32>
    %cst_111 = arith.constant dense<0.000000e+00> : vector<10x32xf32>
    %382 = tpu.matmul %380, %381, %cst_111 {dimension_numbers = #tpu.dot_dimension_numbers<[1], [0], [0], [1], [0, 0, 1, 1], [], []>} : vector<10x64xf32>, vector<64x32xf32>, vector<10x32xf32> -> vector<10x32xf32>
    %c496 = arith.constant 496 : index
    %c0_112 = arith.constant 0 : index
    %383 = vector.load %arg5[%c496, %c0_112] : memref<1296x128xf32, #tpu.memory_space<vmem>>, vector<1x32xf32>
    %384 = vector.broadcast %383 : vector<1x32xf32> to vector<10x32xf32>
    %385 = arith.addf %382, %384 : vector<10x32xf32>
    %386 = arith.addf %349, %385 : vector<10x32xf32>
    %cst_113 = arith.constant dense<0.000000e+00> : vector<10xf32>
    %387 = vector.multi_reduction <add>, %386, %cst_113 [1] : vector<10x32xf32> to vector<10xf32>
    %388 = vector.shape_cast %387 : vector<10xf32> to vector<10x1xf32>
    %cst_114 = arith.constant 3.200000e+01 : f32
    %389 = vector.broadcast %cst_114 : f32 to vector<10x1xf32>
    %390 = arith.divf %388, %389 : vector<10x1xf32>
    %391 = vector.broadcast %390 : vector<10x1xf32> to vector<10x32xf32>
    %392 = arith.subf %386, %391 : vector<10x32xf32>
    %393 = arith.mulf %392, %392 : vector<10x32xf32>
    %cst_115 = arith.constant dense<0.000000e+00> : vector<10xf32>
    %394 = vector.multi_reduction <add>, %393, %cst_115 [1] : vector<10x32xf32> to vector<10xf32>
    %395 = vector.shape_cast %394 : vector<10xf32> to vector<10x1xf32>
    %cst_116 = arith.constant 3.200000e+01 : f32
    %396 = vector.broadcast %cst_116 : f32 to vector<10x1xf32>
    %397 = arith.divf %395, %396 : vector<10x1xf32>
    %398 = vector.broadcast %390 : vector<10x1xf32> to vector<10x32xf32>
    %399 = arith.subf %386, %398 : vector<10x32xf32>
    %cst_117 = arith.constant 9.99999996E-13 : f32
    %400 = vector.broadcast %cst_117 : f32 to vector<10x1xf32>
    %401 = arith.addf %397, %400 : vector<10x1xf32>
    %402 = math.rsqrt %401 : vector<10x1xf32>
    %403 = vector.broadcast %402 : vector<10x1xf32> to vector<10x32xf32>
    %404 = arith.mulf %399, %403 : vector<10x32xf32>
    %c504 = arith.constant 504 : index
    %c0_118 = arith.constant 0 : index
    %405 = vector.load %arg5[%c504, %c0_118] : memref<1296x128xf32, #tpu.memory_space<vmem>>, vector<1x32xf32>
    %406 = vector.broadcast %405 : vector<1x32xf32> to vector<10x32xf32>
    %407 = arith.mulf %404, %406 : vector<10x32xf32>
    %c512 = arith.constant 512 : index
    %c0_119 = arith.constant 0 : index
    %408 = vector.load %arg5[%c512, %c0_119] : memref<1296x128xf32, #tpu.memory_space<vmem>>, vector<1x32xf32>
    %409 = vector.broadcast %408 : vector<1x32xf32> to vector<10x32xf32>
    %410 = arith.addf %407, %409 : vector<10x32xf32>
    %c0_120 = arith.constant 0 : index
    %c0_121 = arith.constant 0 : index
    %c0_122 = arith.constant 0 : index
    %411 = vector.load %arg3[%c0_120, %c0_121, %c0_122] : memref<1x9x32xf32, #tpu.memory_space<vmem>>, vector<1x9x32xf32>
    %412 = vector.shape_cast %411 : vector<1x9x32xf32> to vector<9x32xf32>
    %cst_123 = arith.constant dense<0.000000e+00> : vector<9xf32>
    %413 = vector.multi_reduction <add>, %412, %cst_123 [1] : vector<9x32xf32> to vector<9xf32>
    %414 = vector.shape_cast %413 : vector<9xf32> to vector<9x1xf32>
    %cst_124 = arith.constant 3.200000e+01 : f32
    %415 = vector.broadcast %cst_124 : f32 to vector<9x1xf32>
    %416 = arith.divf %414, %415 : vector<9x1xf32>
    %417 = vector.broadcast %416 : vector<9x1xf32> to vector<9x32xf32>
    %418 = arith.subf %412, %417 : vector<9x32xf32>
    %419 = arith.mulf %418, %418 : vector<9x32xf32>
    %cst_125 = arith.constant dense<0.000000e+00> : vector<9xf32>
    %420 = vector.multi_reduction <add>, %419, %cst_125 [1] : vector<9x32xf32> to vector<9xf32>
    %421 = vector.shape_cast %420 : vector<9xf32> to vector<9x1xf32>
    %cst_126 = arith.constant 3.200000e+01 : f32
    %422 = vector.broadcast %cst_126 : f32 to vector<9x1xf32>
    %423 = arith.divf %421, %422 : vector<9x1xf32>
    %424 = vector.broadcast %416 : vector<9x1xf32> to vector<9x32xf32>
    %425 = arith.subf %412, %424 : vector<9x32xf32>
    %cst_127 = arith.constant 9.99999996E-13 : f32
    %426 = vector.broadcast %cst_127 : f32 to vector<9x1xf32>
    %427 = arith.addf %423, %426 : vector<9x1xf32>
    %428 = math.rsqrt %427 : vector<9x1xf32>
    %429 = vector.broadcast %428 : vector<9x1xf32> to vector<9x32xf32>
    %430 = arith.mulf %425, %429 : vector<9x32xf32>
    %c520 = arith.constant 520 : index
    %c0_128 = arith.constant 0 : index
    %431 = vector.load %arg5[%c520, %c0_128] : memref<1296x128xf32, #tpu.memory_space<vmem>>, vector<1x32xf32>
    %432 = vector.broadcast %431 : vector<1x32xf32> to vector<9x32xf32>
    %433 = arith.mulf %430, %432 : vector<9x32xf32>
    %c528 = arith.constant 528 : index
    %c0_129 = arith.constant 0 : index
    %434 = vector.load %arg5[%c528, %c0_129] : memref<1296x128xf32, #tpu.memory_space<vmem>>, vector<1x32xf32>
    %435 = vector.broadcast %434 : vector<1x32xf32> to vector<9x32xf32>
    %436 = arith.addf %433, %435 : vector<9x32xf32>
    %c536 = arith.constant 536 : index
    %c0_130 = arith.constant 0 : index
    %437 = vector.load %arg5[%c536, %c0_130] : memref<1296x128xf32, #tpu.memory_space<vmem>>, vector<32x96xf32>
    %cst_131 = arith.constant dense<0.000000e+00> : vector<9x96xf32>
    %438 = tpu.matmul %436, %437, %cst_131 {dimension_numbers = #tpu.dot_dimension_numbers<[1], [0], [0], [1], [0, 0, 1, 1], [], []>} : vector<9x32xf32>, vector<32x96xf32>, vector<9x96xf32> -> vector<9x96xf32>
    %c568 = arith.constant 568 : index
    %c0_132 = arith.constant 0 : index
    %439 = vector.load %arg5[%c568, %c0_132] : memref<1296x128xf32, #tpu.memory_space<vmem>>, vector<1x96xf32>
    %440 = vector.broadcast %439 : vector<1x96xf32> to vector<9x96xf32>
    %441 = arith.addf %438, %440 : vector<9x96xf32>
    %442 = vector.extract_strided_slice %441 {offsets = [0, 0], sizes = [9, 32], strides = [1, 1]} : vector<9x96xf32> to vector<9x32xf32>
    %443 = vector.extract_strided_slice %441 {offsets = [0, 32], sizes = [9, 32], strides = [1, 1]} : vector<9x96xf32> to vector<9x32xf32>
    %444 = vector.extract_strided_slice %441 {offsets = [0, 64], sizes = [9, 32], strides = [1, 1]} : vector<9x96xf32> to vector<9x32xf32>
    %cst_133 = arith.constant dense<0.000000e+00> : vector<36x32xf32>
    %445 = tpu.matmul %142, %442, %cst_133 {dimension_numbers = #tpu.dot_dimension_numbers<[1], [0], [0], [1], [0, 0, 1, 1], [], []>} : vector<36x9xf32>, vector<9x32xf32>, vector<36x32xf32> -> vector<36x32xf32>
    %cst_134 = arith.constant 0.000000e+00 : f32
    %446 = vector.broadcast %cst_134 : f32 to vector<36x32xf32>
    %447 = arith.select %123, %445, %446 : vector<36x32xi1>, vector<36x32xf32>
    %cst_135 = arith.constant dense<0.000000e+00> : vector<36x9xf32>
    %448 = tpu.matmul %447, %443, %cst_135 {dimension_numbers = #tpu.dot_dimension_numbers<[1], [1], [0], [0], [0, 0, 1, 0], [], []>} : vector<36x32xf32>, vector<9x32xf32>, vector<36x9xf32> -> vector<36x9xf32>
    %cst_136 = arith.constant 0.353553385 : f32
    %449 = vector.broadcast %cst_136 : f32 to vector<36x9xf32>
    %450 = arith.mulf %448, %449 : vector<36x9xf32>
    %cst_137 = arith.constant -3.40282347E+38 : f32
    %451 = vector.broadcast %cst_137 : f32 to vector<36x9xf32>
    %452 = arith.select %150, %450, %451 : vector<36x9xi1>, vector<36x9xf32>
    %cst_138 = arith.constant dense<0xFF800000> : vector<36xf32>
    %453 = vector.multi_reduction <maximumf>, %452, %cst_138 [1] : vector<36x9xf32> to vector<36xf32>
    %454 = vector.shape_cast %453 : vector<36xf32> to vector<36x1xf32>
    %455 = vector.broadcast %454 : vector<36x1xf32> to vector<36x9xf32>
    %456 = arith.subf %452, %455 : vector<36x9xf32>
    %457 = math.exp %456 : vector<36x9xf32>
    %cst_139 = arith.constant dense<0.000000e+00> : vector<36xf32>
    %458 = vector.multi_reduction <add>, %457, %cst_139 [1] : vector<36x9xf32> to vector<36xf32>
    %459 = vector.shape_cast %458 : vector<36xf32> to vector<36x1xf32>
    %460 = tpu.reciprocal %459 : vector<36x1xf32> -> vector<36x1xf32>
    %461 = vector.broadcast %460 : vector<36x1xf32> to vector<36x9xf32>
    %462 = arith.mulf %457, %461 : vector<36x9xf32>
    %cst_140 = arith.constant 0.000000e+00 : f32
    %463 = vector.broadcast %cst_140 : f32 to vector<36x9xf32>
    %464 = arith.select %150, %462, %463 : vector<36x9xi1>, vector<36x9xf32>
    %cst_141 = arith.constant dense<0.000000e+00> : vector<36x32xf32>
    %465 = tpu.matmul %464, %444, %cst_141 {dimension_numbers = #tpu.dot_dimension_numbers<[1], [0], [0], [1], [0, 0, 1, 1], [], []>} : vector<36x9xf32>, vector<9x32xf32>, vector<36x32xf32> -> vector<36x32xf32>
    %cst_142 = arith.constant 0.000000e+00 : f32
    %466 = vector.broadcast %cst_142 : f32 to vector<36x32xf32>
    %467 = arith.select %123, %465, %466 : vector<36x32xi1>, vector<36x32xf32>
    %cst_143 = arith.constant dense<0.000000e+00> : vector<9x32xf32>
    %468 = tpu.matmul %144, %467, %cst_143 {dimension_numbers = #tpu.dot_dimension_numbers<[1], [0], [0], [1], [0, 0, 1, 1], [], []>} : vector<9x36xf32>, vector<36x32xf32>, vector<9x32xf32> -> vector<9x32xf32>
    %c576 = arith.constant 576 : index
    %c0_144 = arith.constant 0 : index
    %469 = vector.load %arg5[%c576, %c0_144] : memref<1296x128xf32, #tpu.memory_space<vmem>>, vector<32x32xf32>
    %cst_145 = arith.constant dense<0.000000e+00> : vector<9x32xf32>
    %470 = tpu.matmul %468, %469, %cst_145 {dimension_numbers = #tpu.dot_dimension_numbers<[1], [0], [0], [1], [0, 0, 1, 1], [], []>} : vector<9x32xf32>, vector<32x32xf32>, vector<9x32xf32> -> vector<9x32xf32>
    %c608 = arith.constant 608 : index
    %c0_146 = arith.constant 0 : index
    %471 = vector.load %arg5[%c608, %c0_146] : memref<1296x128xf32, #tpu.memory_space<vmem>>, vector<1x32xf32>
    %472 = vector.broadcast %471 : vector<1x32xf32> to vector<9x32xf32>
    %473 = arith.addf %470, %472 : vector<9x32xf32>
    %474 = arith.addf %412, %473 : vector<9x32xf32>
    %cst_147 = arith.constant dense<0.000000e+00> : vector<9xf32>
    %475 = vector.multi_reduction <add>, %474, %cst_147 [1] : vector<9x32xf32> to vector<9xf32>
    %476 = vector.shape_cast %475 : vector<9xf32> to vector<9x1xf32>
    %cst_148 = arith.constant 3.200000e+01 : f32
    %477 = vector.broadcast %cst_148 : f32 to vector<9x1xf32>
    %478 = arith.divf %476, %477 : vector<9x1xf32>
    %479 = vector.broadcast %478 : vector<9x1xf32> to vector<9x32xf32>
    %480 = arith.subf %474, %479 : vector<9x32xf32>
    %481 = arith.mulf %480, %480 : vector<9x32xf32>
    %cst_149 = arith.constant dense<0.000000e+00> : vector<9xf32>
    %482 = vector.multi_reduction <add>, %481, %cst_149 [1] : vector<9x32xf32> to vector<9xf32>
    %483 = vector.shape_cast %482 : vector<9xf32> to vector<9x1xf32>
    %cst_150 = arith.constant 3.200000e+01 : f32
    %484 = vector.broadcast %cst_150 : f32 to vector<9x1xf32>
    %485 = arith.divf %483, %484 : vector<9x1xf32>
    %486 = vector.broadcast %478 : vector<9x1xf32> to vector<9x32xf32>
    %487 = arith.subf %474, %486 : vector<9x32xf32>
    %cst_151 = arith.constant 9.99999996E-13 : f32
    %488 = vector.broadcast %cst_151 : f32 to vector<9x1xf32>
    %489 = arith.addf %485, %488 : vector<9x1xf32>
    %490 = math.rsqrt %489 : vector<9x1xf32>
    %491 = vector.broadcast %490 : vector<9x1xf32> to vector<9x32xf32>
    %492 = arith.mulf %487, %491 : vector<9x32xf32>
    %c616 = arith.constant 616 : index
    %c0_152 = arith.constant 0 : index
    %493 = vector.load %arg5[%c616, %c0_152] : memref<1296x128xf32, #tpu.memory_space<vmem>>, vector<1x32xf32>
    %494 = vector.broadcast %493 : vector<1x32xf32> to vector<9x32xf32>
    %495 = arith.mulf %492, %494 : vector<9x32xf32>
    %c624 = arith.constant 624 : index
    %c0_153 = arith.constant 0 : index
    %496 = vector.load %arg5[%c624, %c0_153] : memref<1296x128xf32, #tpu.memory_space<vmem>>, vector<1x32xf32>
    %497 = vector.broadcast %496 : vector<1x32xf32> to vector<9x32xf32>
    %498 = arith.addf %495, %497 : vector<9x32xf32>
    %c632 = arith.constant 632 : index
    %c0_154 = arith.constant 0 : index
    %499 = vector.load %arg5[%c632, %c0_154] : memref<1296x128xf32, #tpu.memory_space<vmem>>, vector<32x32xf32>
    %cst_155 = arith.constant dense<0.000000e+00> : vector<9x32xf32>
    %500 = tpu.matmul %498, %499, %cst_155 {dimension_numbers = #tpu.dot_dimension_numbers<[1], [0], [0], [1], [0, 0, 1, 1], [], []>} : vector<9x32xf32>, vector<32x32xf32>, vector<9x32xf32> -> vector<9x32xf32>
    %c664 = arith.constant 664 : index
    %c0_156 = arith.constant 0 : index
    %501 = vector.load %arg5[%c664, %c0_156] : memref<1296x128xf32, #tpu.memory_space<vmem>>, vector<1x32xf32>
    %502 = vector.broadcast %501 : vector<1x32xf32> to vector<9x32xf32>
    %503 = arith.addf %500, %502 : vector<9x32xf32>
    %c672 = arith.constant 672 : index
    %c0_157 = arith.constant 0 : index
    %504 = vector.load %arg5[%c672, %c0_157] : memref<1296x128xf32, #tpu.memory_space<vmem>>, vector<32x64xf32>
    %cst_158 = arith.constant dense<0.000000e+00> : vector<10x64xf32>
    %505 = tpu.matmul %410, %504, %cst_158 {dimension_numbers = #tpu.dot_dimension_numbers<[1], [0], [0], [1], [0, 0, 1, 1], [], []>} : vector<10x32xf32>, vector<32x64xf32>, vector<10x64xf32> -> vector<10x64xf32>
    %c704 = arith.constant 704 : index
    %c0_159 = arith.constant 0 : index
    %506 = vector.load %arg5[%c704, %c0_159] : memref<1296x128xf32, #tpu.memory_space<vmem>>, vector<1x64xf32>
    %507 = vector.broadcast %506 : vector<1x64xf32> to vector<10x64xf32>
    %508 = arith.addf %505, %507 : vector<10x64xf32>
    %509 = vector.extract_strided_slice %508 {offsets = [0, 0], sizes = [10, 32], strides = [1, 1]} : vector<10x64xf32> to vector<10x32xf32>
    %510 = vector.extract_strided_slice %508 {offsets = [0, 32], sizes = [10, 32], strides = [1, 1]} : vector<10x64xf32> to vector<10x32xf32>
    %cst_160 = arith.constant dense<0.000000e+00> : vector<36x32xf32>
    %511 = tpu.matmul %142, %503, %cst_160 {dimension_numbers = #tpu.dot_dimension_numbers<[1], [0], [0], [1], [0, 0, 1, 1], [], []>} : vector<36x9xf32>, vector<9x32xf32>, vector<36x32xf32> -> vector<36x32xf32>
    %cst_161 = arith.constant 0.000000e+00 : f32
    %512 = vector.broadcast %cst_161 : f32 to vector<36x32xf32>
    %513 = arith.select %123, %511, %512 : vector<36x32xi1>, vector<36x32xf32>
    %cst_162 = arith.constant dense<0.000000e+00> : vector<36x10xf32>
    %514 = tpu.matmul %513, %509, %cst_162 {dimension_numbers = #tpu.dot_dimension_numbers<[1], [1], [0], [0], [0, 0, 1, 0], [], []>} : vector<36x32xf32>, vector<10x32xf32>, vector<36x10xf32> -> vector<36x10xf32>
    %cst_163 = arith.constant 0.353553385 : f32
    %515 = vector.broadcast %cst_163 : f32 to vector<36x10xf32>
    %516 = arith.mulf %514, %515 : vector<36x10xf32>
    %cst_164 = arith.constant -3.40282347E+38 : f32
    %517 = vector.broadcast %cst_164 : f32 to vector<36x10xf32>
    %518 = arith.select %153, %516, %517 : vector<36x10xi1>, vector<36x10xf32>
    %cst_165 = arith.constant dense<0xFF800000> : vector<36xf32>
    %519 = vector.multi_reduction <maximumf>, %518, %cst_165 [1] : vector<36x10xf32> to vector<36xf32>
    %520 = vector.shape_cast %519 : vector<36xf32> to vector<36x1xf32>
    %521 = vector.broadcast %520 : vector<36x1xf32> to vector<36x10xf32>
    %522 = arith.subf %518, %521 : vector<36x10xf32>
    %523 = math.exp %522 : vector<36x10xf32>
    %cst_166 = arith.constant dense<0.000000e+00> : vector<36xf32>
    %524 = vector.multi_reduction <add>, %523, %cst_166 [1] : vector<36x10xf32> to vector<36xf32>
    %525 = vector.shape_cast %524 : vector<36xf32> to vector<36x1xf32>
    %526 = tpu.reciprocal %525 : vector<36x1xf32> -> vector<36x1xf32>
    %527 = vector.broadcast %526 : vector<36x1xf32> to vector<36x10xf32>
    %528 = arith.mulf %523, %527 : vector<36x10xf32>
    %cst_167 = arith.constant 0.000000e+00 : f32
    %529 = vector.broadcast %cst_167 : f32 to vector<36x10xf32>
    %530 = arith.select %153, %528, %529 : vector<36x10xi1>, vector<36x10xf32>
    %cst_168 = arith.constant dense<0.000000e+00> : vector<36x32xf32>
    %531 = tpu.matmul %530, %510, %cst_168 {dimension_numbers = #tpu.dot_dimension_numbers<[1], [0], [0], [1], [0, 0, 1, 1], [], []>} : vector<36x10xf32>, vector<10x32xf32>, vector<36x32xf32> -> vector<36x32xf32>
    %cst_169 = arith.constant 0.000000e+00 : f32
    %532 = vector.broadcast %cst_169 : f32 to vector<36x32xf32>
    %533 = arith.select %123, %531, %532 : vector<36x32xi1>, vector<36x32xf32>
    %cst_170 = arith.constant dense<0.000000e+00> : vector<9x32xf32>
    %534 = tpu.matmul %144, %533, %cst_170 {dimension_numbers = #tpu.dot_dimension_numbers<[1], [0], [0], [1], [0, 0, 1, 1], [], []>} : vector<9x36xf32>, vector<36x32xf32>, vector<9x32xf32> -> vector<9x32xf32>
    %c712 = arith.constant 712 : index
    %c0_171 = arith.constant 0 : index
    %535 = vector.load %arg5[%c712, %c0_171] : memref<1296x128xf32, #tpu.memory_space<vmem>>, vector<32x32xf32>
    %cst_172 = arith.constant dense<0.000000e+00> : vector<9x32xf32>
    %536 = tpu.matmul %534, %535, %cst_172 {dimension_numbers = #tpu.dot_dimension_numbers<[1], [0], [0], [1], [0, 0, 1, 1], [], []>} : vector<9x32xf32>, vector<32x32xf32>, vector<9x32xf32> -> vector<9x32xf32>
    %c744 = arith.constant 744 : index
    %c0_173 = arith.constant 0 : index
    %537 = vector.load %arg5[%c744, %c0_173] : memref<1296x128xf32, #tpu.memory_space<vmem>>, vector<1x32xf32>
    %538 = vector.broadcast %537 : vector<1x32xf32> to vector<9x32xf32>
    %539 = arith.addf %536, %538 : vector<9x32xf32>
    %540 = arith.addf %474, %539 : vector<9x32xf32>
    %cst_174 = arith.constant dense<0.000000e+00> : vector<9xf32>
    %541 = vector.multi_reduction <add>, %540, %cst_174 [1] : vector<9x32xf32> to vector<9xf32>
    %542 = vector.shape_cast %541 : vector<9xf32> to vector<9x1xf32>
    %cst_175 = arith.constant 3.200000e+01 : f32
    %543 = vector.broadcast %cst_175 : f32 to vector<9x1xf32>
    %544 = arith.divf %542, %543 : vector<9x1xf32>
    %545 = vector.broadcast %544 : vector<9x1xf32> to vector<9x32xf32>
    %546 = arith.subf %540, %545 : vector<9x32xf32>
    %547 = arith.mulf %546, %546 : vector<9x32xf32>
    %cst_176 = arith.constant dense<0.000000e+00> : vector<9xf32>
    %548 = vector.multi_reduction <add>, %547, %cst_176 [1] : vector<9x32xf32> to vector<9xf32>
    %549 = vector.shape_cast %548 : vector<9xf32> to vector<9x1xf32>
    %cst_177 = arith.constant 3.200000e+01 : f32
    %550 = vector.broadcast %cst_177 : f32 to vector<9x1xf32>
    %551 = arith.divf %549, %550 : vector<9x1xf32>
    %552 = vector.broadcast %544 : vector<9x1xf32> to vector<9x32xf32>
    %553 = arith.subf %540, %552 : vector<9x32xf32>
    %cst_178 = arith.constant 9.99999996E-13 : f32
    %554 = vector.broadcast %cst_178 : f32 to vector<9x1xf32>
    %555 = arith.addf %551, %554 : vector<9x1xf32>
    %556 = math.rsqrt %555 : vector<9x1xf32>
    %557 = vector.broadcast %556 : vector<9x1xf32> to vector<9x32xf32>
    %558 = arith.mulf %553, %557 : vector<9x32xf32>
    %c752 = arith.constant 752 : index
    %c0_179 = arith.constant 0 : index
    %559 = vector.load %arg5[%c752, %c0_179] : memref<1296x128xf32, #tpu.memory_space<vmem>>, vector<1x32xf32>
    %560 = vector.broadcast %559 : vector<1x32xf32> to vector<9x32xf32>
    %561 = arith.mulf %558, %560 : vector<9x32xf32>
    %c760 = arith.constant 760 : index
    %c0_180 = arith.constant 0 : index
    %562 = vector.load %arg5[%c760, %c0_180] : memref<1296x128xf32, #tpu.memory_space<vmem>>, vector<1x32xf32>
    %563 = vector.broadcast %562 : vector<1x32xf32> to vector<9x32xf32>
    %564 = arith.addf %561, %563 : vector<9x32xf32>
    %c768 = arith.constant 768 : index
    %c0_181 = arith.constant 0 : index
    %565 = vector.load %arg5[%c768, %c0_181] : memref<1296x128xf32, #tpu.memory_space<vmem>>, vector<32x64xf32>
    %cst_182 = arith.constant dense<0.000000e+00> : vector<9x64xf32>
    %566 = tpu.matmul %564, %565, %cst_182 {dimension_numbers = #tpu.dot_dimension_numbers<[1], [0], [0], [1], [0, 0, 1, 1], [], []>} : vector<9x32xf32>, vector<32x64xf32>, vector<9x64xf32> -> vector<9x64xf32>
    %c800 = arith.constant 800 : index
    %c0_183 = arith.constant 0 : index
    %567 = vector.load %arg5[%c800, %c0_183] : memref<1296x128xf32, #tpu.memory_space<vmem>>, vector<1x64xf32>
    %568 = vector.broadcast %567 : vector<1x64xf32> to vector<9x64xf32>
    %569 = arith.addf %566, %568 : vector<9x64xf32>
    %cst_184 = arith.constant 0.000000e+00 : f32
    %570 = vector.broadcast %cst_184 : f32 to vector<9x64xf32>
    %571 = arith.maximumf %569, %570 : vector<9x64xf32>
    %c808 = arith.constant 808 : index
    %c0_185 = arith.constant 0 : index
    %572 = vector.load %arg5[%c808, %c0_185] : memref<1296x128xf32, #tpu.memory_space<vmem>>, vector<64x32xf32>
    %cst_186 = arith.constant dense<0.000000e+00> : vector<9x32xf32>
    %573 = tpu.matmul %571, %572, %cst_186 {dimension_numbers = #tpu.dot_dimension_numbers<[1], [0], [0], [1], [0, 0, 1, 1], [], []>} : vector<9x64xf32>, vector<64x32xf32>, vector<9x32xf32> -> vector<9x32xf32>
    %c872 = arith.constant 872 : index
    %c0_187 = arith.constant 0 : index
    %574 = vector.load %arg5[%c872, %c0_187] : memref<1296x128xf32, #tpu.memory_space<vmem>>, vector<1x32xf32>
    %575 = vector.broadcast %574 : vector<1x32xf32> to vector<9x32xf32>
    %576 = arith.addf %573, %575 : vector<9x32xf32>
    %577 = arith.addf %540, %576 : vector<9x32xf32>
    %cst_188 = arith.constant dense<0.000000e+00> : vector<9xf32>
    %578 = vector.multi_reduction <add>, %577, %cst_188 [1] : vector<9x32xf32> to vector<9xf32>
    %579 = vector.shape_cast %578 : vector<9xf32> to vector<9x1xf32>
    %cst_189 = arith.constant 3.200000e+01 : f32
    %580 = vector.broadcast %cst_189 : f32 to vector<9x1xf32>
    %581 = arith.divf %579, %580 : vector<9x1xf32>
    %582 = vector.broadcast %581 : vector<9x1xf32> to vector<9x32xf32>
    %583 = arith.subf %577, %582 : vector<9x32xf32>
    %584 = arith.mulf %583, %583 : vector<9x32xf32>
    %cst_190 = arith.constant dense<0.000000e+00> : vector<9xf32>
    %585 = vector.multi_reduction <add>, %584, %cst_190 [1] : vector<9x32xf32> to vector<9xf32>
    %586 = vector.shape_cast %585 : vector<9xf32> to vector<9x1xf32>
    %cst_191 = arith.constant 3.200000e+01 : f32
    %587 = vector.broadcast %cst_191 : f32 to vector<9x1xf32>
    %588 = arith.divf %586, %587 : vector<9x1xf32>
    %589 = vector.broadcast %581 : vector<9x1xf32> to vector<9x32xf32>
    %590 = arith.subf %577, %589 : vector<9x32xf32>
    %cst_192 = arith.constant 9.99999996E-13 : f32
    %591 = vector.broadcast %cst_192 : f32 to vector<9x1xf32>
    %592 = arith.addf %588, %591 : vector<9x1xf32>
    %593 = math.rsqrt %592 : vector<9x1xf32>
    %594 = vector.broadcast %593 : vector<9x1xf32> to vector<9x32xf32>
    %595 = arith.mulf %590, %594 : vector<9x32xf32>
    %c880 = arith.constant 880 : index
    %c0_193 = arith.constant 0 : index
    %596 = vector.load %arg5[%c880, %c0_193] : memref<1296x128xf32, #tpu.memory_space<vmem>>, vector<1x32xf32>
    %597 = vector.broadcast %596 : vector<1x32xf32> to vector<9x32xf32>
    %598 = arith.mulf %595, %597 : vector<9x32xf32>
    %c888 = arith.constant 888 : index
    %c0_194 = arith.constant 0 : index
    %599 = vector.load %arg5[%c888, %c0_194] : memref<1296x128xf32, #tpu.memory_space<vmem>>, vector<1x32xf32>
    %600 = vector.broadcast %599 : vector<1x32xf32> to vector<9x32xf32>
    %601 = arith.addf %598, %600 : vector<9x32xf32>
    %c896 = arith.constant 896 : index
    %c0_195 = arith.constant 0 : index
    %602 = vector.load %arg5[%c896, %c0_195] : memref<1296x128xf32, #tpu.memory_space<vmem>>, vector<32x96xf32>
    %cst_196 = arith.constant dense<0.000000e+00> : vector<9x96xf32>
    %603 = tpu.matmul %601, %602, %cst_196 {dimension_numbers = #tpu.dot_dimension_numbers<[1], [0], [0], [1], [0, 0, 1, 1], [], []>} : vector<9x32xf32>, vector<32x96xf32>, vector<9x96xf32> -> vector<9x96xf32>
    %c928 = arith.constant 928 : index
    %c0_197 = arith.constant 0 : index
    %604 = vector.load %arg5[%c928, %c0_197] : memref<1296x128xf32, #tpu.memory_space<vmem>>, vector<1x96xf32>
    %605 = vector.broadcast %604 : vector<1x96xf32> to vector<9x96xf32>
    %606 = arith.addf %603, %605 : vector<9x96xf32>
    %607 = vector.extract_strided_slice %606 {offsets = [0, 0], sizes = [9, 32], strides = [1, 1]} : vector<9x96xf32> to vector<9x32xf32>
    %608 = vector.extract_strided_slice %606 {offsets = [0, 32], sizes = [9, 32], strides = [1, 1]} : vector<9x96xf32> to vector<9x32xf32>
    %609 = vector.extract_strided_slice %606 {offsets = [0, 64], sizes = [9, 32], strides = [1, 1]} : vector<9x96xf32> to vector<9x32xf32>
    %cst_198 = arith.constant dense<0.000000e+00> : vector<36x32xf32>
    %610 = tpu.matmul %142, %607, %cst_198 {dimension_numbers = #tpu.dot_dimension_numbers<[1], [0], [0], [1], [0, 0, 1, 1], [], []>} : vector<36x9xf32>, vector<9x32xf32>, vector<36x32xf32> -> vector<36x32xf32>
    %cst_199 = arith.constant 0.000000e+00 : f32
    %611 = vector.broadcast %cst_199 : f32 to vector<36x32xf32>
    %612 = arith.select %123, %610, %611 : vector<36x32xi1>, vector<36x32xf32>
    %cst_200 = arith.constant dense<0.000000e+00> : vector<36x9xf32>
    %613 = tpu.matmul %612, %608, %cst_200 {dimension_numbers = #tpu.dot_dimension_numbers<[1], [1], [0], [0], [0, 0, 1, 0], [], []>} : vector<36x32xf32>, vector<9x32xf32>, vector<36x9xf32> -> vector<36x9xf32>
    %cst_201 = arith.constant 0.353553385 : f32
    %614 = vector.broadcast %cst_201 : f32 to vector<36x9xf32>
    %615 = arith.mulf %613, %614 : vector<36x9xf32>
    %cst_202 = arith.constant -3.40282347E+38 : f32
    %616 = vector.broadcast %cst_202 : f32 to vector<36x9xf32>
    %617 = arith.select %150, %615, %616 : vector<36x9xi1>, vector<36x9xf32>
    %cst_203 = arith.constant dense<0xFF800000> : vector<36xf32>
    %618 = vector.multi_reduction <maximumf>, %617, %cst_203 [1] : vector<36x9xf32> to vector<36xf32>
    %619 = vector.shape_cast %618 : vector<36xf32> to vector<36x1xf32>
    %620 = vector.broadcast %619 : vector<36x1xf32> to vector<36x9xf32>
    %621 = arith.subf %617, %620 : vector<36x9xf32>
    %622 = math.exp %621 : vector<36x9xf32>
    %cst_204 = arith.constant dense<0.000000e+00> : vector<36xf32>
    %623 = vector.multi_reduction <add>, %622, %cst_204 [1] : vector<36x9xf32> to vector<36xf32>
    %624 = vector.shape_cast %623 : vector<36xf32> to vector<36x1xf32>
    %625 = tpu.reciprocal %624 : vector<36x1xf32> -> vector<36x1xf32>
    %626 = vector.broadcast %625 : vector<36x1xf32> to vector<36x9xf32>
    %627 = arith.mulf %622, %626 : vector<36x9xf32>
    %cst_205 = arith.constant 0.000000e+00 : f32
    %628 = vector.broadcast %cst_205 : f32 to vector<36x9xf32>
    %629 = arith.select %150, %627, %628 : vector<36x9xi1>, vector<36x9xf32>
    %cst_206 = arith.constant dense<0.000000e+00> : vector<36x32xf32>
    %630 = tpu.matmul %629, %609, %cst_206 {dimension_numbers = #tpu.dot_dimension_numbers<[1], [0], [0], [1], [0, 0, 1, 1], [], []>} : vector<36x9xf32>, vector<9x32xf32>, vector<36x32xf32> -> vector<36x32xf32>
    %cst_207 = arith.constant 0.000000e+00 : f32
    %631 = vector.broadcast %cst_207 : f32 to vector<36x32xf32>
    %632 = arith.select %123, %630, %631 : vector<36x32xi1>, vector<36x32xf32>
    %cst_208 = arith.constant dense<0.000000e+00> : vector<9x32xf32>
    %633 = tpu.matmul %144, %632, %cst_208 {dimension_numbers = #tpu.dot_dimension_numbers<[1], [0], [0], [1], [0, 0, 1, 1], [], []>} : vector<9x36xf32>, vector<36x32xf32>, vector<9x32xf32> -> vector<9x32xf32>
    %c936 = arith.constant 936 : index
    %c0_209 = arith.constant 0 : index
    %634 = vector.load %arg5[%c936, %c0_209] : memref<1296x128xf32, #tpu.memory_space<vmem>>, vector<32x32xf32>
    %cst_210 = arith.constant dense<0.000000e+00> : vector<9x32xf32>
    %635 = tpu.matmul %633, %634, %cst_210 {dimension_numbers = #tpu.dot_dimension_numbers<[1], [0], [0], [1], [0, 0, 1, 1], [], []>} : vector<9x32xf32>, vector<32x32xf32>, vector<9x32xf32> -> vector<9x32xf32>
    %c968 = arith.constant 968 : index
    %c0_211 = arith.constant 0 : index
    %636 = vector.load %arg5[%c968, %c0_211] : memref<1296x128xf32, #tpu.memory_space<vmem>>, vector<1x32xf32>
    %637 = vector.broadcast %636 : vector<1x32xf32> to vector<9x32xf32>
    %638 = arith.addf %635, %637 : vector<9x32xf32>
    %639 = arith.addf %577, %638 : vector<9x32xf32>
    %cst_212 = arith.constant dense<0.000000e+00> : vector<9xf32>
    %640 = vector.multi_reduction <add>, %639, %cst_212 [1] : vector<9x32xf32> to vector<9xf32>
    %641 = vector.shape_cast %640 : vector<9xf32> to vector<9x1xf32>
    %cst_213 = arith.constant 3.200000e+01 : f32
    %642 = vector.broadcast %cst_213 : f32 to vector<9x1xf32>
    %643 = arith.divf %641, %642 : vector<9x1xf32>
    %644 = vector.broadcast %643 : vector<9x1xf32> to vector<9x32xf32>
    %645 = arith.subf %639, %644 : vector<9x32xf32>
    %646 = arith.mulf %645, %645 : vector<9x32xf32>
    %cst_214 = arith.constant dense<0.000000e+00> : vector<9xf32>
    %647 = vector.multi_reduction <add>, %646, %cst_214 [1] : vector<9x32xf32> to vector<9xf32>
    %648 = vector.shape_cast %647 : vector<9xf32> to vector<9x1xf32>
    %cst_215 = arith.constant 3.200000e+01 : f32
    %649 = vector.broadcast %cst_215 : f32 to vector<9x1xf32>
    %650 = arith.divf %648, %649 : vector<9x1xf32>
    %651 = vector.broadcast %643 : vector<9x1xf32> to vector<9x32xf32>
    %652 = arith.subf %639, %651 : vector<9x32xf32>
    %cst_216 = arith.constant 9.99999996E-13 : f32
    %653 = vector.broadcast %cst_216 : f32 to vector<9x1xf32>
    %654 = arith.addf %650, %653 : vector<9x1xf32>
    %655 = math.rsqrt %654 : vector<9x1xf32>
    %656 = vector.broadcast %655 : vector<9x1xf32> to vector<9x32xf32>
    %657 = arith.mulf %652, %656 : vector<9x32xf32>
    %c976 = arith.constant 976 : index
    %c0_217 = arith.constant 0 : index
    %658 = vector.load %arg5[%c976, %c0_217] : memref<1296x128xf32, #tpu.memory_space<vmem>>, vector<1x32xf32>
    %659 = vector.broadcast %658 : vector<1x32xf32> to vector<9x32xf32>
    %660 = arith.mulf %657, %659 : vector<9x32xf32>
    %c984 = arith.constant 984 : index
    %c0_218 = arith.constant 0 : index
    %661 = vector.load %arg5[%c984, %c0_218] : memref<1296x128xf32, #tpu.memory_space<vmem>>, vector<1x32xf32>
    %662 = vector.broadcast %661 : vector<1x32xf32> to vector<9x32xf32>
    %663 = arith.addf %660, %662 : vector<9x32xf32>
    %c992 = arith.constant 992 : index
    %c0_219 = arith.constant 0 : index
    %664 = vector.load %arg5[%c992, %c0_219] : memref<1296x128xf32, #tpu.memory_space<vmem>>, vector<32x32xf32>
    %cst_220 = arith.constant dense<0.000000e+00> : vector<9x32xf32>
    %665 = tpu.matmul %663, %664, %cst_220 {dimension_numbers = #tpu.dot_dimension_numbers<[1], [0], [0], [1], [0, 0, 1, 1], [], []>} : vector<9x32xf32>, vector<32x32xf32>, vector<9x32xf32> -> vector<9x32xf32>
    %c1024 = arith.constant 1024 : index
    %c0_221 = arith.constant 0 : index
    %666 = vector.load %arg5[%c1024, %c0_221] : memref<1296x128xf32, #tpu.memory_space<vmem>>, vector<1x32xf32>
    %667 = vector.broadcast %666 : vector<1x32xf32> to vector<9x32xf32>
    %668 = arith.addf %665, %667 : vector<9x32xf32>
    %c1032 = arith.constant 1032 : index
    %c0_222 = arith.constant 0 : index
    %669 = vector.load %arg5[%c1032, %c0_222] : memref<1296x128xf32, #tpu.memory_space<vmem>>, vector<32x64xf32>
    %cst_223 = arith.constant dense<0.000000e+00> : vector<10x64xf32>
    %670 = tpu.matmul %410, %669, %cst_223 {dimension_numbers = #tpu.dot_dimension_numbers<[1], [0], [0], [1], [0, 0, 1, 1], [], []>} : vector<10x32xf32>, vector<32x64xf32>, vector<10x64xf32> -> vector<10x64xf32>
    %c1064 = arith.constant 1064 : index
    %c0_224 = arith.constant 0 : index
    %671 = vector.load %arg5[%c1064, %c0_224] : memref<1296x128xf32, #tpu.memory_space<vmem>>, vector<1x64xf32>
    %672 = vector.broadcast %671 : vector<1x64xf32> to vector<10x64xf32>
    %673 = arith.addf %670, %672 : vector<10x64xf32>
    %674 = vector.extract_strided_slice %673 {offsets = [0, 0], sizes = [10, 32], strides = [1, 1]} : vector<10x64xf32> to vector<10x32xf32>
    %675 = vector.extract_strided_slice %673 {offsets = [0, 32], sizes = [10, 32], strides = [1, 1]} : vector<10x64xf32> to vector<10x32xf32>
    %cst_225 = arith.constant dense<0.000000e+00> : vector<36x32xf32>
    %676 = tpu.matmul %142, %668, %cst_225 {dimension_numbers = #tpu.dot_dimension_numbers<[1], [0], [0], [1], [0, 0, 1, 1], [], []>} : vector<36x9xf32>, vector<9x32xf32>, vector<36x32xf32> -> vector<36x32xf32>
    %cst_226 = arith.constant 0.000000e+00 : f32
    %677 = vector.broadcast %cst_226 : f32 to vector<36x32xf32>
    %678 = arith.select %123, %676, %677 : vector<36x32xi1>, vector<36x32xf32>
    %cst_227 = arith.constant dense<0.000000e+00> : vector<36x10xf32>
    %679 = tpu.matmul %678, %674, %cst_227 {dimension_numbers = #tpu.dot_dimension_numbers<[1], [1], [0], [0], [0, 0, 1, 0], [], []>} : vector<36x32xf32>, vector<10x32xf32>, vector<36x10xf32> -> vector<36x10xf32>
    %cst_228 = arith.constant 0.353553385 : f32
    %680 = vector.broadcast %cst_228 : f32 to vector<36x10xf32>
    %681 = arith.mulf %679, %680 : vector<36x10xf32>
    %cst_229 = arith.constant -3.40282347E+38 : f32
    %682 = vector.broadcast %cst_229 : f32 to vector<36x10xf32>
    %683 = arith.select %153, %681, %682 : vector<36x10xi1>, vector<36x10xf32>
    %cst_230 = arith.constant dense<0xFF800000> : vector<36xf32>
    %684 = vector.multi_reduction <maximumf>, %683, %cst_230 [1] : vector<36x10xf32> to vector<36xf32>
    %685 = vector.shape_cast %684 : vector<36xf32> to vector<36x1xf32>
    %686 = vector.broadcast %685 : vector<36x1xf32> to vector<36x10xf32>
    %687 = arith.subf %683, %686 : vector<36x10xf32>
    %688 = math.exp %687 : vector<36x10xf32>
    %cst_231 = arith.constant dense<0.000000e+00> : vector<36xf32>
    %689 = vector.multi_reduction <add>, %688, %cst_231 [1] : vector<36x10xf32> to vector<36xf32>
    %690 = vector.shape_cast %689 : vector<36xf32> to vector<36x1xf32>
    %691 = tpu.reciprocal %690 : vector<36x1xf32> -> vector<36x1xf32>
    %692 = vector.broadcast %691 : vector<36x1xf32> to vector<36x10xf32>
    %693 = arith.mulf %688, %692 : vector<36x10xf32>
    %cst_232 = arith.constant 0.000000e+00 : f32
    %694 = vector.broadcast %cst_232 : f32 to vector<36x10xf32>
    %695 = arith.select %153, %693, %694 : vector<36x10xi1>, vector<36x10xf32>
    %cst_233 = arith.constant dense<0.000000e+00> : vector<36x32xf32>
    %696 = tpu.matmul %695, %675, %cst_233 {dimension_numbers = #tpu.dot_dimension_numbers<[1], [0], [0], [1], [0, 0, 1, 1], [], []>} : vector<36x10xf32>, vector<10x32xf32>, vector<36x32xf32> -> vector<36x32xf32>
    %cst_234 = arith.constant 0.000000e+00 : f32
    %697 = vector.broadcast %cst_234 : f32 to vector<36x32xf32>
    %698 = arith.select %123, %696, %697 : vector<36x32xi1>, vector<36x32xf32>
    %cst_235 = arith.constant dense<0.000000e+00> : vector<9x32xf32>
    %699 = tpu.matmul %144, %698, %cst_235 {dimension_numbers = #tpu.dot_dimension_numbers<[1], [0], [0], [1], [0, 0, 1, 1], [], []>} : vector<9x36xf32>, vector<36x32xf32>, vector<9x32xf32> -> vector<9x32xf32>
    %c1072 = arith.constant 1072 : index
    %c0_236 = arith.constant 0 : index
    %700 = vector.load %arg5[%c1072, %c0_236] : memref<1296x128xf32, #tpu.memory_space<vmem>>, vector<32x32xf32>
    %cst_237 = arith.constant dense<0.000000e+00> : vector<9x32xf32>
    %701 = tpu.matmul %699, %700, %cst_237 {dimension_numbers = #tpu.dot_dimension_numbers<[1], [0], [0], [1], [0, 0, 1, 1], [], []>} : vector<9x32xf32>, vector<32x32xf32>, vector<9x32xf32> -> vector<9x32xf32>
    %c1104 = arith.constant 1104 : index
    %c0_238 = arith.constant 0 : index
    %702 = vector.load %arg5[%c1104, %c0_238] : memref<1296x128xf32, #tpu.memory_space<vmem>>, vector<1x32xf32>
    %703 = vector.broadcast %702 : vector<1x32xf32> to vector<9x32xf32>
    %704 = arith.addf %701, %703 : vector<9x32xf32>
    %705 = arith.addf %639, %704 : vector<9x32xf32>
    %cst_239 = arith.constant dense<0.000000e+00> : vector<9xf32>
    %706 = vector.multi_reduction <add>, %705, %cst_239 [1] : vector<9x32xf32> to vector<9xf32>
    %707 = vector.shape_cast %706 : vector<9xf32> to vector<9x1xf32>
    %cst_240 = arith.constant 3.200000e+01 : f32
    %708 = vector.broadcast %cst_240 : f32 to vector<9x1xf32>
    %709 = arith.divf %707, %708 : vector<9x1xf32>
    %710 = vector.broadcast %709 : vector<9x1xf32> to vector<9x32xf32>
    %711 = arith.subf %705, %710 : vector<9x32xf32>
    %712 = arith.mulf %711, %711 : vector<9x32xf32>
    %cst_241 = arith.constant dense<0.000000e+00> : vector<9xf32>
    %713 = vector.multi_reduction <add>, %712, %cst_241 [1] : vector<9x32xf32> to vector<9xf32>
    %714 = vector.shape_cast %713 : vector<9xf32> to vector<9x1xf32>
    %cst_242 = arith.constant 3.200000e+01 : f32
    %715 = vector.broadcast %cst_242 : f32 to vector<9x1xf32>
    %716 = arith.divf %714, %715 : vector<9x1xf32>
    %717 = vector.broadcast %709 : vector<9x1xf32> to vector<9x32xf32>
    %718 = arith.subf %705, %717 : vector<9x32xf32>
    %cst_243 = arith.constant 9.99999996E-13 : f32
    %719 = vector.broadcast %cst_243 : f32 to vector<9x1xf32>
    %720 = arith.addf %716, %719 : vector<9x1xf32>
    %721 = math.rsqrt %720 : vector<9x1xf32>
    %722 = vector.broadcast %721 : vector<9x1xf32> to vector<9x32xf32>
    %723 = arith.mulf %718, %722 : vector<9x32xf32>
    %c1112 = arith.constant 1112 : index
    %c0_244 = arith.constant 0 : index
    %724 = vector.load %arg5[%c1112, %c0_244] : memref<1296x128xf32, #tpu.memory_space<vmem>>, vector<1x32xf32>
    %725 = vector.broadcast %724 : vector<1x32xf32> to vector<9x32xf32>
    %726 = arith.mulf %723, %725 : vector<9x32xf32>
    %c1120 = arith.constant 1120 : index
    %c0_245 = arith.constant 0 : index
    %727 = vector.load %arg5[%c1120, %c0_245] : memref<1296x128xf32, #tpu.memory_space<vmem>>, vector<1x32xf32>
    %728 = vector.broadcast %727 : vector<1x32xf32> to vector<9x32xf32>
    %729 = arith.addf %726, %728 : vector<9x32xf32>
    %c1128 = arith.constant 1128 : index
    %c0_246 = arith.constant 0 : index
    %730 = vector.load %arg5[%c1128, %c0_246] : memref<1296x128xf32, #tpu.memory_space<vmem>>, vector<32x64xf32>
    %cst_247 = arith.constant dense<0.000000e+00> : vector<9x64xf32>
    %731 = tpu.matmul %729, %730, %cst_247 {dimension_numbers = #tpu.dot_dimension_numbers<[1], [0], [0], [1], [0, 0, 1, 1], [], []>} : vector<9x32xf32>, vector<32x64xf32>, vector<9x64xf32> -> vector<9x64xf32>
    %c1160 = arith.constant 1160 : index
    %c0_248 = arith.constant 0 : index
    %732 = vector.load %arg5[%c1160, %c0_248] : memref<1296x128xf32, #tpu.memory_space<vmem>>, vector<1x64xf32>
    %733 = vector.broadcast %732 : vector<1x64xf32> to vector<9x64xf32>
    %734 = arith.addf %731, %733 : vector<9x64xf32>
    %cst_249 = arith.constant 0.000000e+00 : f32
    %735 = vector.broadcast %cst_249 : f32 to vector<9x64xf32>
    %736 = arith.maximumf %734, %735 : vector<9x64xf32>
    %c1168 = arith.constant 1168 : index
    %c0_250 = arith.constant 0 : index
    %737 = vector.load %arg5[%c1168, %c0_250] : memref<1296x128xf32, #tpu.memory_space<vmem>>, vector<64x32xf32>
    %cst_251 = arith.constant dense<0.000000e+00> : vector<9x32xf32>
    %738 = tpu.matmul %736, %737, %cst_251 {dimension_numbers = #tpu.dot_dimension_numbers<[1], [0], [0], [1], [0, 0, 1, 1], [], []>} : vector<9x64xf32>, vector<64x32xf32>, vector<9x32xf32> -> vector<9x32xf32>
    %c1232 = arith.constant 1232 : index
    %c0_252 = arith.constant 0 : index
    %739 = vector.load %arg5[%c1232, %c0_252] : memref<1296x128xf32, #tpu.memory_space<vmem>>, vector<1x32xf32>
    %740 = vector.broadcast %739 : vector<1x32xf32> to vector<9x32xf32>
    %741 = arith.addf %738, %740 : vector<9x32xf32>
    %742 = arith.addf %705, %741 : vector<9x32xf32>
    %cst_253 = arith.constant dense<0.000000e+00> : vector<9xf32>
    %743 = vector.multi_reduction <add>, %742, %cst_253 [1] : vector<9x32xf32> to vector<9xf32>
    %744 = vector.shape_cast %743 : vector<9xf32> to vector<9x1xf32>
    %cst_254 = arith.constant 3.200000e+01 : f32
    %745 = vector.broadcast %cst_254 : f32 to vector<9x1xf32>
    %746 = arith.divf %744, %745 : vector<9x1xf32>
    %747 = vector.broadcast %746 : vector<9x1xf32> to vector<9x32xf32>
    %748 = arith.subf %742, %747 : vector<9x32xf32>
    %749 = arith.mulf %748, %748 : vector<9x32xf32>
    %cst_255 = arith.constant dense<0.000000e+00> : vector<9xf32>
    %750 = vector.multi_reduction <add>, %749, %cst_255 [1] : vector<9x32xf32> to vector<9xf32>
    %751 = vector.shape_cast %750 : vector<9xf32> to vector<9x1xf32>
    %cst_256 = arith.constant 3.200000e+01 : f32
    %752 = vector.broadcast %cst_256 : f32 to vector<9x1xf32>
    %753 = arith.divf %751, %752 : vector<9x1xf32>
    %754 = vector.broadcast %746 : vector<9x1xf32> to vector<9x32xf32>
    %755 = arith.subf %742, %754 : vector<9x32xf32>
    %cst_257 = arith.constant 9.99999996E-13 : f32
    %756 = vector.broadcast %cst_257 : f32 to vector<9x1xf32>
    %757 = arith.addf %753, %756 : vector<9x1xf32>
    %758 = math.rsqrt %757 : vector<9x1xf32>
    %759 = vector.broadcast %758 : vector<9x1xf32> to vector<9x32xf32>
    %760 = arith.mulf %755, %759 : vector<9x32xf32>
    %c1240 = arith.constant 1240 : index
    %c0_258 = arith.constant 0 : index
    %761 = vector.load %arg5[%c1240, %c0_258] : memref<1296x128xf32, #tpu.memory_space<vmem>>, vector<1x32xf32>
    %762 = vector.broadcast %761 : vector<1x32xf32> to vector<9x32xf32>
    %763 = arith.mulf %760, %762 : vector<9x32xf32>
    %c1248 = arith.constant 1248 : index
    %c0_259 = arith.constant 0 : index
    %764 = vector.load %arg5[%c1248, %c0_259] : memref<1296x128xf32, #tpu.memory_space<vmem>>, vector<1x32xf32>
    %765 = vector.broadcast %764 : vector<1x32xf32> to vector<9x32xf32>
    %766 = arith.addf %763, %765 : vector<9x32xf32>
    %c1256 = arith.constant 1256 : index
    %c0_260 = arith.constant 0 : index
    %767 = vector.load %arg5[%c1256, %c0_260] : memref<1296x128xf32, #tpu.memory_space<vmem>>, vector<32x12xf32>
    %cst_261 = arith.constant dense<0.000000e+00> : vector<9x12xf32>
    %768 = tpu.matmul %766, %767, %cst_261 {dimension_numbers = #tpu.dot_dimension_numbers<[1], [0], [0], [1], [0, 0, 1, 1], [], []>} : vector<9x32xf32>, vector<32x12xf32>, vector<9x12xf32> -> vector<9x12xf32>
    %c1288 = arith.constant 1288 : index
    %c0_262 = arith.constant 0 : index
    %769 = vector.load %arg5[%c1288, %c0_262] : memref<1296x128xf32, #tpu.memory_space<vmem>>, vector<1x12xf32>
    %770 = vector.broadcast %769 : vector<1x12xf32> to vector<9x12xf32>
    %771 = arith.addf %768, %770 : vector<9x12xf32>
    %c0_263 = arith.constant 0 : index
    %c0_264 = arith.constant 0 : index
    %c0_265 = arith.constant 0 : index
    %772 = vector.load %arg4[%c0_263, %c0_264, %c0_265] : memref<1x9x12xf32, #tpu.memory_space<vmem>>, vector<1x9x12xf32>
    %773 = vector.shape_cast %772 : vector<1x9x12xf32> to vector<9x12xf32>
    %cst_266 = arith.constant dense<0xFF800000> : vector<9xf32>
    %774 = vector.multi_reduction <maximumf>, %771, %cst_266 [1] : vector<9x12xf32> to vector<9xf32>
    %775 = vector.shape_cast %774 : vector<9xf32> to vector<9x1xf32>
    %776 = vector.broadcast %775 : vector<9x1xf32> to vector<9x12xf32>
    %777 = arith.subf %771, %776 : vector<9x12xf32>
    %778 = math.exp %777 : vector<9x12xf32>
    %cst_267 = arith.constant dense<0.000000e+00> : vector<9xf32>
    %779 = vector.multi_reduction <add>, %778, %cst_267 [1] : vector<9x12xf32> to vector<9xf32>
    %780 = vector.shape_cast %779 : vector<9xf32> to vector<9x1xf32>
    %781 = math.log %780 : vector<9x1xf32>
    %782 = arith.addf %781, %775 : vector<9x1xf32>
    %783 = vector.broadcast %782 : vector<9x1xf32> to vector<9x12xf32>
    %784 = arith.subf %771, %783 : vector<9x12xf32>
    %785 = arith.mulf %773, %784 : vector<9x12xf32>
    %786 = vector.shape_cast %785 : vector<9x12xf32> to vector<1x9x12xf32>
    %cst_268 = arith.constant dense<0.000000e+00> : vector<1xf32>
    %787 = vector.multi_reduction <add>, %786, %cst_268 [1, 2] : vector<1x9x12xf32> to vector<1xf32>
    %788 = vector.shape_cast %787 : vector<1xf32> to vector<1x1x1xf32>
    %789 = vector.extract %788[0, 0, 0] : f32 from vector<1x1x1xf32>
    %cst_269 = arith.constant 0.000000e+00 : f32
    %790 = arith.subf %cst_269, %789 : f32
    %791 = vector.broadcast %790 : f32 to vector<1x1x128xf32>
    %c0_270 = arith.constant 0 : index
    %c0_271 = arith.constant 0 : index
    %c0_272 = arith.constant 0 : index
    %792 = vector.load %arg6[%c0_270, %c0_271, %c0_272] : memref<1x1x128xf32, #tpu.memory_space<vmem>>, vector<1x1x128xf32>
    tpu.vector_store %arg6[%c0_270, %c0_271, %c0_272], %791 {strides = array<i32>} : memref<1x1x128xf32, #tpu.memory_space<vmem>>, vector<1x1x128xf32>,
    return
  }
  func.func @transform_0(%arg0: i32, %arg1: memref<2xi32, #tpu.memory_space<smem>>) -> (i32, i32, i32) {
    %c0_i32 = arith.constant 0 : i32
    %c0_i32_0 = arith.constant 0 : i32
    %c0_i32_1 = arith.constant 0 : i32
    return %arg0, %c0_i32, %c0_i32_0 : i32, i32, i32
  }
  func.func @transform_1(%arg0: i32, %arg1: memref<2xi32, #tpu.memory_space<smem>>) -> (i32, i32, i32) {
    %c0_i32 = arith.constant 0 : i32
    %c0_i32_0 = arith.constant 0 : i32
    %c0_i32_1 = arith.constant 0 : i32
    return %arg0, %c0_i32, %c0_i32_0 : i32, i32, i32
  }
  func.func @transform_2(%arg0: i32, %arg1: memref<2xi32, #tpu.memory_space<smem>>) -> (i32, i32, i32) {
    %c0_i32 = arith.constant 0 : i32
    %c0_i32_0 = arith.constant 0 : i32
    %c0_i32_1 = arith.constant 0 : i32
    return %arg0, %c0_i32, %c0_i32_0 : i32, i32, i32
  }
  func.func @transform_3(%arg0: i32, %arg1: memref<2xi32, #tpu.memory_space<smem>>) -> (i32, i32) {
    %c0_i32 = arith.constant 0 : i32
    %c0_i32_0 = arith.constant 0 : i32
    %c0_i32_1 = arith.constant 0 : i32
    return %c0_i32, %c0_i32_0 : i32, i32
  }
  func.func @transform_4(%arg0: i32, %arg1: memref<2xi32, #tpu.memory_space<smem>>) -> (i32, i32, i32) {
    %c0_i32 = arith.constant 0 : i32
    %c0_i32_0 = arith.constant 0 : i32
    %c0_i32_1 = arith.constant 0 : i32
    return %arg0, %c0_i32, %c0_i32_0 : i32, i32, i32
  }
}

</mosaic_0001>

<bundles_post_ra>
// kernel: e2e_forward.1
= control target key start
LH: loop header
LB: loop body
LE: loop exit
PB: predicated region body
PF: predicated region fallthrough
CT: control target
= control target key end

     0   :  { %s4725_s21 = smov [#allocation3]   ;;  %s6064_s0 = inlined_call_operand.vmem [shape: s32[2], index: 0, kind: input, shape index: {}]   ;;  %s6065_s1 = inlined_call_operand.vmem [shape: f32[2,10,16], index: 1, kind: input, shape index: {}]   ;;  %s6066_s2 = inlined_call_operand.vmem [shape: f32[2,9,32], index: 2, kind: input, shape index: {}]   ;;  %s6067_s3 = inlined_call_operand.vmem [shape: f32[2,9,12], index: 3, kind: input, shape index: {}]   ;;  %s6068_s4 = inlined_call_operand.hbm [shape: f32[1296,128], index: 4, kind: input, shape index: {}]   ;;  %s6069_s5 = inlined_call_operand.vmem [shape: f32[2,1,128], index: 5, kind: output, shape index: {}]  }
   0x1   :  { %s11_s20 = sshll.u32 %s6064_s0, 4  ;;  %s12_s20 = int_to_ptr.vmem [resolvable:$true] %s11_s20 }
   0x2   :  { %14 = dma.vmem_to_smem %s12_s20, 16, %s4725_s21, [#allocation2] }
   0x3   :  { %4715 = dma.done.wait [#allocation2], 16 }
   0x4   :  { %4716 = vsyncadd [#allocation2], 4294967280 }
   0x5   :  { %17 = sfence }
   0x6   :  { %18 = vsyncpa [#allocation5], 0  ;;  %s4767_s22 = smov 0  }
   0x7 LB: > { %s165_s0 = sshll.u32 %s6068_s4, 4  ;;  %s4776_s25 = sadd.s32 4294967295, %s4723_s22   ;;  %s4723_s22 = sphi %s4767_s22, %s24_s22   ;;  %s166_s0 = int_to_ptr.hbm [resolvable:$true] %s165_s0 }
   0x8   : > { %p4162_p0 = scmp.ge.s32.totalorder %s4723_s22, 1  ;;  %p154_p1 = scmp.lt.s32.totalorder %s4723_s22, 3 }
   0x9   : > { %p4416_p2 = scmp.eq.s32.totalorder %s4776_s25, 0  ;;  %s4726_s26 = smov [#allocation4]  }
   0xa   : > { %p155_p3 = pnand %p4162_p0, %p154_p1  ;;  %s167_s27 = sshll.u32 %s4726_s26, 4  ;;  %s168_s27 = int_to_ptr.vmem [resolvable:$true] %s167_s27 }
   0xb   : > { %s4727_s28 = smov 128   ;;  %s4728_s29 = smov 8  }
   0xc   : > { %p4412_p4 = pneg %p155_p3  ;;  %207 = sbr.rel (%p155_p3) target bundleno = 10960 (0x2ad0), region = 36 }
   0xe   : > { %p4413_p5 = pnand %p4416_p2, %p4412_p4 }
  0x10   : > { %4415 = dma.hbm_to_vmem [thread:$0]  (!%p4413_p5), %s166_s0, 20736, %s168_s27, [#allocation5], %s4727_s28, %s4727_s28, %s4728_s29  }
  0x11   : > { %4718 = dma.done.wait (%p4416_p2), [#allocation5], 20736  }
  0x12   : > { %4720 = vsyncadd (%p4416_p2), [#allocation5], 4294946560  ;;  %p242_p6 = scmp.lt.s32.totalorder %s4776_s25, 1  ;;  %v524_v0 = vld [vmem:[#allocation4 + $0x8] sm:$0xff]  ;;  %v523_v1 = vld [vmem:[#allocation4] sm:$0xff]  ;;  %vm527_vm0 = vcmask 130048  }
  0x13   : > { %548 = vmatpush.msra.mxu0 %v524_v0  ;;  %v4435_v4 = vld [vmem:[#allocation4 + $0x10] ss:$0 sm:$0xff]  ;;  %vm6083_vm1 = vcmask 261120   ;;  %vm6080_vm2 = vcmask 254976   ;;  %v4729_v11 = vmov 32.0   ;;  %v620_v52 = vld [vmem:[#allocation4 + $0x28] sm:$0xff] }
  0x14   : > { %s4783_s30 = scalar_select %p242_p6, %s4776_s25, 1  ;;  %4485 = vrcp.f32 %v4729_v11  ;;  %v4436_v42 = vld [vmem:[#allocation4 + $0x18] ss:$0 sm:$0xff]  ;;  %v4437_v46 = vld [vmem:[#allocation4 + $0x20] ss:$0 sm:$0xff] }
  0x15   : > { %549 = vmatpush.msra.mxu0 %v523_v1  ;;  %v621_v60 = vld [vmem:[#allocation4 + $0x30] sm:$0x3]  ;;  %v678_v11 = vld [vmem:[#allocation4 + $0x58] sm:$0xff]  ;;  %s4730_s10 = smov 96   ;;  %s260_s11 = sld [smem:[#allocation3 + %s4776_s25]] }
  0x16   : > { %s4786_s6 = sshll.u32 %s4783_s30, 4  ;;  %s4733_s12 = smov 64  }
  0x17   : > { %s246_s9 = scalar_lea.vmem %s6065_s1, %s4786_s6  ;;  %s5209_s15 = scalar_lea.vmem %s6066_s2, %s4786_s6 }
  0x18   : > { %v521_v2 = vld [vmem:[%s246_s9] sm:$0xff]  ;;  %v522_v3 = vld [vmem:[%s246_s9 + $0x8] sm:$0x3]  ;;  %s256_s18 = scalar_lea.vmem %s6067_s3, %s4786_s6  ;;  %s259_s23 = scalar_lea.vmem %s6069_s5, %s4783_s30 }
  0x19   : > { %4192 = vmatmul.msk.f32.vlgmr.msra.gmra.mxu0 %vm527_vm0, %v521_v2 }
  0x1a   : > { %v4486_v12 = vpop.eup %4485 }
  0x1b   : > { %v566_v13 = vmul.f32 32.0, %v4486_v12  ;;  %vm570_vm3 = vweird.f32 %v4486_v12 }
  0x1d   : > { %v567_v14 = vsub.f32 1.0, %v566_v13  ;;  %v676_v13 = vld [vmem:[#allocation4 + $0x48] sm:$0xff] }
  0x1f   : > { %v568_v15 = vmul.f32 %v4486_v12, %v567_v14 }
  0x21   : > { %4193 = vmatmul.msk.f32.gmra.mxu0 %vm527_vm0, %v522_v3  ;;  %v569_v16 = vadd.f32 %v4486_v12, %v568_v15  ;;  %vm6078_vm0 = vcmask 1041408  }
  0x23   : > { %v4794_v17 = vsel %vm570_vm3, %v4486_v12, %v569_v16  ;;  %v677_v12 = vld [vmem:[#allocation4 + $0x50] sm:$0xff] }
  0x96   : > { %v551_v5 = vpop.f32.mrf.mxu0 }
  0x97   : > { %v552_v6 = vadd.f32 %v4435_v4, %v551_v5 }
  0x99   : > { %v558_v7 = vsel %vm6083_vm1, %v552_v6, 0.0 }
  0x9a   : > { %559 = vadd.xlane.f32.xlu0 %v558_v7 }
  0x9e   : > { %v554_v8 = vpop.f32.mrf.mxu0 }
  0x9f   : > { %v555_v9 = vadd.f32 %v4435_v4, %v554_v8 }
  0xa1   : > { %v562_v10 = vsel %vm6080_vm2, %v555_v9, 0.0 }
  0xa2   : > { %563 = vadd.xlane.f32.xlu0 %v562_v10  ;;  %v679_v10 = vld [vmem:[#allocation4 + $0x60] sm:$0xff] }
  0xa3   : > { %700 = vmatpush.msra.mxu1 %v679_v10 }
  0xa5   : > { %701 = vmatpush.msra.mxu1 %v678_v11 }
  0xa7   : > { %702 = vmatpush.msra.mxu1 %v677_v12 }
  0xa9   : > { %703 = vmatpush.msra.mxu1 %v676_v13 }
 0x10d   : > { %v560_v18 = vpop.xlane.xlu0 %559 }
 0x10e   : > { %v572_v19 = vmul.f32 %v4794_v17, %v560_v18 }
 0x110   : > { %v574_v20 = vsub.f32 %v552_v6, %v572_v19 }
 0x112   : > { %v576_v21 = vmul.f32 %v574_v20, %v574_v20 }
 0x114   : > { %v578_v22 = vsel %vm6083_vm1, %v576_v21, 0.0 }
 0x115   : > { %579 = vadd.xlane.f32.xlu1 %v578_v22  ;;  %v564_v23 = vpop.xlane.xlu0 %563 }
 0x116   : > { %v573_v24 = vmul.f32 %v4794_v17, %v564_v23 }
 0x118   : > { %v575_v25 = vsub.f32 %v555_v9, %v573_v24 }
 0x11a   : > { %v577_v26 = vmul.f32 %v575_v25, %v575_v25 }
 0x11c   : > { %v581_v27 = vsel %vm6080_vm2, %v577_v26, 0.0 }
 0x11d   : > { %582 = vadd.xlane.f32.xlu1 %v581_v27 }
 0x188   : > { %v580_v28 = vpop.xlane.xlu1 %579 }
 0x189   : > { %v584_v29 = vmul.f32 %v580_v28, %v4794_v17 }
 0x18b   : > { %v586_v30 = vadd.f32 1e-12, %v584_v29  ;;  %v4438_v29 = vld [vmem:[#allocation4 + $0x38] ss:$0 sm:$0xff] }
 0x18d   : > { %4487 = vrsqrt.f32 %v586_v30  ;;  %vm594_vm5 = vweird.f32 %v586_v30 }
 0x190   : > { %v583_v31 = vpop.xlane.xlu1 %582 }
 0x191   : > { %v585_v32 = vmul.f32 %v583_v31, %v4794_v17 }
 0x193   : > { %v4488_v33 = vpop.eup %4487  ;;  %v587_v34 = vadd.f32 1e-12, %v585_v32 }
 0x194   : > { %v589_v35 = vmul.f32 %v4488_v33, %v586_v30  ;;  %vm595_vm4 = vweird.f32 %v4488_v33 }
 0x195   : > { %4489 = vrsqrt.f32 %v587_v34  ;;  %vm596_vm6 = vmor %vm594_vm5, %vm595_vm4  ;;  %vm604_vm8 = vweird.f32 %v587_v34  ;;  %vm6074_vm4 = vcmask 80896  }
 0x196   : > { %v590_v36 = vmul.f32 %v4488_v33, %v589_v35 }
 0x198   : > { %v591_v37 = vmul.f32 0.5, %v590_v36 }
 0x19a   : > { %v592_v38 = vsub.f32 1.5, %v591_v37 }
 0x19b   : > { %v4490_v39 = vpop.eup %4489 }
 0x19c   : > { %v593_v40 = vmul.f32 %v4488_v33, %v592_v38  ;;  %v599_v41 = vmul.f32 %v4490_v39, %v587_v34  ;;  %vm605_vm7 = vweird.f32 %v4490_v39 }
 0x19d   : > { %vm606_vm9 = vmor %vm604_vm8, %vm605_vm7 }
 0x19e   : > { %v597_v43 = vsel %vm596_vm6, %v4488_v33, %v593_v40  ;;  %v600_v44 = vmul.f32 %v4490_v39, %v599_v41  ;;  %v4439_v33 = vld [vmem:[#allocation4 + $0x40] ss:$0 sm:$0xff] }
 0x19f   : > { %v608_v45 = vmul.f32 %v597_v43, %v574_v20  ;;  %v4440_v43 = vld [vmem:[#allocation4 + $0x68] ss:$0 sm:$0xff] }
 0x1a0   : > { %v601_v47 = vmul.f32 0.5, %v600_v44 }
 0x1a1   : > { %v612_v48 = vmul.f32 %v4436_v42, %v608_v45  ;;  %v261_v45 = vlaneseq }
 0x1a2   : > { %v602_v49 = vsub.f32 1.5, %v601_v47 }
 0x1a3   : > { %v616_v50 = vadd.f32 %v4437_v46, %v612_v48  ;;  %v4824_v47 = vshrl.u32 %v261_v45, 7  ;;  %v4826_v48 = vand.u32 127, %v261_v45 }
 0x1a4   : > { %v603_v51 = vmul.f32 %v4490_v39, %v602_v49 }
 0x1a5   : > { %v618_v53 = vmax.f32 %v616_v50, 0.0  ;;  %vm269_vm3 = vcmp.eq.s32.totalorder %v4824_v47, %v4826_v48 }
 0x1a6   : > { %v607_v54 = vsel %vm606_vm9, %v4490_v39, %v603_v51  ;;  %v4833_v51 = vadd.s32 8, %v4824_v47 }
 0x1a7   : > { %v609_v55 = vmul.f32 %v607_v54, %v575_v25  ;;  %v4802_v56 = vadd.f32 %v620_v52, %v618_v53  ;;  %v274_v52 = vadd.s32 10, %v4826_v48  ;;  %v4731_v53 = vmov 0.0  }
 0x1a8   : > { %v4841_v54 = vsel %vm269_vm3, 1.0, %v4731_v53  ;;  %vm6073_vm5 = vcmp.eq.s32.totalorder %v4833_v51, %v4826_v48 }
 0x1a9   : > { %v624_v57 = vsel %vm6083_vm1, %v4802_v56, 0.0  ;;  %v613_v58 = vmul.f32 %v4436_v42, %v609_v55  ;;  %vm276_vm6 = vcmp.eq.s32.totalorder %v4833_v51, %v274_v52  ;;  %v4850_v55 = vadd.s32 16, %v4824_v47 }
 0x1aa   : > { %625 = vadd.xlane.f32.xlu2 %v624_v57  ;;  %vm281_vm7 = vmor %vm6073_vm5, %vm276_vm6  ;;  %v285_v57 = vadd.s32 20, %v4826_v48 }
 0x1ab   : > { %v617_v59 = vadd.f32 %v4437_v46, %v613_v58  ;;  %vm6072_vm8 = vcmp.eq.s32.totalorder %v4850_v55, %v4826_v48  ;;  %vm277_vm9 = vcmp.eq.s32.totalorder %v4850_v55, %v274_v52  ;;  %v4860_v58 = vsel %vm281_vm7, 1.0, %v4731_v53 }
 0x1ad   : > { %v619_v61 = vmax.f32 %v617_v59, 0.0  ;;  %v4863_v59 = vadd.s32 24, %v4824_v47 }
 0x1af   : > { %v4806_v62 = vadd.f32 %v621_v60, %v619_v61  ;;  %v296_v60 = vadd.s32 30, %v4826_v48  ;;  %vm289_vm3 = vcmp.eq.s32.totalorder %v4863_v59, %v285_v57 }
 0x1b1   : > { %v627_v63 = vsel %vm6080_vm2, %v4806_v62, 0.0  ;;  %vm300_vm7 = vcmp.eq.s32.totalorder %v4863_v59, %v296_v60 }
 0x1b2   : > { %628 = vadd.xlane.f32.xlu2 %v627_v63  ;;  %v4883_v63 = vadd.s32 32, %v4824_v47 }
 0x21d   : > { %v626_v0 = vpop.xlane.xlu2 %625 }
 0x21e   : > { %v630_v1 = vmul.f32 %v626_v0, %v4794_v17 }
 0x220   : > { %v632_v2 = vsub.f32 %v4802_v56, %v630_v1 }
 0x222   : > { %v634_v3 = vmul.f32 %v632_v2, %v632_v2 }
 0x224   : > { %v636_v4 = vsel %vm6083_vm1, %v634_v3, 0.0 }
 0x225   : > { %637 = vadd.xlane.f32.xlu0 %v636_v4  ;;  %v629_v5 = vpop.xlane.xlu2 %628  ;;  %v4732_v4 = vmov 0  }
 0x226   : > { %v631_v6 = vmul.f32 %v629_v5, %v4794_v17 }
 0x228   : > { %v633_v7 = vsub.f32 %v4806_v62, %v631_v6 }
 0x22a   : > { %v635_v8 = vmul.f32 %v633_v7, %v633_v7 }
 0x22c   : > { %v639_v9 = vsel %vm6080_vm2, %v635_v8, 0.0 }
 0x22d   : > { %640 = vadd.xlane.f32.xlu1 %v639_v9 }
 0x298   : > { %v638_v14 = vpop.xlane.xlu0 %637 }
 0x299   : > { %v642_v15 = vmul.f32 %v638_v14, %v4794_v17 }
 0x29b   : > { %v644_v16 = vadd.f32 1e-12, %v642_v15 }
 0x29d   : > { %4491 = vrsqrt.f32 %v644_v16  ;;  %vm652_vm11 = vweird.f32 %v644_v16 }
 0x2a0   : > { %v641_v18 = vpop.xlane.xlu1 %640 }
 0x2a1   : > { %v643_v19 = vmul.f32 %v641_v18, %v4794_v17 }
 0x2a3   : > { %v4492_v20 = vpop.eup %4491  ;;  %v645_v21 = vadd.f32 1e-12, %v643_v19  ;;  %v1619_v19 = vld [vmem:[#allocation4 + $0x168] sm:$0xff] }
 0x2a4   : > { %v647_v22 = vmul.f32 %v4492_v20, %v644_v16  ;;  %vm653_vm10 = vweird.f32 %v4492_v20 }
 0x2a5   : > { %4493 = vrsqrt.f32 %v645_v21  ;;  %vm654_vm12 = vmor %vm652_vm11, %vm653_vm10  ;;  %vm662_vm14 = vweird.f32 %v645_v21  ;;  %vm288_vm11 = vcmp.eq.s32.totalorder %v4850_v55, %v285_v57 }
 0x2a6   : > { %v648_v23 = vmul.f32 %v4492_v20, %v647_v22  ;;  %vm282_vm10 = vmor %vm6072_vm8, %vm277_vm9  ;;  %vm6071_vm9 = vcmp.eq.s32.totalorder %v4883_v63, %v4826_v48 }
 0x2a8   : > { %v649_v24 = vmul.f32 0.5, %v648_v23 }
 0x2aa   : > { %v650_v25 = vsub.f32 1.5, %v649_v24  ;;  %v1618_v24 = vld [vmem:[#allocation4 + $0x160] sm:$0xff] }
 0x2ab   : > { %v4494_v26 = vpop.eup %4493 }
 0x2ac   : > { %v651_v27 = vmul.f32 %v4492_v20, %v650_v25  ;;  %v657_v28 = vmul.f32 %v4494_v26, %v645_v21  ;;  %vm663_vm13 = vweird.f32 %v4494_v26 }
 0x2ad   : > { %vm664_vm15 = vmor %vm662_vm14, %vm663_vm13  ;;  %vm278_vm13 = vcmp.eq.s32.totalorder %v4863_v59, %v274_v52 }
 0x2ae   : > { %v655_v30 = vsel %vm654_vm12, %v4492_v20, %v651_v27  ;;  %v658_v31 = vmul.f32 %v4494_v26, %v657_v28  ;;  %vm6070_vm12 = vcmp.eq.s32.totalorder %v4863_v59, %v4826_v48  ;;  %vm293_vm14 = vmor %vm282_vm10, %vm288_vm11  ;;  %vm279_vm10 = vcmp.eq.s32.totalorder %v4883_v63, %v274_v52 }
 0x2af   : > { %v666_v32 = vmul.f32 %v655_v30, %v632_v2  ;;  %v4880_v61 = vsel %vm293_vm14, 1.0, %v4731_v53  ;;  %vm290_vm14 = vcmp.eq.s32.totalorder %v4883_v63, %v285_v57 }
 0x2b0   : > { %v659_v34 = vmul.f32 0.5, %v658_v31  ;;  %v3779_v31 = vld [vmem:[#allocation4 + $0x448] sm:$0xff] }
 0x2b1   : > { %v670_v35 = vmul.f32 %v4438_v29, %v666_v32 }
 0x2b2   : > { %v660_v36 = vsub.f32 1.5, %v659_v34 }
 0x2b3   : > { %v674_v37 = vadd.f32 %v4439_v33, %v670_v35 }
 0x2b4   : > { %v661_v38 = vmul.f32 %v4494_v26, %v660_v36 }
 0x2b5   : > { %4194 = vmatmul.msk.f32.vlgmr.msra.gmra.mxu1 %vm6083_vm1, %v674_v37 }
 0x2b6   : > { %v665_v39 = vsel %vm664_vm15, %v4494_v26, %v661_v38  ;;  %vm283_vm15 = vmor %vm6070_vm12, %vm278_vm13 }
 0x2b7   : > { %v667_v40 = vmul.f32 %v665_v39, %v633_v7  ;;  %vm294_vm6 = vmor %vm283_vm15, %vm289_vm3  ;;  %vm301_vm3 = vcmp.eq.s32.totalorder %v4883_v63, %v296_v60 }
 0x2b8   : > { %vm305_vm11 = vmor %vm294_vm6, %vm300_vm7  ;;  %vm337_vm6 = vcmp.ge.s32.totalorder %v4826_v48, 8  ;;  %vm354_vm7 = vcmp.ge.s32.totalorder %v4826_v48, 16 }
 0x2b9   : > { %v671_v41 = vmul.f32 %v4438_v29, %v667_v40  ;;  %vm284_vm13 = vmor %vm6071_vm9, %vm279_vm10  ;;  %v4896_v0 = vsel %vm305_vm11, 1.0, %v4731_v53  ;;  %v338_v5 = vsel %vm337_vm6, 1, %v4732_v4  ;;  %v355_v6 = vsel %vm354_vm7, 1, %v4732_v4 }
 0x2ba   : > { %vm295_vm15 = vmor %vm284_vm13, %vm290_vm14  ;;  %v356_v7 = vadd.s32 %v355_v6, %v338_v5  ;;  %vm328_vm11 = vcmp.ge.s32.totalorder %v4833_v51, 10  ;;  %vm341_vm13 = vcmp.ge.s32.totalorder %v4850_v55, 20  ;;  %v514_v29 = vstv %s260_s11 }
 0x2bb   : > { %v675_v42 = vadd.f32 %v4439_v33, %v671_v41  ;;  %vm306_vm12 = vmor %vm295_vm15, %vm301_vm3  ;;  %v333_v12 = vsel %vm328_vm11, 1, %v4732_v4  ;;  %v346_v14 = vsel %vm341_vm13, 1, %v4732_v4  ;;  %vm360_vm15 = vcmp.ge.s32.totalorder %v4863_v59, 30 }
 0x2bc   : > { %v4902_v1 = vsel %vm306_vm12, 1.0, %v4731_v53  ;;  %vm372_vm12 = vcmp.ge.s32.totalorder %v4826_v48, 24  ;;  %v351_v18 = vadd.s32 1, %v346_v14  ;;  %v365_v20 = vsel %vm360_vm15, 1, %v4732_v4 }
 0x2bd   : > { %4195 = vmatmul.msk.f32.gmra.mxu1 %vm6083_vm1, %v675_v42  ;;  %v373_v8 = vsel %vm372_vm12, 1, %v4732_v4  ;;  %v370_v23 = vadd.s32 2, %v365_v20  ;;  %vm4956_vm12 = vcmp.lt.s32.totalorder %v4826_v48, %v514_v29 }
 0x2be   : > { %v4914_v9 = vadd.s32 %v373_v8, %v356_v7 }
 0x2c0   : > { %vm6084_vm10 = vcmp.eq.s32.totalorder %v4914_v9, 0  ;;  %vm4924_vm14 = vcmp.eq.s32.totalorder %v333_v12, %v4914_v9  ;;  %vm4934_vm3 = vcmp.eq.s32.totalorder %v351_v18, %v4914_v9  ;;  %vm4943_vm6 = vcmp.eq.s32.totalorder %v370_v23, %v4914_v9 }
 0x2c1   : > { %vm6076_vm7 = vcmp.eq.s32.totalorder %v4914_v9, 3 }
 0x332   : > { %v705_v44 = vpop.f32.mrf.mxu1 }
 0x333   : > { %v4820_v46 = vadd.f32 %v4440_v43, %v705_v44 }
 0x335   : > { %769 = vrot.lane.b32.xlu0 %v4820_v46, %s4730_s10 }
 0x33a   : > { %v708_v49 = vpop.f32.mrf.mxu1 }
 0x33b   : > { %v4830_v50 = vadd.f32 %v4440_v43, %v708_v49 }
 0x33d   : > { %771 = vrot.lane.b32.xlu2 %v4830_v50, %s4730_s10  ;;  %4196 = vmatpush.msk.msra.mxu2 %vm6078_vm0, %v4830_v50 }
 0x33f   : > { %746 = vmatpush.msra.mxu2 %v4820_v46 }
 0x340   : > { %4197 = vmatmul.msk.f32.vlgmr.msra.gmra.mxu2 %vm6074_vm4, %v4841_v54 }
 0x348   : > { %4198 = vmatmul.msk.f32.gmra.mxu2 %vm6074_vm4, %v4860_v58 }
 0x350   : > { %4199 = vmatmul.msk.f32.gmra.mxu2 %vm6074_vm4, %v4880_v61 }
 0x358   : > { %4200 = vmatmul.msk.f32.gmra.mxu2 %vm6074_vm4, %v4896_v0 }
 0x360   : > { %4201 = vmatmul.msk.f32.gmra.mxu2 %vm6074_vm4, %v4902_v1 }
 0x397   : > { %v772_v2 = vpop.permute.xlu2 %771 }
 0x398   : > { %4202 = vmatpush.xpose.msk.msra.mxu3 %vm6083_vm1, %v772_v2 }
 0x3a7   : > { %v770_v3 = vpop.permute.xlu0 %769 }
 0x3a8   : > { %4203 = vmatpush.xpose.msk.msra.mxu3 %vm6083_vm1, %v770_v3 }
 0x3c3   : > { %v748_v10 = vpop.f32.mrf.mxu2 }
 0x3c4   : > { %v763_v11 = vsel %vm6084_vm10, %v748_v10, 0.0 }
 0x3c5   : > { %4204 = vmatmul.msk.f32.vlgmr.msra.gmra.mxu3 %vm6083_vm1, %v763_v11 }
 0x3cb   : > { %v751_v15 = vpop.f32.mrf.mxu2 }
 0x3cc   : > { %v764_v16 = vsel %vm4924_vm14, %v751_v15, 0.0 }
 0x3cd   : > { %4205 = vmatmul.msk.f32.gmra.mxu3 %vm6083_vm1, %v764_v16 }
 0x3d3   : > { %v754_v21 = vpop.f32.mrf.mxu2 }
 0x3d4   : > { %v765_v22 = vsel %vm4934_vm3, %v754_v21, 0.0 }
 0x3d5   : > { %4206 = vmatmul.msk.f32.gmra.mxu3 %vm6083_vm1, %v765_v22 }
 0x3db   : > { %v757_v25 = vpop.f32.mrf.mxu2 }
 0x3dc   : > { %v766_v26 = vsel %vm4943_vm6, %v757_v25, 0.0 }
 0x3dd   : > { %4207 = vmatmul.msk.f32.gmra.mxu3 %vm6083_vm1, %v766_v26 }
 0x3e3   : > { %v760_v27 = vpop.f32.mrf.mxu2 }
 0x3e4   : > { %v767_v28 = vsel %vm6076_vm7, %v760_v27, 0.0 }
 0x3e5   : > { %4208 = vmatmul.msk.f32.gmra.mxu3 %vm6083_vm1, %v767_v28 }
 0x448   : > { %v809_v30 = vpop.f32.mrf.mxu3 }
 0x449   : > { %v824_v32 = vmul.f32 0.35355338, %v809_v30 }
 0x44b   : > { %v829_v33 = vsel %vm4956_vm12, %v824_v32, -3.4028235e+38 }
 0x44c   : > { %v834_v34 = vsel %vm6074_vm4, %v829_v33, -inf }
 0x44d   : > { %835 = vmax.xlane.f32.xlu1 %v834_v34 }
 0x450   : > { %v812_v35 = vpop.f32.mrf.mxu3 }
 0x451   : > { %v825_v36 = vmul.f32 0.35355338, %v812_v35 }
 0x453   : > { %v830_v37 = vsel %vm4956_vm12, %v825_v36, -3.4028235e+38 }
 0x454   : > { %v837_v38 = vsel %vm6074_vm4, %v830_v37, -inf }
 0x455   : > { %838 = vmax.xlane.f32.xlu1 %v837_v38 }
 0x458   : > { %v815_v39 = vpop.f32.mrf.mxu3 }
 0x459   : > { %v826_v40 = vmul.f32 0.35355338, %v815_v39 }
 0x45b   : > { %v831_v41 = vsel %vm4956_vm12, %v826_v40, -3.4028235e+38 }
 0x45c   : > { %v840_v42 = vsel %vm6074_vm4, %v831_v41, -inf }
 0x45d   : > { %841 = vmax.xlane.f32.xlu1 %v840_v42 }
 0x460   : > { %v818_v43 = vpop.f32.mrf.mxu3 }
 0x461   : > { %v827_v44 = vmul.f32 0.35355338, %v818_v43 }
 0x463   : > { %v832_v45 = vsel %vm4956_vm12, %v827_v44, -3.4028235e+38 }
 0x464   : > { %v843_v49 = vsel %vm6074_vm4, %v832_v45, -inf }
 0x465   : > { %844 = vmax.xlane.f32.xlu2 %v843_v49 }
 0x468   : > { %v821_v52 = vpop.f32.mrf.mxu3 }
 0x469   : > { %v828_v57 = vmul.f32 0.35355338, %v821_v52 }
 0x46b   : > { %v833_v60 = vsel %vm4956_vm12, %v828_v57, -3.4028235e+38 }
 0x46c   : > { %v846_v2 = vsel %vm6074_vm4, %v833_v60, -inf }
 0x46d   : > { %847 = vmax.xlane.f32.xlu0 %v846_v2 }
 0x47d   : > { %959 = vrot.lane.b32.xlu2 %v4820_v46, %s4733_s12 }
 0x4c0   : > { %v836_v3 = vpop.xlane.xlu1 %835 }
 0x4c1   : > { %v849_v5 = vsub.f32 %v829_v33, %v836_v3 }
 0x4c3   : > { %v854_v6 = vmul.f32 1.442695, %v849_v5 }
 0x4c5   : > { %4495 = vpow2.f32 %v854_v6 }
 0x4c8   : > { %v839_v7 = vpop.xlane.xlu1 %838 }
 0x4c9   : > { %v850_v8 = vsub.f32 %v830_v37, %v839_v7 }
 0x4cb   : > { %v4977_v10 = vpop.eup %4495  ;;  %v856_v11 = vmul.f32 1.442695, %v850_v8 }
 0x4cc   : > { %v864_v12 = vsel %vm6074_vm4, %v4977_v10, 0.0 }
 0x4cd   : > { %4497 = vpow2.f32 %v856_v11  ;;  %865 = vadd.xlane.f32.xlu1 %v864_v12 }
 0x4d0   : > { %v842_v14 = vpop.xlane.xlu1 %841 }
 0x4d1   : > { %v851_v15 = vsub.f32 %v831_v41, %v842_v14 }
 0x4d3   : > { %v4981_v16 = vpop.eup %4497  ;;  %v858_v18 = vmul.f32 1.442695, %v851_v15 }
 0x4d4   : > { %v867_v46 = vsel %vm6074_vm4, %v4981_v16, 0.0 }
 0x4d5   : > { %4499 = vpow2.f32 %v858_v18  ;;  %868 = vadd.xlane.f32.xlu1 %v867_v46 }
 0x4d8   : > { %v845_v20 = vpop.xlane.xlu2 %844 }
 0x4d9   : > { %v852_v21 = vsub.f32 %v832_v45, %v845_v20 }
 0x4db   : > { %v4985_v22 = vpop.eup %4499  ;;  %v860_v23 = vmul.f32 1.442695, %v852_v21 }
 0x4dc   : > { %v870_v25 = vsel %vm6074_vm4, %v4985_v22, 0.0 }
 0x4dd   : > { %4501 = vpow2.f32 %v860_v23  ;;  %871 = vadd.xlane.f32.xlu1 %v870_v25 }
 0x4e0   : > { %v848_v26 = vpop.xlane.xlu0 %847  ;;  %v960_v23 = vpop.permute.xlu2 %959 }
 0x4e1   : > { %v853_v27 = vsub.f32 %v833_v60, %v848_v26 }
 0x4e3   : > { %v4989_v28 = vpop.eup %4501  ;;  %v862_v29 = vmul.f32 1.442695, %v853_v27 }
 0x4e4   : > { %v873_v30 = vsel %vm6074_vm4, %v4989_v28, 0.0 }
 0x4e5   : > { %4503 = vpow2.f32 %v862_v29  ;;  %874 = vadd.xlane.f32.xlu0 %v873_v30 }
 0x4eb   : > { %v4993_v32 = vpop.eup %4503 }
 0x4ec   : > { %v876_v33 = vsel %vm6074_vm4, %v4993_v32, 0.0 }
 0x4ed   : > { %877 = vadd.xlane.f32.xlu0 %v876_v33 }
 0x4f6   : > { %961 = vrot.lane.b32.xlu1 %v4830_v50, %s4733_s12 }
 0x540   : > { %v866_v34 = vpop.xlane.xlu1 %865 }
 0x541   : > { %4505 = vrcp.f32 %v866_v34  ;;  %v890_v52 = vand.u32 2147483648, %v866_v34  ;;  %vm884_vm13 = vweird.f32 %v866_v34  ;;  %v888_v50 = vand.u32 2147483647, %v866_v34 }
 0x543   : > { %v891_v3 = vor.u32 1.1754944e-38, %v890_v52  ;;  %vm889_vm9 = vcmp.eq.f32.partialorder %v888_v50, 8.507059e+37 }
 0x547   : > { %v4506_v36 = vpop.eup %4505 }
 0x548   : > { %v869_v35 = vpop.xlane.xlu1 %868  ;;  %v880_v37 = vmul.f32 %v4506_v36, %v866_v34  ;;  %vm885_vm11 = vweird.f32 %v4506_v36 }
 0x549   : > { %4507 = vrcp.f32 %v869_v35  ;;  %vm886_vm15 = vmor %vm884_vm13, %vm885_vm11  ;;  %v904_v12 = vand.u32 2147483648, %v869_v35  ;;  %vm898_vm5 = vweird.f32 %v869_v35  ;;  %v902_v15 = vand.u32 2147483647, %v869_v35 }
 0x54a   : > { %v881_v38 = vsub.f32 1.0, %v880_v37 }
 0x54b   : > { %v905_v25 = vor.u32 1.1754944e-38, %v904_v12 }
 0x54c   : > { %v882_v41 = vmul.f32 %v4506_v36, %v881_v38 }
 0x54e   : > { %v883_v44 = vadd.f32 %v4506_v36, %v882_v41 }
 0x54f   : > { %v4508_v40 = vpop.eup %4507 }
 0x550   : > { %v872_v39 = vpop.xlane.xlu1 %871  ;;  %v894_v42 = vmul.f32 %v4508_v40, %v869_v35  ;;  %v887_v2 = vsel %vm886_vm15, %v4506_v36, %v883_v44  ;;  %vm899_vm8 = vweird.f32 %v4508_v40 }
 0x551   : > { %4509 = vrcp.f32 %v872_v39  ;;  %v892_v5 = vsel %vm889_vm9, %v891_v3, %v887_v2  ;;  %vm900_vm11 = vmor %vm898_vm5, %vm899_vm8  ;;  %vm903_vm9 = vcmp.eq.f32.partialorder %v902_v15, 8.507059e+37  ;;  %v918_v33 = vand.u32 2147483648, %v872_v39 }
 0x552   : > { %v895_v45 = vsub.f32 1.0, %v894_v42  ;;  %v949_v14 = vmul.f32 %v4977_v10, %v892_v5  ;;  %vm912_vm5 = vweird.f32 %v872_v39  ;;  %v916_v35 = vand.u32 2147483647, %v872_v39 }
 0x554   : > { %v896_v57 = vmul.f32 %v4508_v40, %v895_v45  ;;  %v954_v26 = vsel %vm4956_vm12, %v949_v14, 0.0  ;;  %vm917_vm15 = vcmp.eq.f32.partialorder %v916_v35, 8.507059e+37  ;;  %v1048_v35 = vld [vmem:[#allocation4 + $0x70] sm:$0xff] }
 0x556   : > { %v897_v8 = vadd.f32 %v4508_v40, %v896_v57 }
 0x557   : > { %v4510_v49 = vpop.eup %4509 }
 0x558   : > { %v4999_v43 = vpop.xlane.xlu0 %874  ;;  %v908_v60 = vmul.f32 %v4510_v49, %v872_v39  ;;  %v901_v21 = vsel %vm900_vm11, %v4508_v40, %v897_v8  ;;  %vm913_vm13 = vweird.f32 %v4510_v49  ;;  %v919_v40 = vor.u32 1.1754944e-38, %v918_v33  ;;  %v1049_v33 = vld [vmem:[#allocation4 + $0x78] sm:$0xff] }
 0x559   : > { %4511 = vrcp.f32 %v4999_v43  ;;  %v906_v10 = vsel %vm903_vm9, %v905_v25, %v901_v21  ;;  %vm914_vm8 = vmor %vm912_vm5, %vm913_vm13  ;;  %v932_v52 = vand.u32 2147483648, %v4999_v43  ;;  %vm926_vm9 = vweird.f32 %v4999_v43 }
 0x55a   : > { %v909_v6 = vsub.f32 1.0, %v908_v60  ;;  %v950_v34 = vmul.f32 %v4981_v16, %v906_v10  ;;  %v930_v39 = vand.u32 2147483647, %v4999_v43  ;;  %v315_v21 = vadd.s32 20, %v4824_v47 }
 0x55b   : > { %v933_v57 = vor.u32 1.1754944e-38, %v932_v52  ;;  %v322_v10 = vadd.s32 30, %v4833_v51 }
 0x55c   : > { %v910_v46 = vmul.f32 %v4510_v49, %v909_v6  ;;  %v955_v41 = vsel %vm4956_vm12, %v950_v34, 0.0  ;;  %vm931_vm5 = vcmp.eq.f32.partialorder %v930_v39, 8.507059e+37 }
 0x55e   : > { %v911_v29 = vadd.f32 %v4510_v49, %v910_v46  ;;  %v309_v46 = vadd.s32 10, %v4824_v47 }
 0x55f   : > { %v4512_v11 = vpop.eup %4511 }
 0x560   : > { %v5002_v7 = vpop.xlane.xlu0 %877  ;;  %v922_v20 = vmul.f32 %v4512_v11, %v4999_v43  ;;  %v915_v38 = vsel %vm914_vm8, %v4510_v49, %v911_v29  ;;  %vm927_vm11 = vweird.f32 %v4512_v11  ;;  %v1051_v29 = vld [vmem:[#allocation4 + $0x88] sm:$0xff] }
 0x561   : > { %4513 = vrcp.f32 %v5002_v7  ;;  %v920_v42 = vsel %vm917_vm15, %v919_v40, %v915_v38  ;;  %vm928_vm13 = vmor %vm926_vm9, %vm927_vm11  ;;  %v946_v5 = vand.u32 2147483648, %v5002_v7  ;;  %vm940_vm15 = vweird.f32 %v5002_v7  ;;  %v4441_v38 = vld [vmem:[#allocation4 + $0x90] ss:$0 sm:$0xff] }
 0x562   : > { %v923_v27 = vsub.f32 1.0, %v922_v20  ;;  %v951_v16 = vmul.f32 %v4985_v22, %v920_v42  ;;  %v944_v43 = vand.u32 2147483647, %v5002_v7 }
 0x563   : > { %v947_v8 = vor.u32 1.1754944e-38, %v946_v5 }
 0x564   : > { %v924_v36 = vmul.f32 %v4512_v11, %v923_v27  ;;  %v956_v60 = vsel %vm4956_vm12, %v951_v16, 0.0  ;;  %vm945_vm9 = vcmp.eq.f32.partialorder %v944_v43, 8.507059e+37  ;;  %v1140_v43 = vld [vmem:[#allocation4 + $0xc0] sm:$0xff] }
 0x565   : > { %1161 = vmatpush.msrb.mxu2 %v1140_v43  ;;  %v4444_v43 = vld [vmem:[#allocation4 + $0xc8] ss:$0 sm:$0xff] }
 0x566   : > { %v925_v45 = vadd.f32 %v4512_v11, %v924_v36 }
 0x567   : > { %v4514_v30 = vpop.eup %4513 }
 0x568   : > { %v962_v18 = vpop.permute.xlu1 %961  ;;  %v936_v37 = vmul.f32 %v4514_v30, %v5002_v7  ;;  %v929_v50 = vsel %vm928_vm13, %v4512_v11, %v925_v45  ;;  %vm941_vm8 = vweird.f32 %v4514_v30  ;;  %vm6075_vm13 = vcmp.eq.s32.totalorder %v4826_v48, %v4824_v47 }
 0x569   : > { %4209 = vmatpush.msk.msrb.mxu0 %vm6078_vm0, %v962_v18  ;;  %v934_v2 = vsel %vm931_vm5, %v933_v57, %v929_v50  ;;  %vm942_vm11 = vmor %vm940_vm15, %vm941_vm8  ;;  %vm311_vm5 = vcmp.eq.s32.totalorder %v4826_v48, %v309_v46  ;;  %vm317_vm15 = vcmp.eq.s32.totalorder %v4826_v48, %v315_v21  ;;  %v1178_v21 = vld [vmem:[#allocation4 + $0xf0] sm:$0xff] }
 0x56a   : > { %v937_v44 = vsub.f32 1.0, %v936_v37  ;;  %v952_v22 = vmul.f32 %v4989_v28, %v934_v2  ;;  %vm313_vm8 = vmor %vm6075_vm13, %vm311_vm5 }
 0x56b   : > { %996 = vmatpush.msrb.mxu0 %v960_v23  ;;  %v310_v23 = vadd.s32 10, %v4833_v51 }
 0x56c   : > { %4210 = vmatmul.msk.f32.vlgmr.msrb.gmra.mxu0 %vm6074_vm4, %v954_v26  ;;  %v938_v49 = vmul.f32 %v4514_v30, %v937_v44  ;;  %v957_v11 = vsel %vm4956_vm12, %v952_v22, 0.0  ;;  %v316_v26 = vadd.s32 20, %v4833_v51 }
 0x56d   : > { %vm312_vm5 = vcmp.eq.s32.totalorder %v4826_v48, %v310_v23 }
 0x56e   : > { %v939_v3 = vadd.f32 %v4514_v30, %v938_v49 }
 0x570   : > { %v943_v6 = vsel %vm942_vm11, %v4514_v30, %v939_v3  ;;  %vm319_vm11 = vmor %vm313_vm8, %vm317_vm15  ;;  %vm318_vm15 = vcmp.eq.s32.totalorder %v4826_v48, %v316_v26  ;;  %v1050_v30 = vld [vmem:[#allocation4 + $0x80] sm:$0xff] }
 0x571   : > { %v948_v12 = vsel %vm945_vm9, %v947_v8, %v943_v6  ;;  %v1139_v6 = vld [vmem:[#allocation4 + $0xb8] sm:$0xff]  ;;  %v1138_v8 = vld [vmem:[#allocation4 + $0xb0] sm:$0xff] }
 0x572   : > { %v953_v14 = vmul.f32 %v4993_v32, %v948_v12  ;;  %v321_v32 = vadd.s32 30, %v4824_v47  ;;  %1162 = vmatpush.msrb.mxu2 %v1139_v6 }
 0x574   : > { %4211 = vmatmul.msk.f32.gmra.mxu0 %vm6074_vm4, %v955_v41  ;;  %v958_v15 = vsel %vm4956_vm12, %v953_v14, 0.0  ;;  %vm323_vm9 = vcmp.eq.s32.totalorder %v4826_v48, %v321_v32  ;;  %1163 = vmatpush.msrb.mxu2 %v1138_v8 }
 0x575   : > { %vm325_vm13 = vmor %vm319_vm11, %vm323_vm9  ;;  %vm324_vm9 = vcmp.eq.s32.totalorder %v4826_v48, %v322_v10 }
 0x576   : > { %v5064_v27 = vsel %vm325_vm13, 1.0, %v4731_v53 }
 0x57c   : > { %4212 = vmatmul.msk.f32.gmra.mxu0 %vm6074_vm4, %v956_v60 }
 0x584   : > { %4213 = vmatmul.msk.f32.gmra.mxu0 %vm6074_vm4, %v957_v11  ;;  %v1137_v11 = vld [vmem:[#allocation4 + $0xa8] sm:$0xff] }
 0x585   : > { %1164 = vmatpush.msrb.mxu2 %v1137_v11 }
 0x58c   : > { %4214 = vmatmul.msk.f32.gmra.mxu0 %vm6074_vm4, %v958_v15  ;;  %vm6077_vm4 = vcmp.eq.s32.totalorder %v4826_v48, %v4833_v51 }
 0x58d   : > { %vm314_vm8 = vmor %vm6077_vm4, %vm312_vm5 }
 0x58e   : > { %vm320_vm11 = vmor %vm314_vm8, %vm318_vm15 }
 0x58f   : > { %vm326_vm5 = vmor %vm320_vm11, %vm324_vm9 }
 0x590   : > { %v5072_v34 = vsel %vm326_vm5, 1.0, %v4731_v53 }
 0x5e9   : > { %v998_v28 = vpop.f32.mrf.mxu0 }
 0x5f1   : > { %v1001_v18 = vpop.f32.mrf.mxu0 }
 0x5f9   : > { %v1004_v7 = vpop.f32.mrf.mxu0 }
 0x601   : > { %v1007_v20 = vpop.f32.mrf.mxu0 }
 0x609   : > { %v1010_v25 = vpop.f32.mrf.mxu0 }
 0x60a   : > { %4215 = vmatpush.msk.msrb.mxu1 %vm6076_vm7, %v1010_v25  ;;  %vm1018_vm7 = vcmask 326656   ;;  %v1177_v25 = vld [vmem:[#allocation4 + $0xe8] sm:$0xff] }
 0x60c   : > { %4216 = vmatpush.msk.msrb.mxu1 %vm4943_vm6, %v1007_v20 }
 0x60e   : > { %4217 = vmatpush.msk.msrb.mxu1 %vm4934_vm3, %v1004_v7  ;;  %v1179_v7 = vld [vmem:[#allocation4 + $0xf8] sm:$0xff] }
 0x610   : > { %4218 = vmatpush.msk.msrb.mxu1 %vm4924_vm14, %v1001_v18  ;;  %v1180_v18 = vld [vmem:[#allocation4 + $0x100] sm:$0xff] }
 0x612   : > { %4219 = vmatpush.msk.msrb.mxu1 %vm6084_vm10, %v998_v28  ;;  %v1181_v28 = vld [vmem:[#allocation4 + $0x108] sm:$0xff] }
 0x613   : > { %4220 = vmatmul.msk.f32.vlgmr.msrb.gmra.mxu1 %vm1018_vm7, %v5064_v27  ;;  %1199 = vmatpush.msrb.mxu3 %v1181_v28 }
 0x614   : > { %1072 = vmatpush.msra.mxu1 %v1051_v29 }
 0x615   : > { %1200 = vmatpush.msrb.mxu3 %v1180_v18 }
 0x616   : > { %1073 = vmatpush.msra.mxu1 %v1050_v30 }
 0x617   : > { %1201 = vmatpush.msrb.mxu3 %v1179_v7 }
 0x618   : > { %1074 = vmatpush.msra.mxu1 %v1049_v33 }
 0x619   : > { %1202 = vmatpush.msrb.mxu3 %v1178_v21 }
 0x61a   : > { %1075 = vmatpush.msra.mxu1 %v1048_v35 }
 0x61b   : > { %4221 = vmatmul.msk.f32.gmra.mxu1 %vm1018_vm7, %v5072_v34  ;;  %1203 = vmatpush.msrb.mxu3 %v1177_v25 }
 0x690   : > { %v1042_v36 = vpop.f32.mrf.mxu1 }
 0x691   : > { %4222 = vmatmul.msk.f32.vlgmr.msra.gmra.mxu1 %vm6083_vm1, %v1042_v36 }
 0x698   : > { %v1045_v37 = vpop.f32.mrf.mxu1 }
 0x699   : > { %4223 = vmatmul.msk.f32.gmra.mxu1 %vm6083_vm1, %v1045_v37  ;;  %v4442_v37 = vld [vmem:[#allocation4 + $0x98] ss:$0 sm:$0xff] }
 0x70e   : > { %v1077_v40 = vpop.f32.mrf.mxu1 }
 0x70f   : > { %v1078_v41 = vadd.f32 %v4441_v38, %v1077_v40 }
 0x711   : > { %v5079_v42 = vadd.f32 %v1078_v41, %v4802_v56 }
 0x713   : > { %v1085_v44 = vsel %vm6083_vm1, %v5079_v42, 0.0 }
 0x714   : > { %1086 = vadd.xlane.f32.xlu1 %v1085_v44  ;;  %v4443_v44 = vld [vmem:[#allocation4 + $0xa0] ss:$0 sm:$0xff] }
 0x716   : > { %v1080_v45 = vpop.f32.mrf.mxu1 }
 0x717   : > { %v1081_v52 = vadd.f32 %v4441_v38, %v1080_v45 }
 0x719   : > { %v5084_v16 = vadd.f32 %v1081_v52, %v4806_v62 }
 0x71b   : > { %v1088_v39 = vsel %vm6080_vm2, %v5084_v16, 0.0 }
 0x71c   : > { %1089 = vadd.xlane.f32.xlu0 %v1088_v39 }
 0x787   : > { %v1087_v49 = vpop.xlane.xlu1 %1086 }
 0x788   : > { %v1091_v50 = vmul.f32 %v1087_v49, %v4794_v17 }
 0x78a   : > { %v1093_v57 = vsub.f32 %v5079_v42, %v1091_v50 }
 0x78c   : > { %v1095_v56 = vmul.f32 %v1093_v57, %v1093_v57 }
 0x78e   : > { %v1097_v60 = vsel %vm6083_vm1, %v1095_v56, 0.0 }
 0x78f   : > { %v1090_v2 = vpop.xlane.xlu0 %1089  ;;  %1098 = vadd.xlane.f32.xlu2 %v1097_v60 }
 0x790   : > { %v1092_v3 = vmul.f32 %v1090_v2, %v4794_v17 }
 0x792   : > { %v1094_v5 = vsub.f32 %v5084_v16, %v1092_v3 }
 0x794   : > { %v1096_v62 = vmul.f32 %v1094_v5, %v1094_v5 }
 0x796   : > { %v1100_v22 = vsel %vm6080_vm2, %v1096_v62, 0.0  ;;  %v1176_v62 = vld [vmem:[#allocation4 + $0xe0] sm:$0xff] }
 0x797   : > { %1101 = vadd.xlane.f32.xlu0 %v1100_v22  ;;  %1204 = vmatpush.msrb.mxu3 %v1176_v62  ;;  %v1174_v22 = vld [vmem:[#allocation4 + $0xd0] sm:$0xff] }
 0x802   : > { %v1099_v12 = vpop.xlane.xlu2 %1098 }
 0x803   : > { %v1103_v14 = vmul.f32 %v1099_v12, %v4794_v17 }
 0x805   : > { %v1105_v15 = vadd.f32 1e-12, %v1103_v14 }
 0x807   : > { %4515 = vrsqrt.f32 %v1105_v15  ;;  %vm1113_vm8 = vweird.f32 %v1105_v15 }
 0x80a   : > { %v1102_v46 = vpop.xlane.xlu0 %1101 }
 0x80b   : > { %v1104_v20 = vmul.f32 %v1102_v46, %v4794_v17 }
 0x80d   : > { %v4516_v32 = vpop.eup %4515  ;;  %v1106_v23 = vadd.f32 1e-12, %v1104_v20 }
 0x80e   : > { %v1108_v26 = vmul.f32 %v4516_v32, %v1105_v15  ;;  %vm1114_vm13 = vweird.f32 %v4516_v32  ;;  %v4445_v15 = vld [vmem:[#allocation4 + $0x110] ss:$0 sm:$0xff] }
 0x80f   : > { %4517 = vrsqrt.f32 %v1106_v23  ;;  %vm1115_vm15 = vmor %vm1113_vm8, %vm1114_vm13  ;;  %vm1123_vm9 = vweird.f32 %v1106_v23  ;;  %vm6079_vm13 = vcmask 523264  }
 0x810   : > { %v1109_v10 = vmul.f32 %v4516_v32, %v1108_v26 }
 0x812   : > { %v1110_v29 = vmul.f32 0.5, %v1109_v10 }
 0x814   : > { %v1111_v30 = vsub.f32 1.5, %v1110_v29 }
 0x815   : > { %v4518_v33 = vpop.eup %4517 }
 0x816   : > { %v1112_v35 = vmul.f32 %v4516_v32, %v1111_v30  ;;  %v1118_v36 = vmul.f32 %v4518_v33, %v1106_v23  ;;  %vm1124_vm11 = vweird.f32 %v4518_v33 }
 0x817   : > { %vm1125_vm5 = vmor %vm1123_vm9, %vm1124_vm11 }
 0x818   : > { %v1116_v38 = vsel %vm1115_vm15, %v4516_v32, %v1112_v35  ;;  %v1119_v40 = vmul.f32 %v4518_v33, %v1118_v36 }
 0x819   : > { %v1127_v41 = vmul.f32 %v1116_v38, %v1093_v57  ;;  %v1175_v57 = vld [vmem:[#allocation4 + $0xd8] sm:$0xff] }
 0x81a   : > { %v1120_v45 = vmul.f32 0.5, %v1119_v40  ;;  %1205 = vmatpush.msrb.mxu3 %v1175_v57  ;;  %v1270_v38 = vld [vmem:[#allocation4 + $0x138] sm:$0xff]  ;;  %v1269_v40 = vld [vmem:[#allocation4 + $0x130] sm:$0xff] }
 0x81b   : > { %v1131_v52 = vmul.f32 %v4442_v37, %v1127_v41  ;;  %v1268_v41 = vld [vmem:[#allocation4 + $0x128] sm:$0xff] }
 0x81c   : > { %v1121_v39 = vsub.f32 1.5, %v1120_v45  ;;  %1206 = vmatpush.msrb.mxu3 %v1174_v22 }
 0x81d   : > { %v1135_v49 = vadd.f32 %v4443_v44, %v1131_v52 }
 0x81e   : > { %v1122_v50 = vmul.f32 %v4518_v33, %v1121_v39 }
 0x81f   : > { %4224 = vmatmul.msk.f32.vlgmr.msrb.gmra.mxu2 %vm6083_vm1, %v1135_v49 }
 0x820   : > { %v1126_v56 = vsel %vm1125_vm5, %v4518_v33, %v1122_v50 }
 0x821   : > { %v1128_v60 = vmul.f32 %v1126_v56, %v1094_v5 }
 0x823   : > { %v1132_v2 = vmul.f32 %v4442_v37, %v1128_v60  ;;  %v1271_v37 = vld [vmem:[#allocation4 + $0x140] sm:$0xff] }
 0x824   : > { %1292 = vmatpush.msrb.mxu1 %v1271_v37 }
 0x825   : > { %v1136_v3 = vadd.f32 %v4443_v44, %v1132_v2 }
 0x826   : > { %1293 = vmatpush.msrb.mxu1 %v1270_v38 }
 0x827   : > { %4225 = vmatmul.msk.f32.gmra.mxu2 %vm6083_vm1, %v1136_v3 }
 0x828   : > { %1294 = vmatpush.msrb.mxu1 %v1269_v40 }
 0x82a   : > { %1295 = vmatpush.msrb.mxu1 %v1268_v41 }
 0x8a2   : > { %v1166_v6 = vpop.f32.mrf.mxu2 }
 0x8a3   : > { %v1167_v8 = vadd.f32 %v4444_v43, %v1166_v6  ;;  %v4446_v6 = vld [vmem:[#allocation4 + $0x118] ss:$0 sm:$0xff] }
 0x8a5   : > { %v1172_v11 = vmax.f32 %v1167_v8, 0.0 }
 0x8a7   : > { %4226 = vmatmul.msk.f32.vlgmr.msrb.gmra.mxu3 %vm6079_vm13, %v1172_v11 }
 0x8aa   : > { %v1169_v12 = vpop.f32.mrf.mxu2 }
 0x8ab   : > { %v1170_v14 = vadd.f32 %v4444_v43, %v1169_v12 }
 0x8ad   : > { %v1173_v5 = vmax.f32 %v1170_v14, 0.0  ;;  %v4447_v14 = vld [vmem:[#allocation4 + $0x120] ss:$0 sm:$0xff] }
 0x8af   : > { %4227 = vmatmul.msk.f32.gmra.mxu3 %vm6079_vm13, %v1173_v5 }
 0x92a   : > { %v1208_v28 = vpop.f32.mrf.mxu3 }
 0x92b   : > { %v1209_v18 = vadd.f32 %v4445_v15, %v1208_v28 }
 0x92d   : > { %v5101_v7 = vadd.f32 %v1209_v18, %v5079_v42 }
 0x92f   : > { %v1216_v46 = vsel %vm6083_vm1, %v5101_v7, 0.0 }
 0x930   : > { %1217 = vadd.xlane.f32.xlu0 %v1216_v46 }
 0x932   : > { %v1211_v20 = vpop.f32.mrf.mxu3 }
 0x933   : > { %v1212_v21 = vadd.f32 %v4445_v15, %v1211_v20 }
 0x935   : > { %v5106_v32 = vadd.f32 %v1212_v21, %v5084_v16 }
 0x937   : > { %v1219_v23 = vsel %vm6080_vm2, %v5106_v32, 0.0 }
 0x938   : > { %1220 = vadd.xlane.f32.xlu0 %v1219_v23 }
 0x9a3   : > { %v1218_v25 = vpop.xlane.xlu0 %1217 }
 0x9a4   : > { %v1222_v26 = vmul.f32 %v1218_v25, %v4794_v17 }
 0x9a6   : > { %v1224_v10 = vsub.f32 %v5101_v7, %v1222_v26  ;;  %v4448_v26 = vld [vmem:[#allocation4 + $0x148] ss:$0 sm:$0xff] }
 0x9a8   : > { %v1226_v42 = vmul.f32 %v1224_v10, %v1224_v10 }
 0x9aa   : > { %v1228_v29 = vsel %vm6083_vm1, %v1226_v42, 0.0 }
 0x9ab   : > { %1229 = vadd.xlane.f32.xlu0 %v1228_v29  ;;  %v1221_v30 = vpop.xlane.xlu0 %1220 }
 0x9ac   : > { %v1223_v33 = vmul.f32 %v1221_v30, %v4794_v17 }
 0x9ae   : > { %v1225_v35 = vsub.f32 %v5106_v32, %v1223_v33 }
 0x9b0   : > { %v1227_v16 = vmul.f32 %v1225_v35, %v1225_v35 }
 0x9b2   : > { %v1231_v36 = vsel %vm6080_vm2, %v1227_v16, 0.0 }
 0x9b3   : > { %1232 = vadd.xlane.f32.xlu1 %v1231_v36 }
 0xa1e   : > { %v1230_v44 = vpop.xlane.xlu0 %1229 }
 0xa1f   : > { %v1234_v45 = vmul.f32 %v1230_v44, %v4794_v17 }
 0xa21   : > { %v1236_v52 = vadd.f32 1e-12, %v1234_v45 }
 0xa23   : > { %4519 = vrsqrt.f32 %v1236_v52  ;;  %vm1244_vm15 = vweird.f32 %v1236_v52 }
 0xa26   : > { %v1233_v39 = vpop.xlane.xlu1 %1232 }
 0xa27   : > { %v1235_v49 = vmul.f32 %v1233_v39, %v4794_v17 }
 0xa29   : > { %v4520_v50 = vpop.eup %4519  ;;  %v1237_v56 = vadd.f32 1e-12, %v1235_v49 }
 0xa2a   : > { %v1239_v60 = vmul.f32 %v4520_v50, %v1236_v52  ;;  %vm1245_vm8 = vweird.f32 %v4520_v50 }
 0xa2b   : > { %4521 = vrsqrt.f32 %v1237_v56  ;;  %vm1246_vm11 = vmor %vm1244_vm15, %vm1245_vm8  ;;  %vm1254_vm5 = vweird.f32 %v1237_v56 }
 0xa2c   : > { %v1240_v2 = vmul.f32 %v4520_v50, %v1239_v60 }
 0xa2e   : > { %v1241_v3 = vmul.f32 0.5, %v1240_v2 }
 0xa30   : > { %v1242_v62 = vsub.f32 1.5, %v1241_v3 }
 0xa31   : > { %v4522_v57 = vpop.eup %4521 }
 0xa32   : > { %v1243_v22 = vmul.f32 %v4520_v50, %v1242_v62  ;;  %v1249_v43 = vmul.f32 %v4522_v57, %v1237_v56  ;;  %vm1255_vm9 = vweird.f32 %v4522_v57 }
 0xa33   : > { %vm1256_vm4 = vmor %vm1254_vm5, %vm1255_vm9  ;;  %vm6104_vm5 = vcmp.eq.s32.totalorder %v4914_v9, 3 }
 0xa34   : > { %v1247_v8 = vsel %vm1246_vm11, %v4520_v50, %v1243_v22  ;;  %v1250_v11 = vmul.f32 %v4522_v57, %v1249_v43 }
 0xa35   : > { %v1258_v12 = vmul.f32 %v1247_v8, %v1224_v10 }
 0xa36   : > { %v1251_v5 = vmul.f32 0.5, %v1250_v11 }
 0xa37   : > { %v1262_v15 = vmul.f32 %v4446_v6, %v1258_v12 }
 0xa38   : > { %v1252_v28 = vsub.f32 1.5, %v1251_v5 }
 0xa39   : > { %v1266_v18 = vadd.f32 %v4447_v14, %v1262_v15 }
 0xa3a   : > { %v1253_v46 = vmul.f32 %v4522_v57, %v1252_v28 }
 0xa3b   : > { %4228 = vmatmul.msk.f32.vlgmr.msrb.gmra.mxu1 %vm6083_vm1, %v1266_v18 }
 0xa3c   : > { %v1257_v20 = vsel %vm1256_vm4, %v4522_v57, %v1253_v46  ;;  %vm6099_vm4 = vcmask 80896  }
 0xa3d   : > { %v1259_v21 = vmul.f32 %v1257_v20, %v1225_v35  ;;  %vm6100_vm8 = vmmov %vm6099_vm4 }
 0xa3e   : > { %vm6101_vm15 = vmmov %vm6099_vm4 }
 0xa3f   : > { %v1263_v23 = vmul.f32 %v4446_v6, %v1259_v21  ;;  %vm6102_vm11 = vmmov %vm6099_vm4 }
 0xa40   : > { %vm6103_vm9 = vmmov %vm6099_vm4 }
 0xa41   : > { %v1267_v25 = vadd.f32 %v4447_v14, %v1263_v23 }
 0xa43   : > { %4229 = vmatmul.msk.f32.gmra.mxu1 %vm6083_vm1, %v1267_v25 }
 0xab8   : > { %v1297_v42 = vpop.f32.mrf.mxu1 }
 0xab9   : > { %v1298_v10 = vadd.f32 %v4448_v26, %v1297_v42 }
 0xabb   : > { %1344 = vrot.lane.b32.xlu2 %v1298_v10, %s4730_s10 }
 0xac0   : > { %v1300_v29 = vpop.f32.mrf.mxu1 }
 0xac1   : > { %v5121_v30 = vadd.f32 %v4448_v26, %v1300_v29 }
 0xac3   : > { %1346 = vrot.lane.b32.xlu0 %v5121_v30, %s4730_s10  ;;  %4230 = vmatpush.msk.msra.mxu0 %vm6078_vm0, %v5121_v30 }
 0xac5   : > { %1321 = vmatpush.msra.mxu0 %v1298_v10 }
 0xac6   : > { %4231 = vmatmul.msk.f32.vlgmr.msra.gmra.mxu0 %vm6099_vm4, %v4841_v54 }
 0xace   : > { %4232 = vmatmul.msk.f32.gmra.mxu0 %vm6100_vm8, %v4860_v58  ;;  %vm6105_vm8 = vmmov %vm6099_vm4 }
 0xad6   : > { %4233 = vmatmul.msk.f32.gmra.mxu0 %vm6101_vm15, %v4880_v61  ;;  %vm6106_vm15 = vmmov %vm6099_vm4 }
 0xade   : > { %4234 = vmatmul.msk.f32.gmra.mxu0 %vm6102_vm11, %v4896_v0  ;;  %vm6107_vm11 = vmmov %vm6099_vm4 }
 0xae6   : > { %4235 = vmatmul.msk.f32.gmra.mxu0 %vm6103_vm9, %v4902_v1  ;;  %vm6108_vm9 = vmmov %vm6099_vm4 }
 0xb15   : > { %v1345_v35 = vpop.permute.xlu2 %1344 }
 0xb35   : > { %v1347_v33 = vpop.permute.xlu0 %1346 }
 0xb36   : > { %4236 = vmatpush.xpose.msk.msra.mxu2 %vm6083_vm1, %v1347_v33 }
 0xb3a   : > { %4237 = vmatpush.xpose.msk.msra.mxu2 %vm6083_vm1, %v1345_v35 }
 0xb43   : > { %v1323_v16 = vpop.f32.mrf.mxu0 }
 0xb44   : > { %v1338_v36 = vsel %vm6084_vm10, %v1323_v16, 0.0 }
 0xb45   : > { %4238 = vmatmul.msk.f32.vlgmr.msra.gmra.mxu2 %vm6083_vm1, %v1338_v36 }
 0xb4b   : > { %v1326_v58 = vpop.f32.mrf.mxu0 }
 0xb4c   : > { %v1339_v61 = vsel %vm4924_vm14, %v1326_v58, 0.0 }
 0xb4d   : > { %4239 = vmatmul.msk.f32.gmra.mxu2 %vm6083_vm1, %v1339_v61 }
 0xb53   : > { %v1329_v0 = vpop.f32.mrf.mxu0 }
 0xb54   : > { %v1340_v1 = vsel %vm4934_vm3, %v1329_v0, 0.0 }
 0xb55   : > { %4240 = vmatmul.msk.f32.gmra.mxu2 %vm6083_vm1, %v1340_v1 }
 0xb5b   : > { %v1332_v37 = vpop.f32.mrf.mxu0 }
 0xb5c   : > { %v1341_v38 = vsel %vm4943_vm6, %v1332_v37, 0.0 }
 0xb5d   : > { %4241 = vmatmul.msk.f32.gmra.mxu2 %vm6083_vm1, %v1341_v38 }
 0xb63   : > { %v1335_v40 = vpop.f32.mrf.mxu0 }
 0xb64   : > { %v1342_v41 = vsel %vm6104_vm5, %v1335_v40, 0.0  ;;  %vm6109_vm5 = vmmov %vm6099_vm4 }
 0xb65   : > { %4242 = vmatmul.msk.f32.gmra.mxu2 %vm6083_vm1, %v1342_v41 }
 0xbc8   : > { %v1384_v44 = vpop.f32.mrf.mxu2 }
 0xbc9   : > { %v1399_v45 = vmul.f32 0.35355338, %v1384_v44 }
 0xbcb   : > { %v1404_v52 = vsel %vm4956_vm12, %v1399_v45, -3.4028235e+38 }
 0xbcc   : > { %v1409_v39 = vsel %vm6099_vm4, %v1404_v52, -inf }
 0xbcd   : > { %1410 = vmax.xlane.f32.xlu1 %v1409_v39 }
 0xbd0   : > { %v1387_v49 = vpop.f32.mrf.mxu2 }
 0xbd1   : > { %v1400_v50 = vmul.f32 0.35355338, %v1387_v49 }
 0xbd3   : > { %v1405_v56 = vsel %vm4956_vm12, %v1400_v50, -3.4028235e+38 }
 0xbd4   : > { %v1412_v60 = vsel %vm6105_vm8, %v1405_v56, -inf  ;;  %vm6110_vm8 = vmmov %vm6099_vm4 }
 0xbd5   : > { %1413 = vmax.xlane.f32.xlu1 %v1412_v60 }
 0xbd8   : > { %v1390_v2 = vpop.f32.mrf.mxu2 }
 0xbd9   : > { %v1401_v3 = vmul.f32 0.35355338, %v1390_v2 }
 0xbdb   : > { %v1406_v62 = vsel %vm4956_vm12, %v1401_v3, -3.4028235e+38 }
 0xbdc   : > { %v1415_v57 = vsel %vm6106_vm15, %v1406_v62, -inf  ;;  %vm6111_vm15 = vmmov %vm6099_vm4 }
 0xbdd   : > { %1416 = vmax.xlane.f32.xlu0 %v1415_v57 }
 0xbe0   : > { %v1393_v22 = vpop.f32.mrf.mxu2 }
 0xbe1   : > { %v1402_v43 = vmul.f32 0.35355338, %v1393_v22 }
 0xbe3   : > { %v1407_v6 = vsel %vm4956_vm12, %v1402_v43, -3.4028235e+38 }
 0xbe4   : > { %v1418_v8 = vsel %vm6107_vm11, %v1407_v6, -inf  ;;  %vm6112_vm11 = vmmov %vm6099_vm4 }
 0xbe5   : > { %1419 = vmax.xlane.f32.xlu1 %v1418_v8 }
 0xbe8   : > { %v1396_v11 = vpop.f32.mrf.mxu2 }
 0xbe9   : > { %v1403_v12 = vmul.f32 0.35355338, %v1396_v11 }
 0xbeb   : > { %v1408_v14 = vsel %vm4956_vm12, %v1403_v12, -3.4028235e+38 }
 0xbec   : > { %v1421_v5 = vsel %vm6108_vm9, %v1408_v14, -inf }
 0xbed   : > { %1422 = vmax.xlane.f32.xlu2 %v1421_v5 }
 0xbf1   : > { %1534 = vrot.lane.b32.xlu0 %v1298_v10, %s4733_s12 }
 0xc40   : > { %v1411_v15 = vpop.xlane.xlu1 %1410 }
 0xc41   : > { %v1424_v28 = vsub.f32 %v1404_v52, %v1411_v15 }
 0xc43   : > { %v1429_v18 = vmul.f32 1.442695, %v1424_v28 }
 0xc45   : > { %4523 = vpow2.f32 %v1429_v18 }
 0xc48   : > { %v1414_v46 = vpop.xlane.xlu1 %1413 }
 0xc49   : > { %v1425_v20 = vsub.f32 %v1405_v56, %v1414_v46 }
 0xc4b   : > { %v5170_v21 = vpop.eup %4523  ;;  %v1431_v23 = vmul.f32 1.442695, %v1425_v20 }
 0xc4c   : > { %v1439_v25 = vsel %vm6109_vm5, %v5170_v21, 0.0 }
 0xc4d   : > { %4525 = vpow2.f32 %v1431_v23  ;;  %1440 = vadd.xlane.f32.xlu1 %v1439_v25 }
 0xc50   : > { %v1417_v26 = vpop.xlane.xlu0 %1416 }
 0xc51   : > { %v1426_v42 = vsub.f32 %v1406_v62, %v1417_v26 }
 0xc53   : > { %v5174_v29 = vpop.eup %4525  ;;  %v1433_v33 = vmul.f32 1.442695, %v1426_v42 }
 0xc54   : > { %v1442_v10 = vsel %vm6099_vm4, %v5174_v29, 0.0 }
 0xc55   : > { %4527 = vpow2.f32 %v1433_v33  ;;  %1443 = vadd.xlane.f32.xlu1 %v1442_v10 }
 0xc58   : > { %v1420_v35 = vpop.xlane.xlu1 %1419 }
 0xc59   : > { %v1427_v16 = vsub.f32 %v1407_v6, %v1420_v35 }
 0xc5b   : > { %v5178_v36 = vpop.eup %4527  ;;  %v1435_v58 = vmul.f32 1.442695, %v1427_v16 }
 0xc5c   : > { %v1445_v61 = vsel %vm6110_vm8, %v5178_v36, 0.0 }
 0xc5d   : > { %4529 = vpow2.f32 %v1435_v58  ;;  %1446 = vadd.xlane.f32.xlu1 %v1445_v61  ;;  %v1835_v61 = vld [vmem:[%s5209_s15] sm:$0xff] }
 0xc60   : > { %v1423_v0 = vpop.xlane.xlu2 %1422 }
 0xc61   : > { %v1428_v1 = vsub.f32 %v1408_v14, %v1423_v0  ;;  %v1836_v0 = vld [vmem:[%s5209_s15 + $0x8] sm:$0x1] }
 0xc63   : > { %v5182_v37 = vpop.eup %4529  ;;  %v1437_v38 = vmul.f32 1.442695, %v1428_v1  ;;  %v1535_v35 = vpop.permute.xlu0 %1534 }
 0xc64   : > { %v1448_v40 = vsel %vm6111_vm15, %v5182_v37, 0.0 }
 0xc65   : > { %4531 = vpow2.f32 %v1437_v38  ;;  %1449 = vadd.xlane.f32.xlu2 %v1448_v40  ;;  %v1837_v40 = vsel %vm6083_vm1, %v1835_v61, 0.0 }
 0xc6b   : > { %v5186_v41 = vpop.eup %4531 }
 0xc6c   : > { %v1451_v44 = vsel %vm6112_vm11, %v5186_v41, 0.0 }
 0xc6d   : > { %1452 = vadd.xlane.f32.xlu2 %v1451_v44 }
 0xc76   : > { %1536 = vrot.lane.b32.xlu1 %v5121_v30, %s4733_s12 }
 0xca0   : > { %1838 = vadd.xlane.f32.xlu1 %v1837_v40 }
 0xcc0   : > { %v1441_v45 = vpop.xlane.xlu1 %1440 }
 0xcc1   : > { %4533 = vrcp.f32 %v1441_v45  ;;  %v1465_v43 = vand.u32 2147483648, %v1441_v45  ;;  %vm1459_vm5 = vweird.f32 %v1441_v45  ;;  %v1463_v6 = vand.u32 2147483647, %v1441_v45 }
 0xcc3   : > { %v1466_v14 = vor.u32 1.1754944e-38, %v1465_v43  ;;  %vm1464_vm8 = vcmp.eq.f32.partialorder %v1463_v6, 8.507059e+37 }
 0xcc7   : > { %v4534_v39 = vpop.eup %4533 }
 0xcc8   : > { %v1444_v52 = vpop.xlane.xlu1 %1443  ;;  %v1455_v49 = vmul.f32 %v4534_v39, %v1441_v45  ;;  %vm1460_vm9 = vweird.f32 %v4534_v39 }
 0xcc9   : > { %4535 = vrcp.f32 %v1444_v52  ;;  %vm1461_vm4 = vmor %vm1459_vm5, %vm1460_vm9  ;;  %v1479_v20 = vand.u32 2147483648, %v1444_v52  ;;  %vm1473_vm11 = vweird.f32 %v1444_v52  ;;  %v1477_v25 = vand.u32 2147483647, %v1444_v52 }
 0xcca   : > { %v1456_v50 = vsub.f32 1.0, %v1455_v49 }
 0xccb   : > { %vm1478_vm5 = vcmp.eq.f32.partialorder %v1477_v25, 8.507059e+37 }
 0xccc   : > { %v1457_v2 = vmul.f32 %v4534_v39, %v1456_v50 }
 0xcce   : > { %v1458_v57 = vadd.f32 %v4534_v39, %v1457_v2 }
 0xccf   : > { %v4536_v60 = vpop.eup %4535 }
 0xcd0   : > { %v5192_v56 = vpop.xlane.xlu1 %1446  ;;  %v1469_v3 = vmul.f32 %v4536_v60, %v1444_v52  ;;  %v1462_v12 = vsel %vm1461_vm4, %v4534_v39, %v1458_v57  ;;  %vm1474_vm15 = vweird.f32 %v4536_v60  ;;  %vm6113_vm4 = vcmask 80896  }
 0xcd1   : > { %4537 = vrcp.f32 %v5192_v56  ;;  %v1467_v5 = vsel %vm1464_vm8, %v1466_v14, %v1462_v12  ;;  %vm1475_vm9 = vmor %vm1473_vm11, %vm1474_vm15  ;;  %vm6082_vm15 = vcmask 253952   ;;  %v1493_v52 = vand.u32 2147483648, %v5192_v56 }
 0xcd2   : > { %v1470_v22 = vsub.f32 1.0, %v1469_v3  ;;  %v1524_v23 = vmul.f32 %v5170_v21, %v1467_v5  ;;  %v1480_v21 = vor.u32 1.1754944e-38, %v1479_v20  ;;  %v1841_v44 = vsel %vm6082_vm15, %v1836_v0, 0.0 }
 0xcd3   : > { %1842 = vadd.xlane.f32.xlu0 %v1841_v44  ;;  %vm1487_vm11 = vweird.f32 %v5192_v56  ;;  %v1491_v49 = vand.u32 2147483647, %v5192_v56  ;;  %v1494_v3 = vor.u32 1.1754944e-38, %v1493_v52 }
 0xcd4   : > { %v1471_v8 = vmul.f32 %v4536_v60, %v1470_v22  ;;  %v1529_v16 = vsel %vm4956_vm12, %v1524_v23, 0.0 }
 0xcd6   : > { %v1472_v18 = vadd.f32 %v4536_v60, %v1471_v8 }
 0xcd7   : > { %v4538_v30 = vpop.eup %4537 }
 0xcd8   : > { %v5195_v62 = vpop.xlane.xlu2 %1449  ;;  %v1483_v11 = vmul.f32 %v4538_v30, %v5192_v56  ;;  %v1476_v10 = vsel %vm1475_vm9, %v4536_v60, %v1472_v18  ;;  %vm1488_vm8 = vweird.f32 %v4538_v30 }
 0xcd9   : > { %4539 = vrcp.f32 %v5195_v62  ;;  %v1481_v58 = vsel %vm1478_vm5, %v1480_v21, %v1476_v10  ;;  %vm1489_vm9 = vmor %vm1487_vm11, %vm1488_vm8  ;;  %vm1492_vm5 = vcmp.eq.f32.partialorder %v1491_v49, 8.507059e+37  ;;  %vm1501_vm13 = vweird.f32 %v5195_v62 }
 0xcda   : > { %v1484_v15 = vsub.f32 1.0, %v1483_v11  ;;  %v1525_v39 = vmul.f32 %v5174_v29, %v1481_v58  ;;  %v1507_v29 = vand.u32 2147483648, %v5195_v62  ;;  %v1505_v8 = vand.u32 2147483647, %v5195_v62 }
 0xcdc   : > { %v1485_v42 = vmul.f32 %v4538_v30, %v1484_v15  ;;  %v1530_v57 = vsel %vm4956_vm12, %v1525_v39, 0.0  ;;  %v1508_v12 = vor.u32 1.1754944e-38, %v1507_v29  ;;  %vm1506_vm11 = vcmp.eq.f32.partialorder %v1505_v8, 8.507059e+37  ;;  %v1616_v39 = vld [vmem:[#allocation4 + $0x150] sm:$0xff] }
 0xcde   : > { %v1486_v38 = vadd.f32 %v4538_v30, %v1485_v42 }
 0xcdf   : > { %v4540_v46 = vpop.eup %4539 }
 0xce0   : > { %v5199_v28 = vpop.xlane.xlu2 %1452  ;;  %v1497_v33 = vmul.f32 %v4540_v46, %v5195_v62  ;;  %v1490_v2 = vsel %vm1489_vm9, %v4538_v30, %v1486_v38  ;;  %vm6114_vm9 = vmmov %vm6113_vm4 }
 0xce1   : > { %4541 = vrcp.f32 %v5199_v28  ;;  %v1495_v22 = vsel %vm1492_vm5, %v1494_v3, %v1490_v2  ;;  %v1521_v18 = vand.u32 2147483648, %v5199_v28  ;;  %v1519_v62 = vand.u32 2147483647, %v5199_v28  ;;  %v1892_v2 = vld [vmem:[#allocation4 + $0x228] sm:$0xff]  ;;  %v1891_v3 = vld [vmem:[#allocation4 + $0x220] sm:$0xff] }
 0xce2   : > { %v1498_v1 = vsub.f32 1.0, %v1497_v33  ;;  %v1526_v56 = vmul.f32 %v5178_v36, %v1495_v22  ;;  %v1890_v22 = vld [vmem:[#allocation4 + $0x218] sm:$0xff] }
 0xce3   : > { %v1522_v20 = vor.u32 1.1754944e-38, %v1521_v18 }
 0xce4   : > { %v1499_v50 = vmul.f32 %v4540_v46, %v1498_v1  ;;  %v1531_v14 = vsel %vm4956_vm12, %v1526_v56, 0.0 }
 0xce6   : > { %v1500_v6 = vadd.f32 %v4540_v46, %v1499_v50 }
 0xce7   : > { %v4542_v45 = vpop.eup %4541 }
 0xce8   : > { %v1537_v26 = vpop.permute.xlu1 %1536  ;;  %v1511_v60 = vmul.f32 %v4542_v45, %v5199_v28  ;;  %vm1516_vm5 = vweird.f32 %v4542_v45 }
 0xce9   : > { %4243 = vmatpush.msk.msra.mxu3 %vm6078_vm0, %v1537_v26  ;;  %vm1502_vm0 = vweird.f32 %v4540_v46 }
 0xcea   : > { %v1512_v43 = vsub.f32 1.0, %v1511_v60  ;;  %vm1503_vm8 = vmor %vm1501_vm13, %vm1502_vm0  ;;  %vm1520_vm13 = vcmp.eq.f32.partialorder %v1519_v62, 8.507059e+37  ;;  %v4449_v62 = vld [vmem:[#allocation4 + $0x208] ss:$0 sm:$0xff] }
 0xceb   : > { %1571 = vmatpush.msra.mxu3 %v1535_v35  ;;  %v1504_v11 = vsel %vm1503_vm8, %v4540_v46, %v1500_v6  ;;  %vm6115_vm8 = vmmov %vm6114_vm9 }
 0xcec   : > { %4244 = vmatmul.msk.f32.vlgmr.msra.gmra.mxu3 %vm6113_vm4, %v1529_v16  ;;  %v1513_v30 = vmul.f32 %v4542_v45, %v1512_v43  ;;  %v1509_v5 = vsel %vm1506_vm11, %v1508_v12, %v1504_v11  ;;  %vm6116_vm11 = vmmov %vm6115_vm8 }
 0xced   : > { %v1527_v36 = vmul.f32 %v5182_v37, %v1509_v5 }
 0xcee   : > { %v1514_v15 = vadd.f32 %v4542_v45, %v1513_v30 }
 0xcef   : > { %v1532_v23 = vsel %vm4956_vm12, %v1527_v36, 0.0 }
 0xcf4   : > { %4245 = vmatmul.msk.f32.gmra.mxu3 %vm6113_vm4, %v1530_v57  ;;  %vm1515_vm4 = vweird.f32 %v5199_v28 }
 0xcf5   : > { %vm1517_vm0 = vmor %vm1515_vm4, %vm1516_vm5 }
 0xcf6   : > { %v1518_v46 = vsel %vm1517_vm0, %v4542_v45, %v1514_v15 }
 0xcf7   : > { %v1523_v25 = vsel %vm1520_vm13, %v1522_v20, %v1518_v46  ;;  %vm1941_vm13 = vcmask 1040384  }
 0xcf8   : > { %v1528_v26 = vmul.f32 %v5186_v41, %v1523_v25  ;;  %v4450_v25 = vld [vmem:[#allocation4 + $0x210] ss:$0 sm:$0xff] }
 0xcfa   : > { %v1533_v42 = vsel %vm4956_vm12, %v1528_v26, 0.0 }
 0xcfc   : > { %4246 = vmatmul.msk.f32.gmra.mxu3 %vm6114_vm9, %v1531_v14  ;;  %vm6117_vm9 = vcmp.eq.s32.totalorder %v4914_v9, 3 }
 0xcfd   : > { %vm6118_vm5 = vmmov %vm6117_vm9 }
 0xd04   : > { %4247 = vmatmul.msk.f32.gmra.mxu3 %vm6115_vm8, %v1532_v23  ;;  %vm1925_vm8 = vcmask 72704  }
 0xd0c   : > { %4248 = vmatmul.msk.f32.gmra.mxu3 %vm6116_vm11, %v1533_v42 }
 0xd13   : > { %v1839_v37 = vpop.xlane.xlu1 %1838 }
 0xd14   : > { %v1844_v28 = vmul.f32 %v1839_v37, %v4794_v17 }
 0xd16   : > { %v5246_v33 = vsub.f32 %v1835_v61, %v1844_v28 }
 0xd18   : > { %v1848_v10 = vmul.f32 %v5246_v33, %v5246_v33 }
 0xd1a   : > { %v1850_v16 = vsel %vm6083_vm1, %v1848_v10, 0.0 }
 0xd1b   : > { %1851 = vadd.xlane.f32.xlu2 %v1850_v16 }
 0xd46   : > { %v1843_v35 = vpop.xlane.xlu0 %1842 }
 0xd47   : > { %v1845_v21 = vmul.f32 %v1843_v35, %v4794_v17  ;;  %v4451_v35 = vld [vmem:[#allocation4 + $0x170] ss:$0 sm:$0xff] }
 0xd49   : > { %v5252_v41 = vsub.f32 %v1836_v0, %v1845_v21  ;;  %v1617_v0 = vld [vmem:[#allocation4 + $0x158] sm:$0xff] }
 0xd4b   : > { %v1849_v58 = vmul.f32 %v5252_v41, %v5252_v41 }
 0xd4d   : > { %v1853_v38 = vsel %vm6082_vm15, %v1849_v58, 0.0 }
 0xd4e   : > { %1854 = vadd.xlane.f32.xlu2 %v1853_v38 }
 0xd6f   : > { %v1573_v1 = vpop.f32.mrf.mxu3 }
 0xd77   : > { %v1576_v61 = vpop.f32.mrf.mxu3 }
 0xd7f   : > { %v1579_v40 = vpop.f32.mrf.mxu3 }
 0xd87   : > { %v1582_v44 = vpop.f32.mrf.mxu3 }
 0xd8e   : > { %v1852_v13 = vpop.xlane.xlu2 %1851 }
 0xd8f   : > { %v1585_v45 = vpop.f32.mrf.mxu3  ;;  %v1856_v52 = vmul.f32 %v1852_v13, %v4794_v17  ;;  %v1705_v13 = vld [vmem:[#allocation4 + $0x188] sm:$0xff] }
 0xd90   : > { %4249 = vmatpush.msk.msra.mxu1 %vm6117_vm9, %v1585_v45  ;;  %4401 = vmatpush.msk.msrb.mxu3 %vm6118_vm5, %v1585_v45  ;;  %vm6119_vm9 = vcmp.eq.s32.totalorder %v4833_v51, %v4826_v48 }
 0xd91   : > { %v1858_v49 = vadd.f32 1e-12, %v1856_v52 }
 0xd92   : > { %4250 = vmatpush.msk.msra.mxu1 %vm4943_vm6, %v1582_v44  ;;  %4402 = vmatpush.msk.msrb.mxu3 %vm4943_vm6, %v1582_v44  ;;  %v4452_v44 = vld [vmem:[#allocation4 + $0x238] ss:$0 sm:$0xff] }
 0xd93   : > { %4543 = vrsqrt.f32 %v1858_v49 }
 0xd94   : > { %4251 = vmatpush.msk.msra.mxu1 %vm4934_vm3, %v1579_v40  ;;  %4403 = vmatpush.msk.msrb.mxu3 %vm4934_vm3, %v1579_v40 }
 0xd96   : > { %4252 = vmatpush.msk.msra.mxu1 %vm4924_vm14, %v1576_v61  ;;  %4404 = vmatpush.msk.msrb.mxu3 %vm4924_vm14, %v1576_v61  ;;  %vm1866_vm14 = vweird.f32 %v1858_v49 }
 0xd98   : > { %4253 = vmatpush.msk.msra.mxu1 %vm6084_vm10, %v1573_v1  ;;  %4405 = vmatpush.msk.msrb.mxu3 %vm6084_vm10, %v1573_v1 }
 0xd99   : > { %4254 = vmatmul.msk.f32.vlgmr.msra.gmra.mxu1 %vm1018_vm7, %v5064_v27  ;;  %4255 = vmatmul.msk.f32.vlgmr.msrb.gmra.mxu3 %vm1018_vm7, %v5072_v34  ;;  %v1893_v27 = vld [vmem:[#allocation4 + $0x230] sm:$0xff]  ;;  %v4544_v57 = vpop.eup %4543 }
 0xd9a   : > { %1640 = vmatpush.msrb.mxu1 %v1619_v19  ;;  %v1861_v43 = vmul.f32 %v4544_v57, %v1858_v49  ;;  %vm1867_vm3 = vweird.f32 %v4544_v57 }
 0xd9b   : > { %vm1868_vm6 = vmor %vm1866_vm14, %vm1867_vm3  ;;  %vm6120_vm3 = vcmp.eq.s32.totalorder %v4850_v55, %v4826_v48 }
 0xd9c   : > { %1641 = vmatpush.msrb.mxu1 %v1618_v24  ;;  %v1862_v6 = vmul.f32 %v4544_v57, %v1861_v43  ;;  %v1707_v24 = vld [vmem:[#allocation4 + $0x198] sm:$0xff]  ;;  %v416_v43 = vadd.s32 27, %v4826_v48 }
 0xd9e   : > { %1642 = vmatpush.msrb.mxu1 %v1617_v0  ;;  %v1863_v56 = vmul.f32 0.5, %v1862_v6  ;;  %v1706_v0 = vld [vmem:[#allocation4 + $0x190] sm:$0xff] }
 0xda0   : > { %1643 = vmatpush.msrb.mxu1 %v1616_v39  ;;  %v1864_v30 = vsub.f32 1.5, %v1863_v56  ;;  %v394_v39 = vadd.s32 9, %v4826_v48 }
 0xda2   : > { %1914 = vmatpush.msra.mxu1 %v1893_v27  ;;  %v1865_v12 = vmul.f32 %v4544_v57, %v1864_v30  ;;  %vm396_vm11 = vcmp.eq.s32.totalorder %v4833_v51, %v394_v39  ;;  %vm397_vm14 = vcmp.eq.s32.totalorder %v4850_v55, %v394_v39 }
 0xda3   : > { %vm401_vm5 = vmor %vm6119_vm9, %vm396_vm11  ;;  %vm6121_vm11 = vcmp.eq.s32.totalorder %v4863_v59, %v4826_v48 }
 0xda4   : > { %1915 = vmatpush.msra.mxu1 %v1892_v2  ;;  %v1869_v15 = vsel %vm1868_vm6, %v4544_v57, %v1865_v12  ;;  %v5324_v2 = vsel %vm401_vm5, 1.0, %v4731_v53  ;;  %vm402_vm6 = vmor %vm6120_vm3, %vm397_vm14  ;;  %vm420_vm3 = vcmp.eq.s32.totalorder %v4863_v59, %v416_v43 }
 0xda5   : > { %v1880_v46 = vmul.f32 %v1869_v15, %v5246_v33 }
 0xda6   : > { %1916 = vmatpush.msra.mxu1 %v1891_v3 }
 0xda7   : > { %v1884_v23 = vmul.f32 %v4449_v62, %v1880_v46 }
 0xda8   : > { %1917 = vmatpush.msra.mxu1 %v1890_v22 }
 0xda9   : > { %v1888_v42 = vadd.f32 %v4450_v25, %v1884_v23 }
 0xdc1   : > { %v1855_v50 = vpop.xlane.xlu2 %1854 }
 0xdc2   : > { %v1857_v60 = vmul.f32 %v1855_v50, %v4794_v17 }
 0xdc4   : > { %v1859_v34 = vadd.f32 1e-12, %v1857_v60  ;;  %v405_v60 = vadd.s32 18, %v4826_v48 }
 0xdc6   : > { %4545 = vrsqrt.f32 %v1859_v34  ;;  %vm1876_vm7 = vweird.f32 %v1859_v34  ;;  %vm409_vm5 = vcmp.eq.s32.totalorder %v4863_v59, %v405_v60 }
 0xdcc   : > { %v4546_v29 = vpop.eup %4545 }
 0xdcd   : > { %v1871_v8 = vmul.f32 %v4546_v29, %v1859_v34  ;;  %vm1877_vm4 = vweird.f32 %v4546_v29 }
 0xdce   : > { %vm1878_vm0 = vmor %vm1876_vm7, %vm1877_vm4  ;;  %vm408_vm7 = vcmp.eq.s32.totalorder %v4850_v55, %v405_v60  ;;  %vm398_vm4 = vcmp.eq.s32.totalorder %v4863_v59, %v394_v39 }
 0xdcf   : > { %v1872_v11 = vmul.f32 %v4546_v29, %v1871_v8  ;;  %vm403_vm9 = vmor %vm6121_vm11, %vm398_vm4  ;;  %vm6122_vm4 = vcmp.eq.s32.totalorder %v4883_v63, %v4826_v48  ;;  %vm410_vm11 = vcmp.eq.s32.totalorder %v4883_v63, %v405_v60  ;;  %v1748_v60 = vld [vmem:[#allocation4 + $0x1e0] sm:$0xff] }
 0xdd0   : > { %vm414_vm14 = vmor %vm403_vm9, %vm409_vm5  ;;  %vm421_vm5 = vcmp.eq.s32.totalorder %v4883_v63, %v416_v43 }
 0xdd1   : > { %v1873_v14 = vmul.f32 0.5, %v1872_v11 }
 0xdd3   : > { %v1874_v18 = vsub.f32 1.5, %v1873_v14 }
 0xdd5   : > { %v1875_v20 = vmul.f32 %v4546_v29, %v1874_v18 }
 0xdd7   : > { %v1879_v26 = vsel %vm1878_vm0, %v4546_v29, %v1875_v20  ;;  %vm413_vm0 = vmor %vm402_vm6, %vm408_vm7  ;;  %vm399_vm6 = vcmp.eq.s32.totalorder %v4883_v63, %v394_v39 }
 0xdd8   : > { %v1881_v37 = vmul.f32 %v1879_v26, %v5252_v41  ;;  %v5346_v29 = vsel %vm413_vm0, 1.0, %v4731_v53  ;;  %vm425_vm7 = vmor %vm414_vm14, %vm420_vm3 }
 0xdd9   : > { %vm404_vm0 = vmor %vm6122_vm4, %vm399_vm6  ;;  %v5359_v30 = vsel %vm425_vm7, 1.0, %v4731_v53 }
 0xdda   : > { %v1885_v28 = vmul.f32 %v4449_v62, %v1881_v37  ;;  %vm415_vm9 = vmor %vm404_vm0, %vm410_vm11  ;;  %vm446_vm0 = vcmp.ge.s32.totalorder %v4833_v51, 9  ;;  %vm457_vm11 = vcmp.ge.s32.totalorder %v4850_v55, 18 }
 0xddc   : > { %v1889_v10 = vadd.f32 %v4450_v25, %v1885_v28 }
 0xe16   : > { %v1610_v5 = vpop.f32.mrf.mxu1 }
 0xe17   : > { %4256 = vmatmul.msk.f32.vlgmr.msrb.gmra.mxu1 %vm6083_vm1, %v1610_v5 }
 0xe1c   : > { %v1613_v36 = vpop.f32.mrf.mxu3 }
 0xe1f   : > { %4257 = vmatmul.msk.f32.gmra.mxu1 %vm6083_vm1, %v1613_v36 }
 0xe27   : > { %4262 = vmatmul.msk.f32.vlgmr.msra.gmra.mxu1 %vm6083_vm1, %v1888_v42 }
 0xe2f   : > { %4263 = vmatmul.msk.f32.gmra.mxu1 %vm6083_vm1, %v1889_v10  ;;  %v4453_v10 = vld [vmem:[#allocation4 + $0x178] ss:$0 sm:$0xff] }
 0xe94   : > { %v1645_v21 = vpop.f32.mrf.mxu1 }
 0xe95   : > { %v1646_v16 = vadd.f32 %v4451_v35, %v1645_v21 }
 0xe97   : > { %v5290_v33 = vadd.f32 %v1646_v16, %v5101_v7 }
 0xe99   : > { %v1653_v58 = vsel %vm6083_vm1, %v5290_v33, 0.0 }
 0xe9a   : > { %1654 = vadd.xlane.f32.xlu2 %v1653_v58  ;;  %v4454_v58 = vld [vmem:[#allocation4 + $0x180] ss:$0 sm:$0xff] }
 0xe9c   : > { %v1648_v1 = vpop.f32.mrf.mxu1 }
 0xe9d   : > { %v1649_v38 = vadd.f32 %v4451_v35, %v1648_v1 }
 0xe9f   : > { %v5295_v41 = vadd.f32 %v1649_v38, %v5106_v32  ;;  %v1708_v32 = vld [vmem:[#allocation4 + $0x1a0] sm:$0xff] }
 0xea0   : > { %1729 = vmatpush.msrb.mxu0 %v1708_v32 }
 0xea1   : > { %v1656_v61 = vsel %vm6080_vm2, %v5295_v41, 0.0 }
 0xea2   : > { %1657 = vadd.xlane.f32.xlu2 %v1656_v61  ;;  %1730 = vmatpush.msrb.mxu0 %v1707_v24 }
 0xea4   : > { %v1919_v40 = vpop.f32.mrf.mxu1  ;;  %1731 = vmatpush.msrb.mxu0 %v1706_v0 }
 0xea5   : > { %v5301_v7 = vadd.f32 %v4452_v44, %v1919_v40 }
 0xea6   : > { %1732 = vmatpush.msrb.mxu0 %v1705_v13 }
 0xeac   : > { %v1922_v45 = vpop.f32.mrf.mxu1 }
 0xead   : > { %v5299_v19 = vadd.f32 %v4452_v44, %v1922_v45 }
 0xeaf   : > { %1985 = vrot.lane.b32.xlu0 %v5299_v19, %s4730_s10  ;;  %4264 = vmatpush.msk.msra.mxu3 %vm1941_vm13, %v5299_v19 }
 0xeb1   : > { %1960 = vmatpush.msra.mxu3 %v5301_v7 }
 0xeb2   : > { %4265 = vmatmul.msk.f32.vlgmr.msra.gmra.mxu3 %vm1925_vm8, %v4841_v54 }
 0xeba   : > { %4266 = vmatmul.msk.f32.gmra.mxu3 %vm1925_vm8, %v5324_v2 }
 0xec2   : > { %4267 = vmatmul.msk.f32.gmra.mxu3 %vm1925_vm8, %v5346_v29 }
 0xeca   : > { %4268 = vmatmul.msk.f32.gmra.mxu3 %vm1925_vm8, %v5359_v30 }
 0xf0d   : > { %v1655_v52 = vpop.xlane.xlu2 %1654 }
 0xf0e   : > { %v1659_v49 = vmul.f32 %v1655_v52, %v4794_v17 }
 0xf10   : > { %v5314_v50 = vsub.f32 %v5290_v33, %v1659_v49  ;;  %v451_v49 = vsel %vm446_vm0, 1, %v4732_v4 }
 0xf12   : > { %v1663_v27 = vmul.f32 %v5314_v50, %v5314_v50 }
 0xf14   : > { %v1665_v34 = vsel %vm6083_vm1, %v1663_v27, 0.0 }
 0xf15   : > { %1666 = vadd.xlane.f32.xlu2 %v1665_v34  ;;  %v1658_v3 = vpop.xlane.xlu2 %1657  ;;  %v1747_v34 = vld [vmem:[#allocation4 + $0x1d8] sm:$0xff] }
 0xf16   : > { %v1660_v57 = vmul.f32 %v1658_v3, %v4794_v17  ;;  %v462_v3 = vsel %vm457_vm11, 1, %v4732_v4 }
 0xf17   : > { %v467_v43 = vadd.s32 1, %v462_v3 }
 0xf18   : > { %v5336_v22 = vsub.f32 %v5295_v41, %v1660_v57  ;;  %v1746_v57 = vld [vmem:[#allocation4 + $0x1d0] sm:$0xff] }
 0xf1a   : > { %v1664_v6 = vmul.f32 %v5336_v22, %v5336_v22 }
 0xf1c   : > { %v1668_v56 = vsel %vm6080_vm2, %v1664_v6, 0.0  ;;  %vm426_vm2 = vmor %vm415_vm9, %vm421_vm5  ;;  %vm5385_vm9 = vcmp.eq.s32.totalorder %v451_v49, %v4914_v9  ;;  %vm473_vm5 = vcmp.ge.s32.totalorder %v4863_v59, 27 }
 0xf1d   : > { %1669 = vadd.xlane.f32.xlu1 %v1668_v56  ;;  %v5365_v11 = vsel %vm426_vm2, 1.0, %v4731_v53  ;;  %v1745_v56 = vld [vmem:[#allocation4 + $0x1c8] sm:$0xff] }
 0xf1e   : > { %4269 = vmatmul.msk.f32.gmra.mxu3 %vm1925_vm8, %v5365_v11 }
 0xf21   : > { %v1986_v8 = vpop.permute.xlu0 %1985 }
 0xf22   : > { %4270 = vmatpush.xpose.msk.msra.mxu0 %vm6083_vm1, %v1986_v8  ;;  %v3776_v8 = vld [vmem:[#allocation4 + $0x430] sm:$0xff] }
 0xf2d   : > { %1983 = vrot.lane.b32.xlu2 %v5301_v7, %s4730_s10 }
 0xf35   : > { %v1962_v24 = vpop.f32.mrf.mxu3 }
 0xf36   : > { %v1977_v39 = vsel %vm6084_vm10, %v1962_v24, 0.0 }
 0xf3d   : > { %v1965_v52 = vpop.f32.mrf.mxu3 }
 0xf45   : > { %v1968_v6 = vpop.f32.mrf.mxu3 }
 0xf88   : > { %v1667_v12 = vpop.xlane.xlu2 %1666 }
 0xf89   : > { %v1671_v14 = vmul.f32 %v1667_v12, %v4794_v17  ;;  %v478_v12 = vsel %vm473_vm5, 1, %v4732_v4 }
 0xf8b   : > { %v1673_v5 = vadd.f32 1e-12, %v1671_v14 }
 0xf8d   : > { %4547 = vrsqrt.f32 %v1673_v5  ;;  %vm1681_vm14 = vweird.f32 %v1673_v5 }
 0xf90   : > { %v1670_v15 = vpop.xlane.xlu1 %1669  ;;  %v1984_v18 = vpop.permute.xlu2 %1983 }
 0xf91   : > { %v1672_v36 = vmul.f32 %v1670_v15, %v4794_v17  ;;  %4271 = vmatpush.xpose.msk.msra.mxu0 %vm6083_vm1, %v1984_v18  ;;  %v1971_v15 = vpop.f32.mrf.mxu3 }
 0xf93   : > { %v4548_v62 = vpop.eup %4547  ;;  %v1674_v46 = vadd.f32 1e-12, %v1672_v36 }
 0xf94   : > { %v1676_v20 = vmul.f32 %v4548_v62, %v1673_v5  ;;  %vm1682_vm2 = vweird.f32 %v4548_v62  ;;  %v483_v5 = vadd.s32 2, %v478_v12 }
 0xf95   : > { %4549 = vrsqrt.f32 %v1674_v46  ;;  %vm1683_vm3 = vmor %vm1681_vm14, %vm1682_vm2  ;;  %vm1691_vm7 = vweird.f32 %v1674_v46  ;;  %vm5395_vm2 = vcmp.eq.s32.totalorder %v467_v43, %v4914_v9 }
 0xf96   : > { %v1677_v23 = vmul.f32 %v4548_v62, %v1676_v20  ;;  %v1979_v14 = vsel %vm5395_vm2, %v1968_v6, 0.0  ;;  %vm5404_vm14 = vcmp.eq.s32.totalorder %v483_v5, %v4914_v9  ;;  %v1743_v20 = vld [vmem:[#allocation4 + $0x1b8] sm:$0xff] }
 0xf97   : > { %v1980_v36 = vsel %vm5404_vm14, %v1971_v15, 0.0 }
 0xf98   : > { %v1678_v25 = vmul.f32 0.5, %v1677_v23  ;;  %v1742_v23 = vld [vmem:[#allocation4 + $0x1b0] sm:$0xff] }
 0xf9a   : > { %v1679_v26 = vsub.f32 1.5, %v1678_v25  ;;  %v4455_v25 = vld [vmem:[#allocation4 + $0x1a8] ss:$0 sm:$0xff] }
 0xf9b   : > { %v4550_v42 = vpop.eup %4549 }
 0xf9c   : > { %v1680_v37 = vmul.f32 %v4548_v62, %v1679_v26  ;;  %v1686_v28 = vmul.f32 %v4550_v42, %v1674_v46  ;;  %vm1692_vm6 = vweird.f32 %v4550_v42  ;;  %v1744_v46 = vld [vmem:[#allocation4 + $0x1c0] sm:$0xff] }
 0xf9d   : > { %vm1693_vm4 = vmor %vm1691_vm7, %vm1692_vm6  ;;  %vm6130_vm6 = vcmask 523264  }
 0xf9e   : > { %v1684_v35 = vsel %vm1683_vm3, %v4548_v62, %v1680_v37  ;;  %v1687_v21 = vmul.f32 %v4550_v42, %v1686_v28  ;;  %vm6129_vm3 = vcmp.eq.s32.totalorder %v4914_v9, 3  ;;  %vm6131_vm7 = vmmov %vm6130_vm6 }
 0xf9f   : > { %v1695_v16 = vmul.f32 %v1684_v35, %v5314_v50  ;;  %v1749_v50 = vld [vmem:[#allocation4 + $0x1e8] sm:$0xff] }
 0xfa0   : > { %v1688_v1 = vmul.f32 0.5, %v1687_v21  ;;  %1766 = vmatpush.msrb.mxu2 %v1749_v50 }
 0xfa1   : > { %v1699_v38 = vmul.f32 %v4453_v10, %v1695_v16  ;;  %v1974_v62 = vpop.f32.mrf.mxu3  ;;  %v491_v16 = vmul.u32 9, %v451_v49 }
 0xfa2   : > { %v1689_v61 = vsub.f32 1.5, %v1688_v1  ;;  %1767 = vmatpush.msrb.mxu2 %v1748_v60  ;;  %v1981_v4 = vsel %vm6129_vm3, %v1974_v62, 0.0 }
 0xfa3   : > { %v1703_v40 = vadd.f32 %v4454_v58, %v1699_v38 }
 0xfa4   : > { %v1690_v44 = vmul.f32 %v4550_v42, %v1689_v61  ;;  %1768 = vmatpush.msrb.mxu2 %v1747_v34  ;;  %v5423_v61 = vsub.s32 %v4833_v51, %v491_v16 }
 0xfa5   : > { %4258 = vmatmul.msk.f32.vlgmr.msrb.gmra.mxu0 %vm6083_vm1, %v1703_v40 }
 0xfa6   : > { %v1694_v45 = vsel %vm1693_vm4, %v4550_v42, %v1690_v44  ;;  %1769 = vmatpush.msrb.mxu2 %v1746_v57  ;;  %vm6089_vm4 = vcmp.le.s32.totalorder %v4826_v48, %v4824_v47  ;;  %vm6088_vm0 = vcmp.le.s32.totalorder %v4826_v48, %v5423_v61  ;;  %v492_v44 = vmul.u32 9, %v467_v43 }
 0xfa7   : > { %v1696_v32 = vmul.f32 %v1694_v45, %v5336_v22  ;;  %v1978_v22 = vsel %vm5385_vm9, %v1965_v52, 0.0  ;;  %v493_v52 = vmul.u32 9, %v483_v5 }
 0xfa8   : > { %1770 = vmatpush.msrb.mxu2 %v1745_v56 }
 0xfa9   : > { %v1700_v0 = vmul.f32 %v4453_v10, %v1696_v32  ;;  %v5441_v60 = vsub.s32 %v4863_v59, %v493_v52 }
 0xfaa   : > { %1771 = vmatpush.msrb.mxu2 %v1744_v46 }
 0xfab   : > { %v1704_v13 = vadd.f32 %v4454_v58, %v1700_v0  ;;  %v5432_v0 = vsub.s32 %v4850_v55, %v492_v44  ;;  %vm6086_vm5 = vcmp.le.s32.totalorder %v4826_v48, %v5441_v60 }
 0xfac   : > { %1772 = vmatpush.msrb.mxu2 %v1743_v20 }
 0xfad   : > { %4259 = vmatmul.msk.f32.gmra.mxu0 %vm6083_vm1, %v1704_v13  ;;  %vm6087_vm11 = vcmp.le.s32.totalorder %v4826_v48, %v5432_v0 }
 0xfae   : > { %1773 = vmatpush.msrb.mxu2 %v1742_v23 }
 0xfb5   : > { %4272 = vmatmul.msk.f32.vlgmr.msra.gmra.mxu0 %vm6083_vm1, %v1977_v39 }
 0xfbd   : > { %4273 = vmatmul.msk.f32.gmra.mxu0 %vm6083_vm1, %v1978_v22  ;;  %v5450_v22 = vadd.s32 4294967269, %v4883_v63 }
 0xfbf   : > { %vm6085_vm3 = vcmp.le.s32.totalorder %v4826_v48, %v5450_v22 }
 0xfc5   : > { %4274 = vmatmul.msk.f32.gmra.mxu0 %vm6083_vm1, %v1979_v14 }
 0xfcd   : > { %4275 = vmatmul.msk.f32.gmra.mxu0 %vm6083_vm1, %v1980_v36 }
 0xfd5   : > { %4276 = vmatmul.msk.f32.gmra.mxu0 %vm6083_vm1, %v1981_v4 }
0x1022   : > { %v1734_v26 = vpop.f32.mrf.mxu0 }
0x1023   : > { %v1735_v42 = vadd.f32 %v4455_v25, %v1734_v26 }
0x1025   : > { %v1740_v37 = vmax.f32 %v1735_v42, 0.0 }
0x1027   : > { %4260 = vmatmul.msk.f32.vlgmr.msrb.gmra.mxu2 %vm6130_vm6, %v1740_v37  ;;  %vm6081_vm6 = vcmask 68608  }
0x102a   : > { %v1737_v28 = vpop.f32.mrf.mxu0 }
0x102b   : > { %v1738_v10 = vadd.f32 %v4455_v25, %v1737_v28 }
0x102d   : > { %v1741_v35 = vmax.f32 %v1738_v10, 0.0 }
0x102f   : > { %4261 = vmatmul.msk.f32.gmra.mxu2 %vm6131_vm7, %v1741_v35 }
0x1032   : > { %v2023_v21 = vpop.f32.mrf.mxu0 }
0x1033   : > { %v2038_v58 = vmul.f32 0.35355338, %v2023_v21 }
0x1035   : > { %v2043_v1 = vsel %vm6089_vm4, %v2038_v58, -3.4028235e+38 }
0x1036   : > { %v2048_v38 = vsel %vm1925_vm8, %v2043_v1, -inf }
0x1037   : > { %2049 = vmax.xlane.f32.xlu1 %v2048_v38 }
0x103a   : > { %v2026_v40 = vpop.f32.mrf.mxu0 }
0x103b   : > { %v2039_v45 = vmul.f32 0.35355338, %v2026_v40 }
0x103d   : > { %v2044_v32 = vsel %vm6088_vm0, %v2039_v45, -3.4028235e+38 }
0x103e   : > { %v2051_v24 = vsel %vm1925_vm8, %v2044_v32, -inf }
0x103f   : > { %2052 = vmax.xlane.f32.xlu1 %v2051_v24 }
0x1042   : > { %v2029_v13 = vpop.f32.mrf.mxu0 }
0x1043   : > { %v2040_v39 = vmul.f32 0.35355338, %v2029_v13 }
0x1045   : > { %v2045_v49 = vsel %vm6087_vm11, %v2040_v39, -3.4028235e+38 }
0x1046   : > { %v2054_v50 = vsel %vm1925_vm8, %v2045_v49, -inf }
0x1047   : > { %2055 = vmax.xlane.f32.xlu0 %v2054_v50 }
0x104a   : > { %v2032_v34 = vpop.f32.mrf.mxu0 }
0x104b   : > { %v2041_v55 = vmul.f32 0.35355338, %v2032_v34 }
0x104d   : > { %v2046_v3 = vsel %vm6086_vm5, %v2041_v55, -3.4028235e+38 }
0x104e   : > { %v2057_v57 = vsel %vm1925_vm8, %v2046_v3, -inf }
0x104f   : > { %2058 = vmax.xlane.f32.xlu1 %v2057_v57 }
0x1052   : > { %v2035_v43 = vpop.f32.mrf.mxu0 }
0x1053   : > { %v2042_v59 = vmul.f32 0.35355338, %v2035_v43 }
0x1055   : > { %v2047_v6 = vsel %vm6085_vm3, %v2042_v59, -3.4028235e+38 }
0x1056   : > { %v2061_v56 = vsel %vm6081_vm6, %v2047_v6, -inf }
0x1057   : > { %2062 = vmax.xlane.f32.xlu2 %v2061_v56 }
0x105b   : > { %2174 = vrot.lane.b32.xlu0 %v5301_v7, %s4733_s12 }
0x10aa   : > { %v2050_v12 = vpop.xlane.xlu1 %2049 }
0x10ab   : > { %v2064_v63 = vsub.f32 %v2043_v1, %v2050_v12 }
0x10ad   : > { %v2069_v14 = vmul.f32 1.442695, %v2064_v63 }
0x10af   : > { %4551 = vpow2.f32 %v2069_v14 }
0x10b2   : > { %v2053_v5 = vpop.xlane.xlu1 %2052 }
0x10b3   : > { %v2065_v15 = vsub.f32 %v2044_v32, %v2053_v5 }
0x10b5   : > { %v5460_v36 = vpop.eup %4551  ;;  %v2071_v62 = vmul.f32 1.442695, %v2065_v15 }
0x10b6   : > { %v2079_v4 = vsel %vm1925_vm8, %v5460_v36, 0.0 }
0x10b7   : > { %4553 = vpow2.f32 %v2071_v62  ;;  %2080 = vadd.xlane.f32.xlu1 %v2079_v4 }
0x10ba   : > { %v2056_v46 = vpop.xlane.xlu0 %2055 }
0x10bb   : > { %v2066_v20 = vsub.f32 %v2045_v49, %v2056_v46 }
0x10bd   : > { %v5464_v23 = vpop.eup %4553  ;;  %v2073_v25 = vmul.f32 1.442695, %v2066_v20 }
0x10be   : > { %v2082_v7 = vsel %vm1925_vm8, %v5464_v23, 0.0 }
0x10bf   : > { %4555 = vpow2.f32 %v2073_v25  ;;  %2083 = vadd.xlane.f32.xlu1 %v2082_v7 }
0x10c2   : > { %v2059_v26 = vpop.xlane.xlu1 %2058 }
0x10c3   : > { %v2067_v42 = vsub.f32 %v2046_v3, %v2059_v26 }
0x10c5   : > { %v5468_v37 = vpop.eup %4555  ;;  %v2075_v28 = vmul.f32 1.442695, %v2067_v42 }
0x10c6   : > { %v2085_v10 = vsel %vm1925_vm8, %v5468_v37, 0.0 }
0x10c7   : > { %4557 = vpow2.f32 %v2075_v28  ;;  %2086 = vadd.xlane.f32.xlu1 %v2085_v10 }
0x10ca   : > { %v2063_v35 = vpop.xlane.xlu2 %2062 }
0x10cb   : > { %v2068_v21 = vsub.f32 %v2047_v6, %v2063_v35 }
0x10cd   : > { %v5472_v16 = vpop.eup %4557  ;;  %v2077_v58 = vmul.f32 1.442695, %v2068_v21  ;;  %v2175_v28 = vpop.permute.xlu0 %2174 }
0x10ce   : > { %v2088_v1 = vsel %vm1925_vm8, %v5472_v16, 0.0 }
0x10cf   : > { %4559 = vpow2.f32 %v2077_v58  ;;  %2089 = vadd.xlane.f32.xlu2 %v2088_v1 }
0x10d5   : > { %v5476_v38 = vpop.eup %4559 }
0x10d6   : > { %v2091_v40 = vsel %vm6081_vm6, %v5476_v38, 0.0 }
0x10d7   : > { %2092 = vadd.xlane.f32.xlu2 %v2091_v40 }
0x10e0   : > { %2176 = vrot.lane.b32.xlu1 %v5299_v19, %s4733_s12 }
0x112a   : > { %v2081_v44 = vpop.xlane.xlu1 %2080 }
0x112b   : > { %4561 = vrcp.f32 %v2081_v44  ;;  %v2105_v43 = vand.u32 2147483648, %v2081_v44  ;;  %vm2099_vm6 = vweird.f32 %v2081_v44  ;;  %v2103_v19 = vand.u32 2147483647, %v2081_v44 }
0x112d   : > { %v2106_v12 = vor.u32 1.1754944e-38, %v2105_v43  ;;  %vm2104_vm1 = vcmp.eq.f32.partialorder %v2103_v19, 8.507059e+37 }
0x1131   : > { %v4562_v32 = vpop.eup %4561 }
0x1132   : > { %v2084_v45 = vpop.xlane.xlu1 %2083  ;;  %v2095_v24 = vmul.f32 %v4562_v32, %v2081_v44  ;;  %vm2100_vm7 = vweird.f32 %v4562_v32 }
0x1133   : > { %4563 = vrcp.f32 %v2084_v45  ;;  %vm2101_vm15 = vmor %vm2099_vm6, %vm2100_vm7  ;;  %v2119_v4 = vand.u32 2147483648, %v2084_v45  ;;  %vm2113_vm3 = vweird.f32 %v2084_v45  ;;  %v2117_v20 = vand.u32 2147483647, %v2084_v45 }
0x1134   : > { %v2096_v13 = vsub.f32 1.0, %v2095_v24 }
0x1135   : > { %v2120_v10 = vor.u32 1.1754944e-38, %v2119_v4 }
0x1136   : > { %v2097_v49 = vmul.f32 %v4562_v32, %v2096_v13 }
0x1138   : > { %v2098_v55 = vadd.f32 %v4562_v32, %v2097_v49 }
0x1139   : > { %v4564_v39 = vpop.eup %4563 }
0x113a   : > { %v2087_v52 = vpop.xlane.xlu1 %2086  ;;  %v2109_v50 = vmul.f32 %v4564_v39, %v2084_v45  ;;  %v2102_v56 = vsel %vm2101_vm15, %v4562_v32, %v2098_v55  ;;  %vm2114_vm10 = vweird.f32 %v4564_v39 }
0x113b   : > { %4565 = vrcp.f32 %v2087_v52  ;;  %v2107_v63 = vsel %vm2104_vm1, %v2106_v12, %v2102_v56  ;;  %vm2115_vm6 = vmor %vm2113_vm3, %vm2114_vm10  ;;  %vm2118_vm1 = vcmp.eq.f32.partialorder %v2117_v20, 8.507059e+37  ;;  %v2133_v40 = vand.u32 2147483648, %v2087_v52 }
0x113c   : > { %v2110_v3 = vsub.f32 1.0, %v2109_v50  ;;  %v2164_v46 = vmul.f32 %v5460_v36, %v2107_v63  ;;  %vm2127_vm15 = vweird.f32 %v2087_v52  ;;  %v2131_v45 = vand.u32 2147483647, %v2087_v52 }
0x113e   : > { %v2111_v59 = vmul.f32 %v4564_v39, %v2110_v3  ;;  %v2169_v35 = vsel %vm6089_vm4, %v2164_v46, 0.0  ;;  %vm2132_vm7 = vcmp.eq.f32.partialorder %v2131_v45, 8.507059e+37  ;;  %v2268_v45 = vld [vmem:[#allocation4 + $0x248] sm:$0xff] }
0x1140   : > { %v2112_v15 = vadd.f32 %v4564_v39, %v2111_v59 }
0x1141   : > { %v4566_v57 = vpop.eup %4565 }
0x1142   : > { %v5482_v34 = vpop.xlane.xlu2 %2089  ;;  %v2123_v6 = vmul.f32 %v4566_v57, %v2087_v52  ;;  %v2116_v42 = vsel %vm2115_vm6, %v4564_v39, %v2112_v15  ;;  %vm2128_vm10 = vweird.f32 %v4566_v57  ;;  %v2134_v39 = vor.u32 1.1754944e-38, %v2133_v40 }
0x1143   : > { %4567 = vrcp.f32 %v5482_v34  ;;  %v2121_v36 = vsel %vm2118_vm1, %v2120_v10, %v2116_v42  ;;  %vm2129_vm3 = vmor %vm2127_vm15, %vm2128_vm10  ;;  %vm2141_vm1 = vweird.f32 %v5482_v34  ;;  %v427_v42 = vadd.s32 9, %v4824_v47 }
0x1144   : > { %v2124_v14 = vsub.f32 1.0, %v2123_v6  ;;  %v2165_v44 = vmul.f32 %v5464_v23, %v2121_v36  ;;  %v2147_v23 = vand.u32 2147483648, %v5482_v34  ;;  %v433_v10 = vadd.s32 18, %v4824_v47 }
0x1145   : > { %v428_v36 = vadd.s32 9, %v4833_v51 }
0x1146   : > { %v2125_v7 = vmul.f32 %v4566_v57, %v2124_v14  ;;  %v2170_v49 = vsel %vm6088_vm0, %v2165_v44, 0.0  ;;  %v2148_v59 = vor.u32 1.1754944e-38, %v2147_v23  ;;  %v2270_v44 = vld [vmem:[#allocation4 + $0x258] sm:$0xff] }
0x1148   : > { %v2126_v58 = vadd.f32 %v4566_v57, %v2125_v7 }
0x1149   : > { %v4568_v62 = vpop.eup %4567 }
0x114a   : > { %v5485_v5 = vpop.xlane.xlu2 %2092  ;;  %v2137_v26 = vmul.f32 %v4568_v62, %v5482_v34  ;;  %v2130_v13 = vsel %vm2129_vm3, %v4566_v57, %v2126_v58  ;;  %vm2142_vm6 = vweird.f32 %v4568_v62  ;;  %v2145_v57 = vand.u32 2147483647, %v5482_v34 }
0x114b   : > { %4569 = vrcp.f32 %v5485_v5  ;;  %v2135_v50 = vsel %vm2132_vm7, %v2134_v39, %v2130_v13  ;;  %vm2143_vm10 = vmor %vm2141_vm1, %vm2142_vm6  ;;  %v2161_v63 = vand.u32 2147483648, %v5485_v5  ;;  %vm2155_vm7 = vweird.f32 %v5485_v5 }
0x114c   : > { %v2138_v21 = vsub.f32 1.0, %v2137_v26  ;;  %v2166_v52 = vmul.f32 %v5468_v37, %v2135_v50  ;;  %vm2146_vm15 = vcmp.eq.f32.partialorder %v2145_v57, 8.507059e+37  ;;  %v2159_v34 = vand.u32 2147483647, %v5485_v5 }
0x114d   : > { %v2162_v15 = vor.u32 1.1754944e-38, %v2161_v63  ;;  %v434_v58 = vadd.s32 18, %v4833_v51 }
0x114e   : > { %v2139_v32 = vmul.f32 %v4568_v62, %v2138_v21  ;;  %v2171_v6 = vsel %vm6087_vm11, %v2166_v52, 0.0  ;;  %vm2160_vm1 = vcmp.eq.f32.partialorder %v2159_v34, 8.507059e+37 }
0x1150   : > { %v2140_v3 = vadd.f32 %v4568_v62, %v2139_v32 }
0x1151   : > { %v4570_v1 = vpop.eup %4569 }
0x1152   : > { %v2177_v25 = vpop.permute.xlu1 %2176  ;;  %v2151_v24 = vmul.f32 %v4570_v1, %v5485_v5  ;;  %v2144_v19 = vsel %vm2143_vm10, %v4568_v62, %v2140_v3  ;;  %vm2156_vm3 = vweird.f32 %v4570_v1  ;;  %vm6132_vm10 = vcmp.le.s32.totalorder %v4826_v48, %v5450_v22  ;;  %v4667_v3 = vld [vmem:[%s5209_s15] sm:$0xff] }
0x1153   : > { %4277 = vmatpush.msk.msra.mxu2 %vm1941_vm13, %v2177_v25  ;;  %v2149_v56 = vsel %vm2146_vm15, %v2148_v59, %v2144_v19  ;;  %vm2157_vm6 = vmor %vm2155_vm7, %vm2156_vm3  ;;  %vm429_vm15 = vcmp.eq.s32.totalorder %v4826_v48, %v427_v42  ;;  %vm6133_vm3 = vcmp.eq.s32.totalorder %v4826_v48, %v4824_v47 }
0x1154   : > { %v2152_v55 = vsub.f32 1.0, %v2151_v24  ;;  %v2167_v37 = vmul.f32 %v5472_v16, %v2149_v56  ;;  %v5522_v16 = vpop.f32.mrf.mxu2  ;;  %vm431_vm7 = vmor %vm6133_vm3, %vm429_vm15  ;;  %vm430_vm15 = vcmp.eq.s32.totalorder %v4826_v48, %v428_v36  ;;  %v2267_v24 = vld [vmem:[#allocation4 + $0x240] sm:$0xff] }
0x1155   : > { %2211 = vmatpush.msra.mxu2 %v2175_v28 }
0x1156   : > { %4278 = vmatmul.msk.f32.vlgmr.msra.gmra.mxu2 %vm1925_vm8, %v2169_v35  ;;  %v2153_v43 = vmul.f32 %v4570_v1, %v2152_v55  ;;  %v2172_v62 = vsel %vm6086_vm5, %v2167_v37, 0.0 }
0x1158   : > { %v2154_v12 = vadd.f32 %v4570_v1, %v2153_v43  ;;  %v4668_v43 = vld [vmem:[%s5209_s15 + $0x8] sm:$0x1] }
0x115a   : > { %v2158_v14 = vsel %vm2157_vm6, %v4570_v1, %v2154_v12  ;;  %vm2240_vm6 = vcmask 1043456   ;;  %v440_v1 = vadd.s32 27, %v4833_v51 }
0x115b   : > { %v2163_v4 = vsel %vm2160_vm1, %v2162_v15, %v2158_v14  ;;  %vm435_vm1 = vcmp.eq.s32.totalorder %v4826_v48, %v433_v10  ;;  %v4456_v15 = vld [vmem:[#allocation4 + $0x1f0] ss:$0 sm:$0xff] }
0x115c   : > { %v2168_v46 = vmul.f32 %v5476_v38, %v2163_v4  ;;  %v5524_v5 = vpop.f32.mrf.mxu2  ;;  %v439_v38 = vadd.s32 27, %v4824_v47  ;;  %vm437_vm5 = vmor %vm431_vm7, %vm435_vm1  ;;  %vm436_vm7 = vcmp.eq.s32.totalorder %v4826_v48, %v434_v58  ;;  %vm2233_vm1 = vcmask 293888   ;;  %v2359_v10 = vld [vmem:[#allocation4 + $0x290] sm:$0xff] }
0x115d   : > { %vm442_vm4 = vcmp.eq.s32.totalorder %v4826_v48, %v440_v1  ;;  %2380 = vmatpush.msrb.mxu3 %v2359_v10 }
0x115e   : > { %4279 = vmatmul.msk.f32.gmra.mxu2 %vm1925_vm8, %v2170_v49  ;;  %v2173_v20 = vsel %vm6132_vm10, %v2168_v46, 0.0  ;;  %vm6134_vm10 = vcmp.eq.s32.totalorder %v4914_v9, 3  ;;  %vm441_vm11 = vcmp.eq.s32.totalorder %v4826_v48, %v439_v38  ;;  %v4457_v49 = vld [vmem:[#allocation4 + $0x260] ss:$0 sm:$0xff]  ;;  %v1776_v46 = vadd.f32 %v4456_v15, %v5522_v16  ;;  %v2358_v38 = vld [vmem:[#allocation4 + $0x288] sm:$0xff] }
0x115f   : > { %vm443_vm3 = vmor %vm437_vm5, %vm441_vm11  ;;  %vm6136_vm11 = vcmp.eq.s32.totalorder %v4914_v9, 0  ;;  %2381 = vmatpush.msrb.mxu3 %v2358_v38  ;;  %v2357_v16 = vld [vmem:[#allocation4 + $0x280] sm:$0xff]  ;;  %v2394_v38 = vld [vmem:[#allocation4 + $0x2b8] sm:$0xff] }
0x1160   : > { %v5553_v40 = vsel %vm443_vm3, 1.0, %v4731_v53 }
0x1161   : > { %2382 = vmatpush.msrb.mxu3 %v2357_v16  ;;  %v2392_v16 = vld [vmem:[#allocation4 + $0x2a8] sm:$0xff] }
0x1166   : > { %4280 = vmatmul.msk.f32.gmra.mxu2 %vm1925_vm8, %v2171_v6 }
0x116e   : > { %4281 = vmatmul.msk.f32.gmra.mxu2 %vm1925_vm8, %v2172_v62 }
0x1176   : > { %4282 = vmatmul.msk.f32.gmra.mxu2 %vm1925_vm8, %v2173_v20 }
0x11d9   : > { %v2213_v25 = vpop.f32.mrf.mxu2 }
0x11e1   : > { %v2216_v7 = vpop.f32.mrf.mxu2 }
0x11e9   : > { %v2219_v26 = vpop.f32.mrf.mxu2 }
0x11f1   : > { %v2222_v28 = vpop.f32.mrf.mxu2 }
0x11f9   : > { %v2225_v35 = vpop.f32.mrf.mxu2 }
0x11fa   : > { %v2232_v21 = vsel %vm6134_vm10, %v2225_v35, 0.0  ;;  %vm6135_vm10 = vcmp.eq.s32.totalorder %v4826_v48, %v4833_v51  ;;  %v2269_v51 = vld [vmem:[#allocation4 + $0x250] sm:$0xff]  ;;  %v2356_v35 = vld [vmem:[#allocation4 + $0x278] sm:$0xff] }
0x11fb   : > { %4283 = vmatpush.msk.msrb.mxu1 %vm2240_vm6, %v2232_v21  ;;  %vm432_vm0 = vmor %vm6135_vm10, %vm430_vm15  ;;  %vm6140_vm10 = vcmask 253952   ;;  %2383 = vmatpush.msrb.mxu3 %v2356_v35  ;;  %v2391_v35 = vld [vmem:[#allocation4 + $0x2a0] sm:$0xff] }
0x11fc   : > { %vm438_vm5 = vmor %vm432_vm0, %vm436_vm7  ;;  %vm6137_vm0 = vcmask 261120  }
0x11fd   : > { %4284 = vmatpush.msk.msrb.mxu1 %vm5404_vm14, %v2222_v28  ;;  %vm444_vm15 = vmor %vm438_vm5, %vm442_vm4 }
0x11fe   : > { %v5561_v32 = vsel %vm444_vm15, 1.0, %v4731_v53  ;;  %vm6138_vm3 = vmmov %vm6137_vm0  ;;  %vm6144_vm15 = vcmask 254976  }
0x11ff   : > { %4285 = vmatpush.msk.msrb.mxu1 %vm5395_vm2, %v2219_v26  ;;  %vm6139_vm4 = vmmov %vm6137_vm0 }
0x1200   : > { %vm6141_vm7 = vmmov %vm6137_vm0 }
0x1201   : > { %4286 = vmatpush.msk.msrb.mxu1 %vm5385_vm9, %v2216_v7  ;;  %v1779_v7 = vadd.f32 %v4456_v15, %v5524_v5  ;;  %vm6143_vm5 = vmmov %vm6137_vm0 }
0x1203   : > { %4287 = vmatpush.msk.msrb.mxu1 %vm6136_vm11, %v2213_v25  ;;  %vm6142_vm11 = vmmov %vm6140_vm10  ;;  %v1781_v25 = vadd.f32 %v1776_v46, %v5290_v33  ;;  %v1782_v42 = vadd.f32 %v1779_v7, %v5295_v41 }
0x1204   : > { %4288 = vmatmul.msk.f32.vlgmr.msrb.gmra.mxu1 %vm2233_vm1, %v5553_v40 }
0x1205   : > { %2291 = vmatpush.msra.mxu1 %v2270_v44  ;;  %v1783_v26 = vsel %vm6143_vm5, %v1781_v25, 0.0  ;;  %v1786_v28 = vsel %vm6144_vm15, %v1782_v42, 0.0 }
0x1207   : > { %2292 = vmatpush.msra.mxu1 %v2269_v51 }
0x1209   : > { %2293 = vmatpush.msra.mxu1 %v2268_v45 }
0x120b   : > { %2294 = vmatpush.msra.mxu1 %v2267_v24 }
0x120c   : > { %4289 = vmatmul.msk.f32.gmra.mxu1 %vm2233_vm1, %v5561_v32 }
0x120d   : > { %2415 = vmatpush.msrb.mxu1 %v2394_v38 }
0x1281   : > { %v2261_v13 = vpop.f32.mrf.mxu1 }
0x1282   : > { %4290 = vmatmul.msk.f32.vlgmr.msra.gmra.mxu1 %vm6137_vm0, %v2261_v13 }
0x1289   : > { %v2264_v39 = vpop.f32.mrf.mxu1 }
0x128a   : > { %4291 = vmatmul.msk.f32.gmra.mxu1 %vm6138_vm3, %v2264_v39 }
0x12ff   : > { %v2296_v50 = vpop.f32.mrf.mxu1 }
0x1300   : > { %v2297_v55 = vadd.f32 %v4457_v49, %v2296_v50 }
0x1302   : > { %v5568_v23 = vadd.f32 %v4667_v3, %v2297_v55 }
0x1304   : > { %v2304_v53 = vsel %vm6139_vm4, %v5568_v23, 0.0 }
0x1305   : > { %2305 = vadd.xlane.f32.xlu1 %v2304_v53  ;;  %v4458_v53 = vld [vmem:[#allocation4 + $0x268] ss:$0 sm:$0xff] }
0x1307   : > { %v2299_v52 = vpop.f32.mrf.mxu1 }
0x1308   : > { %v2300_v57 = vadd.f32 %v4457_v49, %v2299_v52 }
0x130a   : > { %v5573_v19 = vadd.f32 %v4668_v43, %v2300_v57 }
0x130c   : > { %v2307_v59 = vsel %vm6140_vm10, %v5573_v19, 0.0  ;;  %vm6145_vm10 = vmmov %vm6143_vm5 }
0x130d   : > { %2308 = vadd.xlane.f32.xlu0 %v2307_v59  ;;  %vm6146_vm15 = vmmov %vm6145_vm10 }
0x1378   : > { %v2306_v6 = vpop.xlane.xlu1 %2305 }
0x1379   : > { %v2310_v56 = vmul.f32 %v2306_v6, %v4794_v17 }
0x137b   : > { %v2312_v12 = vsub.f32 %v5568_v23, %v2310_v56  ;;  %v4459_v56 = vld [vmem:[#allocation4 + $0x270] ss:$0 sm:$0xff] }
0x137d   : > { %v2314_v63 = vmul.f32 %v2312_v12, %v2312_v12 }
0x137f   : > { %v2316_v37 = vsel %vm6141_vm7, %v2314_v63, 0.0 }
0x1380   : > { %v2309_v34 = vpop.xlane.xlu0 %2308  ;;  %2317 = vadd.xlane.f32.xlu2 %v2316_v37 }
0x1381   : > { %v2311_v14 = vmul.f32 %v2309_v34, %v4794_v17 }
0x1383   : > { %v5582_v62 = vsub.f32 %v5573_v19, %v2311_v14 }
0x1385   : > { %v2315_v4 = vmul.f32 %v5582_v62, %v5582_v62 }
0x1387   : > { %v2319_v20 = vsel %vm6142_vm11, %v2315_v4, 0.0 }
0x1388   : > { %2320 = vadd.xlane.f32.xlu2 %v2319_v20 }
0x1390   : > { %1784 = vadd.xlane.f32.xlu2 %v1783_v26 }
0x1398   : > { %1787 = vadd.xlane.f32.xlu2 %v1786_v28 }
0x13f3   : > { %v2318_v36 = vpop.xlane.xlu2 %2317 }
0x13f4   : > { %v2322_v33 = vmul.f32 %v2318_v36, %v4794_v17 }
0x13f6   : > { %v2324_v5 = vadd.f32 1e-12, %v2322_v33 }
0x13f8   : > { %4571 = vrsqrt.f32 %v2324_v5  ;;  %vm2332_vm3 = vweird.f32 %v2324_v5 }
0x13fb   : > { %v2321_v21 = vpop.xlane.xlu2 %2320 }
0x13fc   : > { %v2323_v58 = vmul.f32 %v2321_v21, %v4794_v17 }
0x13fe   : > { %v4572_v41 = vpop.eup %4571  ;;  %v2325_v1 = vadd.f32 1e-12, %v2323_v58 }
0x13ff   : > { %v2327_v44 = vmul.f32 %v4572_v41, %v2324_v5  ;;  %vm2333_vm0 = vweird.f32 %v4572_v41 }
0x1400   : > { %4573 = vrsqrt.f32 %v2325_v1  ;;  %vm2334_vm4 = vmor %vm2332_vm3, %vm2333_vm0  ;;  %vm2342_vm11 = vweird.f32 %v2325_v1  ;;  %vm6147_vm0 = vcmask 254976  }
0x1401   : > { %v2328_v51 = vmul.f32 %v4572_v41, %v2327_v44  ;;  %vm6148_vm3 = vmmov %vm6145_vm10 }
0x1403   : > { %v2329_v45 = vmul.f32 0.5, %v2328_v51  ;;  %v1785_v24 = vpop.xlane.xlu2 %1784 }
0x1404   : > { %v1789_v13 = vmul.f32 %v1785_v24, %v4794_v17 }
0x1405   : > { %v2330_v39 = vsub.f32 1.5, %v2329_v45 }
0x1406   : > { %v4574_v49 = vpop.eup %4573  ;;  %v5596_v50 = vsub.f32 %v1781_v25, %v1789_v13 }
0x1407   : > { %v2331_v55 = vmul.f32 %v4572_v41, %v2330_v39  ;;  %v2337_v3 = vmul.f32 %v4574_v49, %v2325_v1  ;;  %vm2343_vm7 = vweird.f32 %v4574_v49 }
0x1408   : > { %v1793_v52 = vmul.f32 %v5596_v50, %v5596_v50  ;;  %vm2344_vm5 = vmor %vm2342_vm11, %vm2343_vm7 }
0x1409   : > { %v2335_v57 = vsel %vm2334_vm4, %v4572_v41, %v2331_v55  ;;  %v2338_v43 = vmul.f32 %v4574_v49, %v2337_v3 }
0x140a   : > { %v2346_v59 = vmul.f32 %v2335_v57, %v2312_v12  ;;  %v1795_v6 = vsel %vm6145_vm10, %v1793_v52, 0.0  ;;  %v4462_v57 = vld [vmem:[#allocation4 + $0x200] ss:$0 sm:$0xff] }
0x140b   : > { %v2339_v63 = vmul.f32 0.5, %v2338_v43  ;;  %1796 = vadd.xlane.f32.xlu2 %v1795_v6  ;;  %v1788_v37 = vpop.xlane.xlu2 %1787 }
0x140c   : > { %v2350_v34 = vmul.f32 %v4458_v53, %v2346_v59  ;;  %v1790_v14 = vmul.f32 %v1788_v37, %v4794_v17  ;;  %v4461_v37 = vld [vmem:[#allocation4 + $0x298] ss:$0 sm:$0xff] }
0x140d   : > { %v2340_v15 = vsub.f32 1.5, %v2339_v63 }
0x140e   : > { %v1792_v4 = vsub.f32 %v1782_v42, %v1790_v14  ;;  %v2354_v46 = vadd.f32 %v4459_v56, %v2350_v34  ;;  %v2393_v42 = vld [vmem:[#allocation4 + $0x2b0] sm:$0xff] }
0x140f   : > { %v2341_v20 = vmul.f32 %v4574_v49, %v2340_v15  ;;  %2416 = vmatpush.msrb.mxu1 %v2393_v42 }
0x1410   : > { %4292 = vmatmul.msk.f32.vlgmr.msrb.gmra.mxu3 %vm6146_vm15, %v2354_v46  ;;  %v1794_v25 = vmul.f32 %v1792_v4, %v1792_v4 }
0x1411   : > { %v2345_v12 = vsel %vm2344_vm5, %v4574_v49, %v2341_v20  ;;  %2417 = vmatpush.msrb.mxu1 %v2392_v16  ;;  %v4460_v49 = vld [vmem:[#allocation4 + $0x1f8] ss:$0 sm:$0xff] }
0x1412   : > { %v1798_v7 = vsel %vm6147_vm0, %v1794_v25, 0.0  ;;  %v2347_v26 = vmul.f32 %v2345_v12, %v5582_v62  ;;  %vm6149_vm0 = vmmov %vm6148_vm3 }
0x1413   : > { %1799 = vadd.xlane.f32.xlu1 %v1798_v7  ;;  %2418 = vmatpush.msrb.mxu1 %v2391_v35  ;;  %v4463_v7 = vld [vmem:[#allocation4 + $0x2c0] ss:$0 sm:$0xff] }
0x1414   : > { %v2351_v28 = vmul.f32 %v4458_v53, %v2347_v26 }
0x1416   : > { %v2355_v10 = vadd.f32 %v4459_v56, %v2351_v28 }
0x1418   : > { %4293 = vmatmul.msk.f32.gmra.mxu3 %vm6148_vm3, %v2355_v10  ;;  %vm6150_vm3 = vmmov %vm6149_vm0 }
0x147e   : > { %v1797_v36 = vpop.xlane.xlu2 %1796 }
0x147f   : > { %v1801_v33 = vmul.f32 %v1797_v36, %v4794_v17 }
0x1481   : > { %v1803_v5 = vadd.f32 1e-12, %v1801_v33 }
0x1483   : > { %4575 = vrsqrt.f32 %v1803_v5  ;;  %vm1811_vm10 = vweird.f32 %v1803_v5 }
0x1486   : > { %v1800_v21 = vpop.xlane.xlu1 %1799 }
0x1487   : > { %v1802_v62 = vmul.f32 %v1800_v21, %v4794_v17 }
0x1489   : > { %v4576_v58 = vpop.eup %4575  ;;  %v1804_v41 = vadd.f32 1e-12, %v1802_v62 }
0x148a   : > { %v1806_v1 = vmul.f32 %v4576_v58, %v1803_v5  ;;  %vm1812_vm4 = vweird.f32 %v4576_v58 }
0x148b   : > { %4577 = vrsqrt.f32 %v1804_v41  ;;  %vm1813_vm7 = vmor %vm1811_vm10, %vm1812_vm4  ;;  %vm1821_vm5 = vweird.f32 %v1804_v41 }
0x148c   : > { %v1807_v44 = vmul.f32 %v4576_v58, %v1806_v1  ;;  %vm6151_vm4 = vmmov %vm6149_vm0 }
0x148d   : > { %vm6152_vm10 = vmmov %vm6149_vm0 }
0x148e   : > { %v1808_v51 = vmul.f32 0.5, %v1807_v44 }
0x1490   : > { %v1809_v45 = vsub.f32 1.5, %v1808_v51 }
0x1491   : > { %v4578_v24 = vpop.eup %4577 }
0x1492   : > { %v1810_v13 = vmul.f32 %v4576_v58, %v1809_v45  ;;  %v1816_v39 = vmul.f32 %v4578_v24, %v1804_v41  ;;  %vm1822_vm11 = vweird.f32 %v4578_v24 }
0x1493   : > { %v2385_v55 = vpop.f32.mrf.mxu3  ;;  %vm1823_vm15 = vmor %vm1821_vm5, %vm1822_vm11 }
0x1494   : > { %v1814_v3 = vsel %vm1813_vm7, %v4576_v58, %v1810_v13  ;;  %v1817_v53 = vmul.f32 %v4578_v24, %v1816_v39  ;;  %v2386_v20 = vadd.f32 %v4461_v37, %v2385_v55  ;;  %vm6153_vm7 = vcmp.eq.s32.totalorder %v4914_v9, 0  ;;  %vm6154_vm11 = vmmov %vm6149_vm0 }
0x1495   : > { %v1825_v52 = vmul.f32 %v1814_v3, %v5596_v50  ;;  %vm6155_vm5 = vmmov %vm6149_vm0 }
0x1496   : > { %v1818_v43 = vmul.f32 0.5, %v1817_v53 }
0x1497   : > { %v1829_v59 = vmul.f32 %v4460_v49, %v1825_v52 }
0x1498   : > { %v1819_v6 = vsub.f32 1.5, %v1818_v43 }
0x1499   : > { %v5609_v56 = vadd.f32 %v4462_v57, %v1829_v59 }
0x149a   : > { %v1820_v63 = vmul.f32 %v4578_v24, %v1819_v6 }
0x149b   : > { %v2388_v34 = vpop.f32.mrf.mxu3  ;;  %4294 = vmatmul.msk.f32.vlgmr.msrb.gmra.mxu1 %vm6149_vm0, %v5609_v56 }
0x149c   : > { %v1824_v14 = vsel %vm1823_vm15, %v4578_v24, %v1820_v63  ;;  %v2389_v15 = vadd.f32 %v4461_v37, %v2388_v34  ;;  %vm6156_vm15 = vmmov %vm6149_vm0 }
0x149d   : > { %v1826_v46 = vmul.f32 %v1824_v14, %v1792_v4 }
0x149e   : > { %4296 = vmatpush.msk.msrb.mxu0 %vm1941_vm13, %v2389_v15 }
0x149f   : > { %v1830_v50 = vmul.f32 %v4460_v49, %v1826_v46 }
0x14a0   : > { %2444 = vmatpush.msrb.mxu0 %v2386_v20 }
0x14a1   : > { %v5614_v25 = vadd.f32 %v4462_v57, %v1830_v50  ;;  %4297 = vmatmul.msk.f32.vlgmr.msrb.gmra.mxu0 %vm1925_vm8, %v4841_v54 }
0x14a3   : > { %4295 = vmatmul.msk.f32.gmra.mxu1 %vm6150_vm3, %v5614_v25  ;;  %vm6157_vm3 = vcmp.eq.s32.totalorder %v4914_v9, 3 }
0x14a9   : > { %4298 = vmatmul.msk.f32.gmra.mxu0 %vm1925_vm8, %v5324_v2 }
0x14b1   : > { %4299 = vmatmul.msk.f32.gmra.mxu0 %vm1925_vm8, %v5346_v29 }
0x14b9   : > { %4300 = vmatmul.msk.f32.gmra.mxu0 %vm1925_vm8, %v5359_v30 }
0x14c1   : > { %4301 = vmatmul.msk.f32.gmra.mxu0 %vm1925_vm8, %v5365_v11 }
0x1518   : > { %v2420_v4 = vpop.f32.mrf.mxu1 }
0x1519   : > { %v5632_v10 = vadd.f32 %v4463_v7, %v2420_v4 }
0x151e   : > { %v2446_v12 = vpop.f32.mrf.mxu0 }
0x151f   : > { %v2461_v42 = vsel %vm6153_vm7, %v2446_v12, 0.0 }
0x1520   : > { %v2423_v26 = vpop.f32.mrf.mxu1 }
0x1521   : > { %v5628_v28 = vadd.f32 %v4463_v7, %v2423_v26 }
0x1523   : > { %4302 = vmatpush.xpose.msk.msrb.mxu2 %vm6151_vm4, %v5628_v28  ;;  %vm6158_vm4 = vmmov %vm6149_vm0 }
0x1526   : > { %v2449_v38 = vpop.f32.mrf.mxu0 }
0x1527   : > { %4303 = vmatpush.xpose.msk.msrb.mxu2 %vm6152_vm10, %v5632_v10  ;;  %v2462_v16 = vsel %vm5385_vm9, %v2449_v38, 0.0  ;;  %vm6159_vm10 = vcmask 80896  }
0x1528   : > { %vm6160_vm7 = vmmov %vm6159_vm10 }
0x152a   : > { %4304 = vmatmul.msk.f32.vlgmr.msrb.gmra.mxu2 %vm6154_vm11, %v2461_v42  ;;  %vm6161_vm11 = vmmov %vm6160_vm7 }
0x152e   : > { %v2452_v35 = vpop.f32.mrf.mxu0 }
0x152f   : > { %v2463_v36 = vsel %vm5395_vm2, %v2452_v35, 0.0 }
0x1532   : > { %4305 = vmatmul.msk.f32.gmra.mxu2 %vm6155_vm5, %v2462_v16  ;;  %vm6162_vm5 = vmmov %vm6160_vm7 }
0x1536   : > { %v2455_v33 = vpop.f32.mrf.mxu0 }
0x1537   : > { %v2464_v5 = vsel %vm5404_vm14, %v2455_v33, 0.0 }
0x153a   : > { %4306 = vmatmul.msk.f32.gmra.mxu2 %vm6156_vm15, %v2463_v36  ;;  %vm6090_vm15 = vcmask 76800  }
0x153e   : > { %v2458_v21 = vpop.f32.mrf.mxu0 }
0x153f   : > { %v2465_v62 = vsel %vm6157_vm3, %v2458_v21, 0.0 }
0x1542   : > { %4307 = vmatmul.msk.f32.gmra.mxu2 %vm6149_vm0, %v2464_v5  ;;  %vm6163_vm0 = vmmov %vm6162_vm5 }
0x1543   : > { %vm6164_vm3 = vmmov %vm6163_vm0 }
0x154a   : > { %4308 = vmatmul.msk.f32.gmra.mxu2 %vm6158_vm4, %v2465_v62  ;;  %vm6165_vm4 = vmmov %vm6163_vm0 }
0x15ad   : > { %v2504_v58 = vpop.f32.mrf.mxu2 }
0x15ae   : > { %v2519_v41 = vmul.f32 0.35355338, %v2504_v58 }
0x15b0   : > { %v2524_v1 = vsel %vm4956_vm12, %v2519_v41, -3.4028235e+38 }
0x15b1   : > { %v2529_v44 = vsel %vm6159_vm10, %v2524_v1, -inf  ;;  %vm6166_vm10 = vmmov %vm6163_vm0 }
0x15b2   : > { %2530 = vmax.xlane.f32.xlu2 %v2529_v44 }
0x15b5   : > { %v2507_v51 = vpop.f32.mrf.mxu2 }
0x15b6   : > { %v2520_v45 = vmul.f32 0.35355338, %v2507_v51 }
0x15b8   : > { %v2525_v24 = vsel %vm4956_vm12, %v2520_v45, -3.4028235e+38 }
0x15b9   : > { %v2532_v13 = vsel %vm6160_vm7, %v2525_v24, -inf }
0x15ba   : > { %2533 = vmax.xlane.f32.xlu0 %v2532_v13 }
0x15bd   : > { %v2510_v39 = vpop.f32.mrf.mxu2 }
0x15be   : > { %v2521_v49 = vmul.f32 0.35355338, %v2510_v39 }
0x15c0   : > { %v2526_v55 = vsel %vm4956_vm12, %v2521_v49, -3.4028235e+38 }
0x15c1   : > { %v2535_v3 = vsel %vm6161_vm11, %v2526_v55, -inf }
0x15c2   : > { %2536 = vmax.xlane.f32.xlu1 %v2535_v3 }
0x15c5   : > { %v2513_v53 = vpop.f32.mrf.mxu2 }
0x15c6   : > { %v2522_v52 = vmul.f32 0.35355338, %v2513_v53 }
0x15c8   : > { %v2527_v57 = vsel %vm4956_vm12, %v2522_v52, -3.4028235e+38 }
0x15c9   : > { %v2538_v43 = vsel %vm6162_vm5, %v2527_v57, -inf }
0x15ca   : > { %2539 = vmax.xlane.f32.xlu2 %v2538_v43 }
0x15cd   : > { %v2516_v59 = vpop.f32.mrf.mxu2 }
0x15ce   : > { %v2523_v6 = vmul.f32 0.35355338, %v2516_v59 }
0x15d0   : > { %v2528_v63 = vsel %vm4956_vm12, %v2523_v6, -3.4028235e+38 }
0x15d1   : > { %v2542_v37 = vsel %vm6090_vm15, %v2528_v63, -inf }
0x15d2   : > { %2543 = vmax.xlane.f32.xlu0 %v2542_v37 }
0x1625   : > { %v2531_v34 = vpop.xlane.xlu2 %2530 }
0x1626   : > { %v2545_v14 = vsub.f32 %v2524_v1, %v2531_v34 }
0x1628   : > { %v2550_v15 = vmul.f32 1.442695, %v2545_v14 }
0x162a   : > { %4579 = vpow2.f32 %v2550_v15 }
0x162d   : > { %v2534_v46 = vpop.xlane.xlu0 %2533 }
0x162e   : > { %v2546_v20 = vsub.f32 %v2525_v24, %v2534_v46 }
0x1630   : > { %v4580_v50 = vpop.eup %4579  ;;  %v2552_v4 = vmul.f32 1.442695, %v2546_v20 }
0x1631   : > { %v2560_v12 = vsel %vm6163_vm0, %v4580_v50, 0.0 }
0x1632   : > { %4581 = vpow2.f32 %v2552_v4  ;;  %2561 = vadd.xlane.f32.xlu1 %v2560_v12 }
0x1635   : > { %v2537_v7 = vpop.xlane.xlu1 %2536 }
0x1636   : > { %v2547_v26 = vsub.f32 %v2526_v55, %v2537_v7 }
0x1638   : > { %v5667_v38 = vpop.eup %4581  ;;  %v2554_v42 = vmul.f32 1.442695, %v2547_v26 }
0x1639   : > { %v2563_v16 = vsel %vm6164_vm3, %v5667_v38, 0.0 }
0x163a   : > { %4583 = vpow2.f32 %v2554_v42  ;;  %2564 = vadd.xlane.f32.xlu2 %v2563_v16 }
0x163d   : > { %v2540_v35 = vpop.xlane.xlu2 %2539 }
0x163e   : > { %v2548_v36 = vsub.f32 %v2527_v57, %v2540_v35 }
0x1640   : > { %v5671_v33 = vpop.eup %4583  ;;  %v2556_v5 = vmul.f32 1.442695, %v2548_v36 }
0x1641   : > { %v2566_v21 = vsel %vm6165_vm4, %v5671_v33, 0.0 }
0x1642   : > { %4585 = vpow2.f32 %v2556_v5  ;;  %2567 = vadd.xlane.f32.xlu0 %v2566_v21 }
0x1645   : > { %v2544_v62 = vpop.xlane.xlu0 %2543 }
0x1646   : > { %v2549_v58 = vsub.f32 %v2528_v63, %v2544_v62 }
0x1648   : > { %v5675_v41 = vpop.eup %4585  ;;  %v2558_v1 = vmul.f32 1.442695, %v2549_v58 }
0x1649   : > { %v2569_v44 = vsel %vm6166_vm10, %v5675_v41, 0.0 }
0x164a   : > { %4587 = vpow2.f32 %v2558_v1  ;;  %2570 = vadd.xlane.f32.xlu0 %v2569_v44 }
0x164b   : > { %2657 = vrot.lane.b32.xlu1 %v5628_v28, %s4730_s10 }
0x1650   : > { %v5681_v51 = vpop.eup %4587 }
0x1651   : > { %v2572_v45 = vsel %vm6090_vm15, %v5681_v51, 0.0 }
0x1652   : > { %2655 = vrot.lane.b32.xlu2 %v5632_v10, %s4730_s10  ;;  %2573 = vadd.xlane.f32.xlu0 %v2572_v45 }
0x16a5   : > { %v2562_v24 = vpop.xlane.xlu1 %2561 }
0x16a6   : > { %4589 = vrcp.f32 %v2562_v24  ;;  %v2586_v28 = vand.u32 2147483648, %v2562_v24  ;;  %vm2580_vm11 = vweird.f32 %v2562_v24  ;;  %v2584_v57 = vand.u32 2147483647, %v2562_v24 }
0x16a8   : > { %v2587_v6 = vor.u32 1.1754944e-38, %v2586_v28  ;;  %vm2585_vm0 = vcmp.eq.f32.partialorder %v2584_v57, 8.507059e+37 }
0x16ac   : > { %v4590_v13 = vpop.eup %4589 }
0x16ad   : > { %v2576_v39 = vmul.f32 %v4590_v13, %v2562_v24  ;;  %v2565_v49 = vpop.xlane.xlu2 %2564  ;;  %vm2581_vm7 = vweird.f32 %v4590_v13 }
0x16ae   : > { %4591 = vrcp.f32 %v2565_v49  ;;  %vm2582_vm5 = vmor %vm2580_vm11, %vm2581_vm7  ;;  %v2600_v14 = vand.u32 2147483648, %v2565_v49  ;;  %vm2594_vm4 = vweird.f32 %v2565_v49  ;;  %v2598_v4 = vand.u32 2147483647, %v2565_v49 }
0x16af   : > { %v2577_v55 = vsub.f32 1.0, %v2576_v39  ;;  %vm6167_vm7 = vcmask 1041408  }
0x16b0   : > { %v2601_v16 = vor.u32 1.1754944e-38, %v2600_v14  ;;  %vm2599_vm11 = vcmp.eq.f32.partialorder %v2598_v4, 8.507059e+37 }
0x16b1   : > { %v2578_v3 = vmul.f32 %v4590_v13, %v2577_v55 }
0x16b3   : > { %v2579_v53 = vadd.f32 %v4590_v13, %v2578_v3 }
0x16b4   : > { %v4592_v52 = vpop.eup %4591 }
0x16b5   : > { %v2590_v43 = vmul.f32 %v4592_v52, %v2565_v49  ;;  %v2568_v59 = vpop.xlane.xlu0 %2567  ;;  %v2583_v10 = vsel %vm2582_vm5, %v4590_v13, %v2579_v53  ;;  %vm2595_vm3 = vweird.f32 %v4592_v52  ;;  %v2656_v35 = vpop.permute.xlu2 %2655  ;;  %vm6168_vm5 = vcmask 80896  }
0x16b6   : > { %4593 = vrcp.f32 %v2568_v59  ;;  %v2588_v34 = vsel %vm2585_vm0, %v2587_v6, %v2583_v10  ;;  %vm2596_vm10 = vmor %vm2594_vm4, %vm2595_vm3  ;;  %v2614_v62 = vand.u32 2147483648, %v2568_v59  ;;  %vm2608_vm3 = vweird.f32 %v2568_v59 }
0x16b7   : > { %v2591_v63 = vsub.f32 1.0, %v2590_v43  ;;  %v2645_v20 = vmul.f32 %v4580_v50, %v2588_v34  ;;  %v2612_v45 = vand.u32 2147483647, %v2568_v59 }
0x16b8   : > { %v2615_v49 = vor.u32 1.1754944e-38, %v2614_v62 }
0x16b9   : > { %v2592_v37 = vmul.f32 %v4592_v52, %v2591_v63  ;;  %v2650_v5 = vsel %vm4956_vm12, %v2645_v20, 0.0 }
0x16bb   : > { %v2593_v15 = vadd.f32 %v4592_v52, %v2592_v37 }
0x16bc   : > { %v4594_v46 = vpop.eup %4593 }
0x16bd   : > { %v2604_v12 = vmul.f32 %v4594_v46, %v2568_v59  ;;  %v2658_v7 = vpop.permute.xlu1 %2657  ;;  %v2571_v26 = vpop.xlane.xlu0 %2570  ;;  %v2597_v42 = vsel %vm2596_vm10, %v4592_v52, %v2593_v15  ;;  %vm2609_vm0 = vweird.f32 %v4594_v46  ;;  %vm2613_vm10 = vcmp.eq.f32.partialorder %v2612_v45, 8.507059e+37 }
0x16be   : > { %4595 = vrcp.f32 %v2571_v26  ;;  %4309 = vmatpush.msk.msra.mxu3 %vm6167_vm7, %v2658_v7  ;;  %v2602_v50 = vsel %vm2599_vm11, %v2601_v16, %v2597_v42  ;;  %vm2610_vm4 = vmor %vm2608_vm3, %vm2609_vm0  ;;  %v2628_v52 = vand.u32 2147483648, %v2571_v26  ;;  %v2626_v59 = vand.u32 2147483647, %v2571_v26 }
0x16bf   : > { %v2605_v36 = vsub.f32 1.0, %v2604_v12  ;;  %v2646_v44 = vmul.f32 %v5667_v38, %v2602_v50  ;;  %vm6169_vm7 = vmmov %vm6168_vm5 }
0x16c0   : > { %2692 = vmatpush.msra.mxu3 %v2656_v35  ;;  %v2629_v63 = vor.u32 1.1754944e-38, %v2628_v52  ;;  %vm2627_vm3 = vcmp.eq.f32.partialorder %v2626_v59, 8.507059e+37 }
0x16c1   : > { %v2606_v21 = vmul.f32 %v4594_v46, %v2605_v36  ;;  %4310 = vmatmul.msk.f32.vlgmr.msra.gmra.mxu3 %vm6168_vm5, %v2650_v5  ;;  %v2651_v3 = vsel %vm4956_vm12, %v2646_v44, 0.0  ;;  %vm2622_vm5 = vweird.f32 %v2571_v26  ;;  %v2740_v44 = vld [vmem:[#allocation4 + $0x2c8] sm:$0xff] }
0x16c3   : > { %v2607_v58 = vadd.f32 %v4594_v46, %v2606_v21 }
0x16c4   : > { %v4596_v1 = vpop.eup %4595 }
0x16c5   : > { %v2618_v24 = vmul.f32 %v4596_v1, %v2571_v26  ;;  %v2574_v13 = vpop.xlane.xlu0 %2573  ;;  %v2611_v39 = vsel %vm2610_vm4, %v4594_v46, %v2607_v58  ;;  %vm2623_vm11 = vweird.f32 %v4596_v1  ;;  %vm6170_vm4 = vmmov %vm6169_vm7  ;;  %v2742_v58 = vld [vmem:[#allocation4 + $0x2d8] sm:$0xff] }
0x16c6   : > { %4597 = vrcp.f32 %v2574_v13  ;;  %v2616_v28 = vsel %vm2613_vm10, %v2615_v49, %v2611_v39  ;;  %vm2624_vm0 = vmor %vm2622_vm5, %vm2623_vm11  ;;  %v2642_v20 = vand.u32 2147483648, %v2574_v13  ;;  %v2640_v4 = vand.u32 2147483647, %v2574_v13 }
0x16c7   : > { %v2619_v55 = vsub.f32 1.0, %v2618_v24  ;;  %v2647_v43 = vmul.f32 %v5671_v33, %v2616_v28  ;;  %vm6171_vm5 = vmmov %vm6170_vm4 }
0x16c8   : > { %v2643_v7 = vor.u32 1.1754944e-38, %v2642_v20  ;;  %vm2641_vm11 = vcmp.eq.f32.partialorder %v2640_v4, 8.507059e+37  ;;  %v2829_v20 = vld [vmem:[#allocation4 + $0x300] sm:$0xff] }
0x16c9   : > { %v2620_v53 = vmul.f32 %v4596_v1, %v2619_v55  ;;  %4311 = vmatmul.msk.f32.gmra.mxu3 %vm6169_vm7, %v2651_v3  ;;  %v2652_v34 = vsel %vm4956_vm12, %v2647_v43, 0.0  ;;  %vm2636_vm7 = vweird.f32 %v2574_v13 }
0x16cb   : > { %v2621_v57 = vadd.f32 %v4596_v1, %v2620_v53 }
0x16cc   : > { %v4598_v38 = vpop.eup %4597 }
0x16cd   : > { %v2632_v10 = vmul.f32 %v4598_v38, %v2574_v13  ;;  %v2625_v6 = vsel %vm2624_vm0, %v4596_v1, %v2621_v57  ;;  %vm2637_vm10 = vweird.f32 %v4598_v38  ;;  %vm6172_vm0 = vmmov %vm6170_vm4  ;;  %v2741_v1 = vld [vmem:[#allocation4 + $0x2d0] sm:$0xff]  ;;  %v4464_v13 = vld [vmem:[#allocation4 + $0x2e8] ss:$0 sm:$0xff] }
0x16ce   : > { %v2630_v15 = vsel %vm2627_vm3, %v2629_v63, %v2625_v6  ;;  %vm2638_vm15 = vmor %vm2636_vm7, %vm2637_vm10  ;;  %vm6174_vm3 = vcmp.eq.s32.totalorder %v4914_v9, 0 }
0x16cf   : > { %v2633_v37 = vsub.f32 1.0, %v2632_v10  ;;  %v2648_v33 = vmul.f32 %v5675_v41, %v2630_v15  ;;  %v2831_v15 = vld [vmem:[#allocation4 + $0x310] sm:$0xff] }
0x16d1   : > { %v2634_v14 = vmul.f32 %v4598_v38, %v2633_v37  ;;  %4312 = vmatmul.msk.f32.gmra.mxu3 %vm6170_vm4, %v2652_v34  ;;  %v2653_v26 = vsel %vm4956_vm12, %v2648_v33, 0.0  ;;  %vm6175_vm4 = vcmask 261120  }
0x16d2   : > { %vm6176_vm10 = vmmov %vm6175_vm4 }
0x16d3   : > { %v2635_v46 = vadd.f32 %v4598_v38, %v2634_v14  ;;  %vm6177_vm7 = vmmov %vm6175_vm4  ;;  %v2832_v14 = vld [vmem:[#allocation4 + $0x318] sm:$0xff] }
0x16d4   : > { %2853 = vmatpush.msra.mxu0 %v2832_v14  ;;  %v4467_v14 = vld [vmem:[#allocation4 + $0x320] ss:$0 sm:$0xff] }
0x16d5   : > { %v2639_v12 = vsel %vm2638_vm15, %v4598_v38, %v2635_v46  ;;  %vm6173_vm15 = vcmp.eq.s32.totalorder %v4914_v9, 3  ;;  %v2830_v46 = vld [vmem:[#allocation4 + $0x308] sm:$0xff] }
0x16d6   : > { %v2644_v42 = vsel %vm2641_vm11, %v2643_v7, %v2639_v12  ;;  %vm6178_vm11 = vcmask 253952   ;;  %2854 = vmatpush.msra.mxu0 %v2831_v15  ;;  %v2873_v7 = vld [vmem:[#allocation4 + $0x360] sm:$0xff] }
0x16d7   : > { %v2649_v16 = vmul.f32 %v5681_v51, %v2644_v42  ;;  %v2743_v51 = vld [vmem:[#allocation4 + $0x2e0] sm:$0xff]  ;;  %2890 = vmatpush.msra.mxu2 %v2873_v7  ;;  %v2871_v42 = vld [vmem:[#allocation4 + $0x350] sm:$0xff] }
0x16d8   : > { %2855 = vmatpush.msra.mxu0 %v2830_v46 }
0x16d9   : > { %4313 = vmatmul.msk.f32.gmra.mxu3 %vm6171_vm5, %v2653_v26  ;;  %v2654_v35 = vsel %vm4956_vm12, %v2649_v16, 0.0  ;;  %vm6179_vm5 = vmmov %vm6175_vm4  ;;  %v2872_v26 = vld [vmem:[#allocation4 + $0x358] sm:$0xff] }
0x16da   : > { %2856 = vmatpush.msra.mxu0 %v2829_v20  ;;  %2891 = vmatpush.msra.mxu2 %v2872_v26 }
0x16dc   : > { %2892 = vmatpush.msra.mxu2 %v2871_v42 }
0x16e1   : > { %4314 = vmatmul.msk.f32.gmra.mxu3 %vm6172_vm0, %v2654_v35  ;;  %vm6180_vm0 = vmmov %vm6178_vm11 }
0x1744   : > { %v2694_v36 = vpop.f32.mrf.mxu3 }
0x174c   : > { %v2697_v5 = vpop.f32.mrf.mxu3 }
0x1754   : > { %v2700_v41 = vpop.f32.mrf.mxu3 }
0x175c   : > { %v2703_v21 = vpop.f32.mrf.mxu3 }
0x1764   : > { %v2706_v50 = vpop.f32.mrf.mxu3 }
0x1765   : > { %v2713_v62 = vsel %vm6173_vm15, %v2706_v50, 0.0 }
0x1766   : > { %4315 = vmatpush.msk.msra.mxu1 %vm2240_vm6, %v2713_v62 }
0x1768   : > { %4316 = vmatpush.msk.msra.mxu1 %vm5404_vm14, %v2703_v21  ;;  %v2869_v21 = vld [vmem:[#allocation4 + $0x340] sm:$0xff] }
0x176a   : > { %4317 = vmatpush.msk.msra.mxu1 %vm5395_vm2, %v2700_v41 }
0x176c   : > { %4318 = vmatpush.msk.msra.mxu1 %vm5385_vm9, %v2697_v5 }
0x176e   : > { %4319 = vmatpush.msk.msra.mxu1 %vm6174_vm3, %v2694_v36  ;;  %v2870_v36 = vld [vmem:[#allocation4 + $0x348] sm:$0xff] }
0x176f   : > { %4320 = vmatmul.msk.f32.vlgmr.msra.gmra.mxu1 %vm2233_vm1, %v5553_v40  ;;  %2893 = vmatpush.msra.mxu2 %v2870_v36 }
0x1770   : > { %2764 = vmatpush.msrb.mxu1 %v2743_v51 }
0x1771   : > { %2894 = vmatpush.msra.mxu2 %v2869_v21 }
0x1772   : > { %2765 = vmatpush.msrb.mxu1 %v2742_v58 }
0x1774   : > { %2766 = vmatpush.msrb.mxu1 %v2741_v1 }
0x1776   : > { %2767 = vmatpush.msrb.mxu1 %v2740_v44 }
0x1777   : > { %4321 = vmatmul.msk.f32.gmra.mxu1 %vm2233_vm1, %v5561_v32 }
0x17ec   : > { %v2734_v45 = vpop.f32.mrf.mxu1 }
0x17ed   : > { %4322 = vmatmul.msk.f32.vlgmr.msrb.gmra.mxu1 %vm6175_vm4, %v2734_v45 }
0x17f4   : > { %v2737_v24 = vpop.f32.mrf.mxu1 }
0x17f5   : > { %4323 = vmatmul.msk.f32.gmra.mxu1 %vm6176_vm10, %v2737_v24  ;;  %v4465_v24 = vld [vmem:[#allocation4 + $0x2f0] ss:$0 sm:$0xff] }
0x186a   : > { %v2769_v39 = vpop.f32.mrf.mxu1 }
0x186b   : > { %v2770_v49 = vadd.f32 %v4464_v13, %v2769_v39 }
0x186d   : > { %v5725_v55 = vadd.f32 %v2770_v49, %v5568_v23  ;;  %v4466_v49 = vld [vmem:[#allocation4 + $0x2f8] ss:$0 sm:$0xff] }
0x186f   : > { %v2777_v3 = vsel %vm6177_vm7, %v5725_v55, 0.0 }
0x1870   : > { %2778 = vadd.xlane.f32.xlu0 %v2777_v3 }
0x1872   : > { %v2772_v53 = vpop.f32.mrf.mxu1 }
0x1873   : > { %v2773_v28 = vadd.f32 %v4464_v13, %v2772_v53 }
0x1875   : > { %v5730_v52 = vadd.f32 %v2773_v28, %v5573_v19 }
0x1877   : > { %v2780_v57 = vsel %vm6178_vm11, %v5730_v52, 0.0 }
0x1878   : > { %2781 = vadd.xlane.f32.xlu1 %v2780_v57 }
0x18e3   : > { %v2779_v38 = vpop.xlane.xlu0 %2778 }
0x18e4   : > { %v2783_v43 = vmul.f32 %v2779_v38, %v4794_v17 }
0x18e6   : > { %v2785_v59 = vsub.f32 %v5725_v55, %v2783_v43 }
0x18e8   : > { %v2787_v23 = vmul.f32 %v2785_v59, %v2785_v59 }
0x18ea   : > { %v2789_v10 = vsel %vm6179_vm5, %v2787_v23, 0.0 }
0x18eb   : > { %v2782_v6 = vpop.xlane.xlu1 %2781  ;;  %2790 = vadd.xlane.f32.xlu2 %v2789_v10 }
0x18ec   : > { %v2784_v63 = vmul.f32 %v2782_v6, %v4794_v17 }
0x18ee   : > { %v2786_v37 = vsub.f32 %v5730_v52, %v2784_v63 }
0x18f0   : > { %v2788_v19 = vmul.f32 %v2786_v37, %v2786_v37 }
0x18f2   : > { %v2792_v34 = vsel %vm6180_vm0, %v2788_v19, 0.0  ;;  %vm6181_vm0 = vmmov %vm6179_vm5  ;;  %v2868_v19 = vld [vmem:[#allocation4 + $0x338] sm:$0xff] }
0x18f3   : > { %2793 = vadd.xlane.f32.xlu0 %v2792_v34  ;;  %2895 = vmatpush.msra.mxu2 %v2868_v19  ;;  %v2867_v34 = vld [vmem:[#allocation4 + $0x330] sm:$0xff] }
0x18f5   : > { %2896 = vmatpush.msra.mxu2 %v2867_v34 }
0x195e   : > { %v2791_v4 = vpop.xlane.xlu2 %2790 }
0x195f   : > { %v2795_v33 = vmul.f32 %v2791_v4, %v4794_v17 }
0x1961   : > { %v2797_v12 = vadd.f32 1e-12, %v2795_v33 }
0x1963   : > { %4599 = vrsqrt.f32 %v2797_v12  ;;  %vm2805_vm3 = vweird.f32 %v2797_v12 }
0x1966   : > { %v2794_v16 = vpop.xlane.xlu0 %2793 }
0x1967   : > { %v2796_v35 = vmul.f32 %v2794_v16, %v4794_v17 }
0x1969   : > { %v4600_v5 = vpop.eup %4599  ;;  %v2798_v41 = vadd.f32 1e-12, %v2796_v35 }
0x196a   : > { %v2800_v50 = vmul.f32 %v4600_v5, %v2797_v12  ;;  %vm2806_vm15 = vweird.f32 %v4600_v5 }
0x196b   : > { %4601 = vrsqrt.f32 %v2798_v41  ;;  %vm2807_vm4 = vmor %vm2805_vm3, %vm2806_vm15  ;;  %vm2815_vm7 = vweird.f32 %v2798_v41  ;;  %vm6182_vm15 = vcmask 523264  }
0x196c   : > { %v2801_v62 = vmul.f32 %v4600_v5, %v2800_v50  ;;  %vm6183_vm3 = vmmov %vm6182_vm15 }
0x196e   : > { %v2802_v51 = vmul.f32 0.5, %v2801_v62 }
0x1970   : > { %v2803_v58 = vsub.f32 1.5, %v2802_v51 }
0x1971   : > { %v4602_v1 = vpop.eup %4601 }
0x1972   : > { %v2804_v44 = vmul.f32 %v4600_v5, %v2803_v58  ;;  %v2810_v45 = vmul.f32 %v4602_v1, %v2798_v41  ;;  %vm2816_vm10 = vweird.f32 %v4602_v1 }
0x1973   : > { %vm2817_vm11 = vmor %vm2815_vm7, %vm2816_vm10  ;;  %vm6185_vm10 = vcmask 253952  }
0x1974   : > { %v2808_v13 = vsel %vm2807_vm4, %v4600_v5, %v2804_v44  ;;  %v2811_v39 = vmul.f32 %v4602_v1, %v2810_v45  ;;  %vm6184_vm4 = vmmov %vm6181_vm0 }
0x1975   : > { %v2819_v3 = vmul.f32 %v2808_v13, %v2785_v59  ;;  %v2866_v59 = vld [vmem:[#allocation4 + $0x328] sm:$0xff]  ;;  %vm6186_vm7 = vmmov %vm6181_vm0  ;;  %v2961_v13 = vld [vmem:[#allocation4 + $0x390] sm:$0xff] }
0x1976   : > { %v2812_v53 = vmul.f32 0.5, %v2811_v39  ;;  %2897 = vmatpush.msra.mxu2 %v2866_v59  ;;  %v2960_v39 = vld [vmem:[#allocation4 + $0x388] sm:$0xff] }
0x1977   : > { %v2823_v28 = vmul.f32 %v4465_v24, %v2819_v3 }
0x1978   : > { %v2813_v57 = vsub.f32 1.5, %v2812_v53 }
0x1979   : > { %v2827_v38 = vadd.f32 %v4466_v49, %v2823_v28 }
0x197a   : > { %v2814_v43 = vmul.f32 %v4602_v1, %v2813_v57 }
0x197b   : > { %4324 = vmatmul.msk.f32.vlgmr.msra.gmra.mxu0 %vm6179_vm5, %v2827_v38 }
0x197c   : > { %v2818_v23 = vsel %vm2817_vm11, %v4602_v1, %v2814_v43  ;;  %vm6187_vm11 = vmmov %vm6185_vm10 }
0x197d   : > { %v2820_v10 = vmul.f32 %v2818_v23, %v2786_v37  ;;  %v4468_v37 = vld [vmem:[#allocation4 + $0x368] ss:$0 sm:$0xff] }
0x197f   : > { %v2824_v6 = vmul.f32 %v4465_v24, %v2820_v10  ;;  %v2962_v24 = vld [vmem:[#allocation4 + $0x398] sm:$0xff] }
0x1980   : > { %2983 = vmatpush.msra.mxu1 %v2962_v24 }
0x1981   : > { %v2828_v63 = vadd.f32 %v4466_v49, %v2824_v6  ;;  %v2959_v49 = vld [vmem:[#allocation4 + $0x380] sm:$0xff] }
0x1982   : > { %2984 = vmatpush.msra.mxu1 %v2961_v13 }
0x1983   : > { %4325 = vmatmul.msk.f32.gmra.mxu0 %vm6181_vm0, %v2828_v63 }
0x1984   : > { %2985 = vmatpush.msra.mxu1 %v2960_v39 }
0x1986   : > { %2986 = vmatpush.msra.mxu1 %v2959_v49 }
0x19f8   : > { %v2858_v15 = vpop.f32.mrf.mxu0 }
0x19f9   : > { %v2859_v46 = vadd.f32 %v4467_v14, %v2858_v15  ;;  %v4469_v15 = vld [vmem:[#allocation4 + $0x370] ss:$0 sm:$0xff] }
0x19fb   : > { %v2864_v20 = vmax.f32 %v2859_v46, 0.0 }
0x19fd   : > { %4326 = vmatmul.msk.f32.vlgmr.msra.gmra.mxu2 %vm6182_vm15, %v2864_v20 }
0x1a00   : > { %v2861_v4 = vpop.f32.mrf.mxu0 }
0x1a01   : > { %v2862_v33 = vadd.f32 %v4467_v14, %v2861_v4 }
0x1a03   : > { %v2865_v12 = vmax.f32 %v2862_v33, 0.0  ;;  %v4470_v33 = vld [vmem:[#allocation4 + $0x378] ss:$0 sm:$0xff] }
0x1a05   : > { %4327 = vmatmul.msk.f32.gmra.mxu2 %vm6183_vm3, %v2865_v12 }
0x1a80   : > { %v2899_v7 = vpop.f32.mrf.mxu2 }
0x1a81   : > { %v2900_v26 = vadd.f32 %v4468_v37, %v2899_v7 }
0x1a83   : > { %v5747_v42 = vadd.f32 %v2900_v26, %v5725_v55 }
0x1a85   : > { %v2907_v16 = vsel %vm6184_vm4, %v5747_v42, 0.0 }
0x1a86   : > { %2908 = vadd.xlane.f32.xlu0 %v2907_v16 }
0x1a88   : > { %v2902_v35 = vpop.f32.mrf.mxu2 }
0x1a89   : > { %v2903_v36 = vadd.f32 %v4468_v37, %v2902_v35 }
0x1a8b   : > { %v5752_v5 = vadd.f32 %v2903_v36, %v5730_v52 }
0x1a8d   : > { %v2910_v41 = vsel %vm6185_vm10, %v5752_v5, 0.0 }
0x1a8e   : > { %2911 = vadd.xlane.f32.xlu0 %v2910_v41 }
0x1af9   : > { %v2909_v21 = vpop.xlane.xlu0 %2908 }
0x1afa   : > { %v2913_v50 = vmul.f32 %v2909_v21, %v4794_v17 }
0x1afc   : > { %v2915_v62 = vsub.f32 %v5747_v42, %v2913_v50  ;;  %v4471_v50 = vld [vmem:[#allocation4 + $0x3a0] ss:$0 sm:$0xff] }
0x1afe   : > { %v2917_v55 = vmul.f32 %v2915_v62, %v2915_v62 }
0x1b00   : > { %v2919_v51 = vsel %vm6186_vm7, %v2917_v55, 0.0 }
0x1b01   : > { %2920 = vadd.xlane.f32.xlu0 %v2919_v51  ;;  %v2912_v58 = vpop.xlane.xlu0 %2911 }
0x1b02   : > { %v2914_v1 = vmul.f32 %v2912_v58, %v4794_v17 }
0x1b04   : > { %v2916_v44 = vsub.f32 %v5752_v5, %v2914_v1 }
0x1b06   : > { %v2918_v52 = vmul.f32 %v2916_v44, %v2916_v44 }
0x1b08   : > { %v2922_v45 = vsel %vm6187_vm11, %v2918_v52, 0.0  ;;  %vm6188_vm11 = vmmov %vm6186_vm7 }
0x1b09   : > { %2923 = vadd.xlane.f32.xlu0 %v2922_v45 }
0x1b74   : > { %v2921_v3 = vpop.xlane.xlu0 %2920 }
0x1b75   : > { %v2925_v53 = vmul.f32 %v2921_v3, %v4794_v17 }
0x1b77   : > { %v2927_v28 = vadd.f32 1e-12, %v2925_v53 }
0x1b79   : > { %4603 = vrsqrt.f32 %v2927_v28  ;;  %vm2935_vm0 = vweird.f32 %v2927_v28 }
0x1b7c   : > { %v2924_v57 = vpop.xlane.xlu0 %2923 }
0x1b7d   : > { %v2926_v38 = vmul.f32 %v2924_v57, %v4794_v17 }
0x1b7f   : > { %v4604_v43 = vpop.eup %4603  ;;  %v2928_v23 = vadd.f32 1e-12, %v2926_v38 }
0x1b80   : > { %v2930_v10 = vmul.f32 %v4604_v43, %v2927_v28  ;;  %vm2936_vm5 = vweird.f32 %v4604_v43 }
0x1b81   : > { %4605 = vrsqrt.f32 %v2928_v23  ;;  %vm2937_vm15 = vmor %vm2935_vm0, %vm2936_vm5  ;;  %vm2945_vm4 = vweird.f32 %v2928_v23 }
0x1b82   : > { %v2931_v6 = vmul.f32 %v4604_v43, %v2930_v10  ;;  %vm6189_vm5 = vmmov %vm6186_vm7 }
0x1b83   : > { %vm6190_vm0 = vmmov %vm6189_vm5 }
0x1b84   : > { %v2932_v63 = vmul.f32 0.5, %v2931_v6 }
0x1b86   : > { %v2933_v19 = vsub.f32 1.5, %v2932_v63 }
0x1b87   : > { %v4606_v34 = vpop.eup %4605 }
0x1b88   : > { %v2934_v59 = vmul.f32 %v4604_v43, %v2933_v19  ;;  %v2940_v14 = vmul.f32 %v4606_v34, %v2928_v23  ;;  %vm2946_vm3 = vweird.f32 %v4606_v34 }
0x1b89   : > { %vm2947_vm10 = vmor %vm2945_vm4, %vm2946_vm3 }
0x1b8a   : > { %v2938_v46 = vsel %vm2937_vm15, %v4604_v43, %v2934_v59  ;;  %v2941_v20 = vmul.f32 %v4606_v34, %v2940_v14  ;;  %vm6191_vm15 = vcmp.eq.s32.totalorder %v4914_v9, 0  ;;  %vm6192_vm3 = vmmov %vm6190_vm0 }
0x1b8b   : > { %v2949_v4 = vmul.f32 %v2938_v46, %v2915_v62  ;;  %vm6193_vm4 = vmmov %vm6190_vm0 }
0x1b8c   : > { %v2942_v12 = vmul.f32 0.5, %v2941_v20 }
0x1b8d   : > { %v2953_v37 = vmul.f32 %v4469_v15, %v2949_v4 }
0x1b8e   : > { %v2943_v7 = vsub.f32 1.5, %v2942_v12 }
0x1b8f   : > { %v2957_v26 = vadd.f32 %v4470_v33, %v2953_v37 }
0x1b90   : > { %v2944_v16 = vmul.f32 %v4606_v34, %v2943_v7 }
0x1b91   : > { %4328 = vmatmul.msk.f32.vlgmr.msra.gmra.mxu1 %vm6186_vm7, %v2957_v26  ;;  %vm6195_vm7 = vmmov %vm6190_vm0 }
0x1b92   : > { %v2948_v35 = vsel %vm2947_vm10, %v4606_v34, %v2944_v16  ;;  %vm6194_vm10 = vmmov %vm6190_vm0 }
0x1b93   : > { %v2950_v36 = vmul.f32 %v2948_v35, %v2916_v44 }
0x1b95   : > { %v2954_v41 = vmul.f32 %v4469_v15, %v2950_v36 }
0x1b97   : > { %v2958_v21 = vadd.f32 %v4470_v33, %v2954_v41 }
0x1b99   : > { %4329 = vmatmul.msk.f32.gmra.mxu1 %vm6188_vm11, %v2958_v21  ;;  %vm6196_vm11 = vcmp.eq.s32.totalorder %v4914_v9, 3 }
0x1c0e   : > { %v2988_v55 = vpop.f32.mrf.mxu1 }
0x1c0f   : > { %v2989_v62 = vadd.f32 %v4471_v50, %v2988_v55 }
0x1c11   : > { %3035 = vrot.lane.b32.xlu2 %v2989_v62, %s4730_s10 }
0x1c16   : > { %v2991_v51 = vpop.f32.mrf.mxu1 }
0x1c17   : > { %v5767_v58 = vadd.f32 %v4471_v50, %v2991_v51 }
0x1c19   : > { %3037 = vrot.lane.b32.xlu1 %v5767_v58, %s4730_s10  ;;  %4330 = vmatpush.msk.msrb.mxu3 %vm1941_vm13, %v5767_v58 }
0x1c1b   : > { %3012 = vmatpush.msrb.mxu3 %v2989_v62 }
0x1c1c   : > { %4331 = vmatmul.msk.f32.vlgmr.msrb.gmra.mxu3 %vm1925_vm8, %v4841_v54 }
0x1c24   : > { %4332 = vmatmul.msk.f32.gmra.mxu3 %vm1925_vm8, %v5324_v2 }
0x1c2c   : > { %4333 = vmatmul.msk.f32.gmra.mxu3 %vm1925_vm8, %v5346_v29 }
0x1c34   : > { %4334 = vmatmul.msk.f32.gmra.mxu3 %vm1925_vm8, %v5359_v30 }
0x1c3c   : > { %4335 = vmatmul.msk.f32.gmra.mxu3 %vm1925_vm8, %v5365_v11 }
0x1c6b   : > { %v3036_v44 = vpop.permute.xlu2 %3035 }
0x1c8b   : > { %v3038_v1 = vpop.permute.xlu1 %3037 }
0x1c8c   : > { %4336 = vmatpush.xpose.msk.msrb.mxu0 %vm6189_vm5, %v3038_v1  ;;  %vm6197_vm5 = vmmov %vm6190_vm0 }
0x1c90   : > { %4337 = vmatpush.xpose.msk.msrb.mxu0 %vm6190_vm0, %v3036_v44  ;;  %vm6198_vm0 = vcmp.le.s32.totalorder %v4826_v48, %v4824_v47 }
0x1c9f   : > { %v3014_v52 = vpop.f32.mrf.mxu3 }
0x1ca0   : > { %v3029_v45 = vsel %vm6191_vm15, %v3014_v52, 0.0  ;;  %vm6199_vm15 = vcmp.le.s32.totalorder %v4826_v48, %v5423_v61 }
0x1ca1   : > { %4338 = vmatmul.msk.f32.vlgmr.msrb.gmra.mxu0 %vm6192_vm3, %v3029_v45  ;;  %vm6200_vm3 = vcmp.le.s32.totalorder %v4826_v48, %v5432_v0 }
0x1ca7   : > { %v3017_v24 = vpop.f32.mrf.mxu3 }
0x1ca8   : > { %v3030_v13 = vsel %vm5385_vm9, %v3017_v24, 0.0 }
0x1ca9   : > { %4339 = vmatmul.msk.f32.gmra.mxu0 %vm6193_vm4, %v3030_v13  ;;  %vm6201_vm4 = vcmp.le.s32.totalorder %v4826_v48, %v5441_v60 }
0x1caf   : > { %v3020_v39 = vpop.f32.mrf.mxu3 }
0x1cb0   : > { %v3031_v49 = vsel %vm5395_vm2, %v3020_v39, 0.0 }
0x1cb1   : > { %4340 = vmatmul.msk.f32.gmra.mxu0 %vm6194_vm10, %v3031_v49  ;;  %vm6202_vm10 = vcmp.le.s32.totalorder %v4826_v48, %v5450_v22 }
0x1cb7   : > { %v3023_v3 = vpop.f32.mrf.mxu3 }
0x1cb8   : > { %v3032_v53 = vsel %vm5404_vm14, %v3023_v3, 0.0 }
0x1cb9   : > { %4341 = vmatmul.msk.f32.gmra.mxu0 %vm6195_vm7, %v3032_v53  ;;  %vm6203_vm7 = vcmask 68608  }
0x1cbf   : > { %v3026_v28 = vpop.f32.mrf.mxu3 }
0x1cc0   : > { %v3033_v57 = vsel %vm6196_vm11, %v3026_v28, 0.0  ;;  %vm6204_vm11 = vmmov %vm6203_vm7 }
0x1cc1   : > { %4342 = vmatmul.msk.f32.gmra.mxu0 %vm6197_vm5, %v3033_v57 }
0x1d1e   : > { %v3075_v38 = vpop.f32.mrf.mxu0 }
0x1d1f   : > { %v3090_v43 = vmul.f32 0.35355338, %v3075_v38 }
0x1d21   : > { %v3095_v23 = vsel %vm6198_vm0, %v3090_v43, -3.4028235e+38 }
0x1d22   : > { %v3100_v10 = vsel %vm1925_vm8, %v3095_v23, -inf }
0x1d23   : > { %3101 = vmax.xlane.f32.xlu0 %v3100_v10 }
0x1d26   : > { %v3078_v6 = vpop.f32.mrf.mxu0 }
0x1d27   : > { %v3091_v63 = vmul.f32 0.35355338, %v3078_v6 }
0x1d29   : > { %v3096_v19 = vsel %vm6199_vm15, %v3091_v63, -3.4028235e+38 }
0x1d2a   : > { %v3103_v34 = vsel %vm1925_vm8, %v3096_v19, -inf }
0x1d2b   : > { %3104 = vmax.xlane.f32.xlu0 %v3103_v34 }
0x1d2e   : > { %v3081_v59 = vpop.f32.mrf.mxu0 }
0x1d2f   : > { %v3092_v14 = vmul.f32 0.35355338, %v3081_v59 }
0x1d31   : > { %v3097_v15 = vsel %vm6200_vm3, %v3092_v14, -3.4028235e+38 }
0x1d32   : > { %v3106_v46 = vsel %vm1925_vm8, %v3097_v15, -inf }
0x1d33   : > { %3107 = vmax.xlane.f32.xlu0 %v3106_v46 }
0x1d36   : > { %v3084_v20 = vpop.f32.mrf.mxu0 }
0x1d37   : > { %v3093_v4 = vmul.f32 0.35355338, %v3084_v20 }
0x1d39   : > { %v3098_v33 = vsel %vm6201_vm4, %v3093_v4, -3.4028235e+38 }
0x1d3a   : > { %v3109_v12 = vsel %vm1925_vm8, %v3098_v33, -inf }
0x1d3b   : > { %3110 = vmax.xlane.f32.xlu1 %v3109_v12 }
0x1d3e   : > { %v3087_v37 = vpop.f32.mrf.mxu0 }
0x1d3f   : > { %v3094_v7 = vmul.f32 0.35355338, %v3087_v37 }
0x1d41   : > { %v3099_v26 = vsel %vm6202_vm10, %v3094_v7, -3.4028235e+38 }
0x1d42   : > { %v3112_v16 = vsel %vm6203_vm7, %v3099_v26, -inf }
0x1d43   : > { %3113 = vmax.xlane.f32.xlu2 %v3112_v16 }
0x1d5b   : > { %3225 = vrot.lane.b32.xlu2 %v2989_v62, %s4733_s12 }
0x1d96   : > { %v3102_v35 = vpop.xlane.xlu0 %3101 }
0x1d97   : > { %v3115_v36 = vsub.f32 %v3095_v23, %v3102_v35 }
0x1d99   : > { %v3120_v41 = vmul.f32 1.442695, %v3115_v36 }
0x1d9b   : > { %4607 = vpow2.f32 %v3120_v41 }
0x1d9e   : > { %v3105_v21 = vpop.xlane.xlu0 %3104 }
0x1d9f   : > { %v3116_v50 = vsub.f32 %v3096_v19, %v3105_v21 }
0x1da1   : > { %v5821_v55 = vpop.eup %4607  ;;  %v3122_v51 = vmul.f32 1.442695, %v3116_v50 }
0x1da2   : > { %v3130_v1 = vsel %vm1925_vm8, %v5821_v55, 0.0 }
0x1da3   : > { %4609 = vpow2.f32 %v3122_v51  ;;  %3131 = vadd.xlane.f32.xlu0 %v3130_v1 }
0x1da6   : > { %v3108_v44 = vpop.xlane.xlu0 %3107 }
0x1da7   : > { %v3117_v52 = vsub.f32 %v3097_v15, %v3108_v44 }
0x1da9   : > { %v5825_v45 = vpop.eup %4609  ;;  %v3124_v24 = vmul.f32 1.442695, %v3117_v52 }
0x1daa   : > { %v3133_v62 = vsel %vm1925_vm8, %v5825_v45, 0.0 }
0x1dab   : > { %4611 = vpow2.f32 %v3124_v24  ;;  %3134 = vadd.xlane.f32.xlu0 %v3133_v62 }
0x1dae   : > { %v3111_v13 = vpop.xlane.xlu1 %3110 }
0x1daf   : > { %v3118_v39 = vsub.f32 %v3098_v33, %v3111_v13 }
0x1db1   : > { %v5829_v49 = vpop.eup %4611  ;;  %v3126_v3 = vmul.f32 1.442695, %v3118_v39 }
0x1db2   : > { %v3136_v53 = vsel %vm1925_vm8, %v5829_v49, 0.0 }
0x1db3   : > { %4613 = vpow2.f32 %v3126_v3  ;;  %3137 = vadd.xlane.f32.xlu0 %v3136_v53 }
0x1db6   : > { %v3114_v38 = vpop.xlane.xlu2 %3113 }
0x1db7   : > { %v3119_v43 = vsub.f32 %v3099_v26, %v3114_v38 }
0x1db9   : > { %v5833_v28 = vpop.eup %4613  ;;  %v3128_v23 = vmul.f32 1.442695, %v3119_v43 }
0x1dba   : > { %v3139_v57 = vsel %vm1925_vm8, %v5833_v28, 0.0 }
0x1dbb   : > { %3140 = vadd.xlane.f32.xlu1 %v3139_v57  ;;  %4615 = vpow2.f32 %v3128_v23 }
0x1dbe   : > { %v3226_v53 = vpop.permute.xlu2 %3225 }
0x1dc1   : > { %v5839_v10 = vpop.eup %4615 }
0x1dc2   : > { %v3142_v6 = vsel %vm6204_vm11, %v5839_v10, 0.0  ;;  %vm6205_vm11 = vcmp.le.s32.totalorder %v4826_v48, %v4824_v47 }
0x1dc7   : > { %3227 = vrot.lane.b32.xlu0 %v5767_v58, %s4733_s12 }
0x1df1   : > { %3143 = vadd.xlane.f32.xlu0 %v3142_v6 }
0x1e16   : > { %v3132_v63 = vpop.xlane.xlu0 %3131 }
0x1e17   : > { %4617 = vrcp.f32 %v3132_v63  ;;  %v3156_v7 = vand.u32 2147483648, %v3132_v63  ;;  %vm3150_vm0 = vweird.f32 %v3132_v63  ;;  %v3154_v26 = vand.u32 2147483647, %v3132_v63 }
0x1e19   : > { %v3157_v41 = vor.u32 1.1754944e-38, %v3156_v7  ;;  %vm3155_vm3 = vcmp.eq.f32.partialorder %v3154_v26, 8.507059e+37 }
0x1e1d   : > { %v4618_v34 = vpop.eup %4617 }
0x1e1e   : > { %v3135_v19 = vpop.xlane.xlu0 %3134  ;;  %v3146_v59 = vmul.f32 %v4618_v34, %v3132_v63  ;;  %vm3151_vm5 = vweird.f32 %v4618_v34 }
0x1e1f   : > { %4619 = vrcp.f32 %v3135_v19  ;;  %vm3152_vm15 = vmor %vm3150_vm0, %vm3151_vm5  ;;  %v3170_v44 = vand.u32 2147483648, %v3135_v19  ;;  %vm3164_vm10 = vweird.f32 %v3135_v19  ;;  %v3168_v52 = vand.u32 2147483647, %v3135_v19 }
0x1e20   : > { %v3147_v14 = vsub.f32 1.0, %v3146_v59 }
0x1e21   : > { %v3171_v57 = vor.u32 1.1754944e-38, %v3170_v44  ;;  %vm3169_vm5 = vcmp.eq.f32.partialorder %v3168_v52, 8.507059e+37 }
0x1e22   : > { %v3148_v58 = vmul.f32 %v4618_v34, %v3147_v14 }
0x1e24   : > { %v3149_v4 = vadd.f32 %v4618_v34, %v3148_v58 }
0x1e25   : > { %v4620_v46 = vpop.eup %4619 }
0x1e26   : > { %v3138_v15 = vpop.xlane.xlu0 %3137  ;;  %v3160_v20 = vmul.f32 %v4620_v46, %v3135_v19  ;;  %v3153_v16 = vsel %vm3152_vm15, %v4618_v34, %v3149_v4  ;;  %vm3165_vm4 = vweird.f32 %v4620_v46 }
0x1e27   : > { %4621 = vrcp.f32 %v3138_v15  ;;  %v3158_v21 = vsel %vm3155_vm3, %v3157_v41, %v3153_v16  ;;  %vm3166_vm7 = vmor %vm3164_vm10, %vm3165_vm4  ;;  %v3184_v6 = vand.u32 2147483648, %v3138_v15  ;;  %vm3178_vm15 = vweird.f32 %v3138_v15 }
0x1e28   : > { %v3161_v33 = vsub.f32 1.0, %v3160_v20  ;;  %v3215_v24 = vmul.f32 %v5821_v55, %v3158_v21  ;;  %v3182_v63 = vand.u32 2147483647, %v3138_v15  ;;  %vm6206_vm4 = vcmp.le.s32.totalorder %v4826_v48, %v5423_v61 }
0x1e29   : > { %v3185_v14 = vor.u32 1.1754944e-38, %v3184_v6  ;;  %v4472_v6 = vld [vmem:[#allocation4 + $0x3c8] ss:$0 sm:$0xff] }
0x1e2a   : > { %v3162_v35 = vmul.f32 %v4620_v46, %v3161_v33  ;;  %v3220_v38 = vsel %vm6205_vm11, %v3215_v24, 0.0  ;;  %vm3183_vm10 = vcmp.eq.f32.partialorder %v3182_v63, 8.507059e+37 }
0x1e2c   : > { %v3163_v50 = vadd.f32 %v4620_v46, %v3162_v35 }
0x1e2d   : > { %v4622_v37 = vpop.eup %4621 }
0x1e2e   : > { %v3141_v12 = vpop.xlane.xlu1 %3140  ;;  %v3174_v36 = vmul.f32 %v4622_v37, %v3138_v15  ;;  %v3167_v3 = vsel %vm3166_vm7, %v4620_v46, %v3163_v50  ;;  %vm3179_vm0 = vweird.f32 %v4622_v37 }
0x1e2f   : > { %4623 = vrcp.f32 %v3141_v12  ;;  %v3172_v43 = vsel %vm3169_vm5, %v3171_v57, %v3167_v3  ;;  %vm3180_vm3 = vmor %vm3178_vm15, %vm3179_vm0  ;;  %v3198_v20 = vand.u32 2147483648, %v3141_v12  ;;  %vm3192_vm11 = vweird.f32 %v3141_v12  ;;  %v3310_v3 = vld [vmem:[#allocation4 + $0x3a8] sm:$0xff]  ;;  %v3436_v57 = vld [vmem:[#allocation4 + $0x418] sm:$0xff] }
0x1e30   : > { %v3175_v51 = vsub.f32 1.0, %v3174_v36  ;;  %v3216_v19 = vmul.f32 %v5825_v45, %v3172_v43  ;;  %v3196_v4 = vand.u32 2147483647, %v3141_v12  ;;  %vm6207_vm0 = vcmp.le.s32.totalorder %v4826_v48, %v5432_v0  ;;  %v3434_v43 = vld [vmem:[#allocation4 + $0x408] sm:$0xff] }
0x1e31   : > { %v3199_v33 = vor.u32 1.1754944e-38, %v3198_v20 }
0x1e32   : > { %v3176_v13 = vmul.f32 %v4622_v37, %v3175_v51  ;;  %v3221_v47 = vsel %vm6206_vm4, %v3216_v19, 0.0  ;;  %vm3197_vm15 = vcmp.eq.f32.partialorder %v3196_v4, 8.507059e+37 }
0x1e34   : > { %v3177_v23 = vadd.f32 %v4622_v37, %v3176_v13 }
0x1e35   : > { %v4624_v1 = vpop.eup %4623 }
0x1e36   : > { %v3188_v39 = vmul.f32 %v4624_v1, %v3141_v12  ;;  %v3181_v59 = vsel %vm3180_vm3, %v4622_v37, %v3177_v23  ;;  %vm3193_vm7 = vweird.f32 %v4624_v1  ;;  %vm6208_vm3 = vcmp.le.s32.totalorder %v4826_v48, %v5441_v60 }
0x1e37   : > { %v3186_v46 = vsel %vm3183_vm10, %v3185_v14, %v3181_v59  ;;  %vm3194_vm5 = vmor %vm3192_vm11, %vm3193_vm7 }
0x1e38   : > { %v3189_v55 = vsub.f32 1.0, %v3188_v39  ;;  %v3217_v15 = vmul.f32 %v5829_v49, %v3186_v46 }
0x1e39   : > { %v3228_v62 = vpop.permute.xlu0 %3227 }
0x1e3a   : > { %4343 = vmatpush.msk.msrb.mxu2 %vm1941_vm13, %v3228_v62  ;;  %v3190_v34 = vmul.f32 %v4624_v1, %v3189_v55  ;;  %v3222_v37 = vsel %vm6207_vm0, %v3217_v15, 0.0  ;;  %vm6210_vm0 = vcmp.eq.s32.totalorder %v4914_v9, 3 }
0x1e3c   : > { %3262 = vmatpush.msrb.mxu2 %v3226_v53  ;;  %v3191_v58 = vadd.f32 %v4624_v1, %v3190_v34  ;;  %v3437_v53 = vld [vmem:[#allocation4 + $0x420] sm:$0xff] }
0x1e3d   : > { %4344 = vmatmul.msk.f32.vlgmr.msrb.gmra.mxu2 %vm1925_vm8, %v3220_v38  ;;  %v3435_v38 = vld [vmem:[#allocation4 + $0x410] sm:$0xff] }
0x1e3e   : > { %v3195_v45 = vsel %vm3194_vm5, %v4624_v1, %v3191_v58  ;;  %vm6209_vm5 = vcmp.le.s32.totalorder %v4826_v48, %v5450_v22  ;;  %v3313_v48 = vld [vmem:[#allocation4 + $0x3c0] sm:$0xff]  ;;  %v3312_v22 = vld [vmem:[#allocation4 + $0x3b8] sm:$0xff]  ;;  %v4473_v58 = vld [vmem:[#allocation4 + $0x428] ss:$0 sm:$0xff] }
0x1e3f   : > { %v3200_v61 = vsel %vm3197_vm15, %v3199_v33, %v3195_v45  ;;  %vm6211_vm15 = vcmp.eq.s32.totalorder %v4914_v9, 0 }
0x1e40   : > { %v3218_v7 = vmul.f32 %v5833_v28, %v3200_v61 }
0x1e42   : > { %v3223_v26 = vsel %vm6208_vm3, %v3218_v7, 0.0  ;;  %vm6212_vm3 = vcmask 261120  }
0x1e45   : > { %4345 = vmatmul.msk.f32.gmra.mxu2 %vm1925_vm8, %v3221_v47 }
0x1e4d   : > { %4346 = vmatmul.msk.f32.gmra.mxu2 %vm1925_vm8, %v3222_v37 }
0x1e55   : > { %4347 = vmatmul.msk.f32.gmra.mxu2 %vm1925_vm8, %v3223_v26 }
0x1e64   : > { %v3144_v49 = vpop.xlane.xlu0 %3143 }
0x1e65   : > { %4625 = vrcp.f32 %v3144_v49  ;;  %v3212_v36 = vand.u32 2147483648, %v3144_v49  ;;  %v3210_v41 = vand.u32 2147483647, %v3144_v49  ;;  %vm3206_vm10 = vweird.f32 %v3144_v49 }
0x1e67   : > { %v3213_v50 = vor.u32 1.1754944e-38, %v3212_v36  ;;  %vm3211_vm11 = vcmp.eq.f32.partialorder %v3210_v41, 8.507059e+37  ;;  %v3400_v36 = vld [vmem:[#allocation4 + $0x3e8] sm:$0xff] }
0x1e6b   : > { %v4626_v12 = vpop.eup %4625 }
0x1e6c   : > { %v3202_v16 = vmul.f32 %v4626_v12, %v3144_v49  ;;  %vm3207_vm4 = vweird.f32 %v4626_v12 }
0x1e6d   : > { %vm3208_vm7 = vmor %vm3206_vm10, %vm3207_vm4 }
0x1e6e   : > { %v3203_v35 = vsub.f32 1.0, %v3202_v16  ;;  %vm6213_vm4 = vmmov %vm6212_vm3  ;;  %v3402_v16 = vld [vmem:[#allocation4 + $0x3f8] sm:$0xff] }
0x1e6f   : > { %vm6214_vm10 = vmmov %vm6212_vm3  ;;  %3423 = vmatpush.msra.mxu3 %v3402_v16 }
0x1e70   : > { %v3204_v0 = vmul.f32 %v4626_v12, %v3203_v35  ;;  %v3401_v35 = vld [vmem:[#allocation4 + $0x3f0] sm:$0xff] }
0x1e71   : > { %3424 = vmatpush.msra.mxu3 %v3401_v35 }
0x1e72   : > { %v3205_v21 = vadd.f32 %v4626_v12, %v3204_v0  ;;  %v3399_v0 = vld [vmem:[#allocation4 + $0x3e0] sm:$0xff] }
0x1e73   : > { %3425 = vmatpush.msra.mxu3 %v3400_v36 }
0x1e74   : > { %v3209_v28 = vsel %vm3208_vm7, %v4626_v12, %v3205_v21  ;;  %vm6215_vm7 = vmmov %vm6212_vm3 }
0x1e75   : > { %v3214_v51 = vsel %vm3211_vm11, %v3213_v50, %v3209_v28  ;;  %vm6216_vm11 = vmmov %vm6212_vm3  ;;  %3426 = vmatpush.msra.mxu3 %v3399_v0 }
0x1e76   : > { %v3219_v60 = vmul.f32 %v5839_v10, %v3214_v51  ;;  %v3311_v10 = vld [vmem:[#allocation4 + $0x3b0] sm:$0xff] }
0x1e78   : > { %v3224_v1 = vsel %vm6209_vm5, %v3219_v60, 0.0  ;;  %vm6217_vm5 = vcmask 253952  }
0x1e79   : > { %4348 = vmatmul.msk.f32.gmra.mxu2 %vm1925_vm8, %v3224_v1 }
0x1ec0   : > { %v3264_v44 = vpop.f32.mrf.mxu2 }
0x1ec8   : > { %v3267_v52 = vpop.f32.mrf.mxu2 }
0x1ed0   : > { %v3270_v24 = vpop.f32.mrf.mxu2 }
0x1ed8   : > { %v3273_v62 = vpop.f32.mrf.mxu2 }
0x1efc   : > { %v3276_v13 = vpop.f32.mrf.mxu2 }
0x1efd   : > { %v3283_v39 = vsel %vm6210_vm0, %v3276_v13, 0.0  ;;  %vm6218_vm0 = vmmov %vm6212_vm3 }
0x1efe   : > { %4349 = vmatpush.msk.msrb.mxu1 %vm2240_vm6, %v3283_v39 }
0x1f00   : > { %4350 = vmatpush.msk.msrb.mxu1 %vm5404_vm14, %v3273_v62 }
0x1f02   : > { %4351 = vmatpush.msk.msrb.mxu1 %vm5395_vm2, %v3270_v24 }
0x1f04   : > { %4352 = vmatpush.msk.msrb.mxu1 %vm5385_vm9, %v3267_v52 }
0x1f06   : > { %4353 = vmatpush.msk.msrb.mxu1 %vm6211_vm15, %v3264_v44  ;;  %vm6219_vm15 = vmmov %vm6218_vm0 }
0x1f07   : > { %4354 = vmatmul.msk.f32.vlgmr.msrb.gmra.mxu1 %vm2233_vm1, %v5553_v40 }
0x1f08   : > { %3334 = vmatpush.msra.mxu1 %v3313_v48 }
0x1f0a   : > { %3335 = vmatpush.msra.mxu1 %v3312_v22 }
0x1f0c   : > { %3336 = vmatpush.msra.mxu1 %v3311_v10  ;;  %v4474_v10 = vld [vmem:[#allocation4 + $0x3d0] ss:$0 sm:$0xff] }
0x1f0e   : > { %3337 = vmatpush.msra.mxu1 %v3310_v3 }
0x1f0f   : > { %4355 = vmatmul.msk.f32.gmra.mxu1 %vm2233_vm1, %v5561_v32 }
0x1f10   : > { %3452 = vmatpush.msrb.mxu1 %v3437_v53 }
0x1f12   : > { %3453 = vmatpush.msrb.mxu1 %v3436_v57  ;;  %v4475_v57 = vld [vmem:[#allocation4 + $0x3d8] ss:$0 sm:$0xff] }
0x1f14   : > { %3454 = vmatpush.msrb.mxu1 %v3435_v38 }
0x1f16   : > { %3455 = vmatpush.msrb.mxu1 %v3434_v43 }
0x1f84   : > { %v3304_v23 = vpop.f32.mrf.mxu1 }
0x1f85   : > { %4356 = vmatmul.msk.f32.vlgmr.msra.gmra.mxu1 %vm6212_vm3, %v3304_v23  ;;  %vm6220_vm3 = vmmov %vm6218_vm0 }
0x1f8c   : > { %v3307_v55 = vpop.f32.mrf.mxu1 }
0x1f8d   : > { %4357 = vmatmul.msk.f32.gmra.mxu1 %vm6213_vm4, %v3307_v55  ;;  %vm6221_vm4 = vmmov %vm6217_vm5 }
0x1f95   : > { %4360 = vmatmul.msk.f32.vlgmr.msrb.gmra.mxu1 %vm6214_vm10, %v5609_v56  ;;  %vm6222_vm10 = vcmask 1041408  }
0x1f9d   : > { %4361 = vmatmul.msk.f32.gmra.mxu1 %vm6215_vm7, %v5614_v25 }
0x2002   : > { %v3339_v63 = vpop.f32.mrf.mxu1 }
0x2003   : > { %v3340_v19 = vadd.f32 %v4472_v6, %v3339_v63 }
0x2005   : > { %v5891_v34 = vadd.f32 %v3340_v19, %v5747_v42 }
0x2007   : > { %v3347_v59 = vsel %vm6216_vm11, %v5891_v34, 0.0 }
0x2008   : > { %3348 = vadd.xlane.f32.xlu1 %v3347_v59 }
0x200a   : > { %v3342_v14 = vpop.f32.mrf.mxu1 }
0x200b   : > { %v3343_v47 = vadd.f32 %v4472_v6, %v3342_v14 }
0x200d   : > { %v5896_v46 = vadd.f32 %v3343_v47, %v5752_v5 }
0x200f   : > { %v3350_v56 = vsel %vm6217_vm5, %v5896_v46, 0.0 }
0x2010   : > { %3351 = vadd.xlane.f32.xlu1 %v3350_v56 }
0x2012   : > { %v3457_v25 = vpop.f32.mrf.mxu1 }
0x2013   : > { %v5901_v42 = vadd.f32 %v4473_v58, %v3457_v25  ;;  %v4476_v25 = vld [vmem:[#allocation4 + $0x400] ss:$0 sm:$0xff] }
0x201a   : > { %v3460_v20 = vpop.f32.mrf.mxu1 }
0x201b   : > { %v3461_v4 = vadd.f32 %v4473_v58, %v3460_v20 }
0x201d   : > { %4368 = vmatpush.xpose.msk.msra.mxu2 %vm6218_vm0, %v3461_v4 }
0x2021   : > { %4369 = vmatpush.xpose.msk.msra.mxu2 %vm6219_vm15, %v5901_v42 }
0x207b   : > { %v3349_v15 = vpop.xlane.xlu1 %3348 }
0x207c   : > { %v3353_v45 = vmul.f32 %v3349_v15, %v4794_v17 }
0x207e   : > { %v3355_v5 = vsub.f32 %v5891_v34, %v3353_v45 }
0x2080   : > { %v3357_v33 = vmul.f32 %v3355_v5, %v3355_v5 }
0x2082   : > { %v3359_v37 = vsel %vm6220_vm3, %v3357_v33, 0.0 }
0x2083   : > { %3360 = vadd.xlane.f32.xlu2 %v3359_v37  ;;  %v3352_v61 = vpop.xlane.xlu1 %3351 }
0x2084   : > { %v3354_v7 = vmul.f32 %v3352_v61, %v4794_v17 }
0x2086   : > { %v3356_v26 = vsub.f32 %v5896_v46, %v3354_v7 }
0x2088   : > { %v3358_v49 = vmul.f32 %v3356_v26, %v3356_v26 }
0x208a   : > { %v3362_v12 = vsel %vm6221_vm4, %v3358_v49, 0.0  ;;  %vm6223_vm4 = vcmask 261120  }
0x208b   : > { %3363 = vadd.xlane.f32.xlu1 %v3362_v12 }
0x209b   : > { %3693 = vrot.lane.b32.xlu2 %v3461_v4, %s4730_s10 }
0x20f6   : > { %v3361_v41 = vpop.xlane.xlu2 %3360 }
0x20f7   : > { %v3365_v21 = vmul.f32 %v3361_v41, %v4794_v17 }
0x20f9   : > { %v3367_v50 = vadd.f32 1e-12, %v3365_v21 }
0x20fb   : > { %4627 = vrsqrt.f32 %v3367_v50  ;;  %vm3375_vm11 = vweird.f32 %v3367_v50 }
0x20fe   : > { %v3694_v28 = vpop.permute.xlu2 %3693  ;;  %v3364_v51 = vpop.xlane.xlu1 %3363 }
0x20ff   : > { %v3366_v60 = vmul.f32 %v3364_v51, %v4794_v17  ;;  %4375 = vmatpush.msk.msrb.mxu3 %vm6222_vm10, %v3694_v28  ;;  %vm6224_vm10 = vmmov %vm6223_vm4 }
0x2101   : > { %v4628_v1 = vpop.eup %4627  ;;  %v3368_v44 = vadd.f32 1e-12, %v3366_v60 }
0x2102   : > { %v3370_v52 = vmul.f32 %v4628_v1, %v3367_v50  ;;  %vm3376_vm7 = vweird.f32 %v4628_v1 }
0x2103   : > { %4629 = vrsqrt.f32 %v3368_v44  ;;  %vm3377_vm5 = vmor %vm3375_vm11, %vm3376_vm7  ;;  %vm3385_vm15 = vweird.f32 %v3368_v44  ;;  %vm6225_vm7 = vcmp.eq.s32.totalorder %v4914_v9, 0 }
0x2104   : > { %v3371_v24 = vmul.f32 %v4628_v1, %v3370_v52  ;;  %vm6227_vm11 = vmmov %vm6223_vm4 }
0x2106   : > { %v3372_v62 = vmul.f32 0.5, %v3371_v24 }
0x2108   : > { %v3373_v13 = vsub.f32 1.5, %v3372_v62 }
0x2109   : > { %v4630_v39 = vpop.eup %4629 }
0x210a   : > { %v3374_v48 = vmul.f32 %v4628_v1, %v3373_v13  ;;  %v3380_v22 = vmul.f32 %v4630_v39, %v3368_v44  ;;  %vm3386_vm0 = vweird.f32 %v4630_v39 }
0x210b   : > { %vm3387_vm3 = vmor %vm3385_vm15, %vm3386_vm0  ;;  %vm6230_vm0 = vcmp.eq.s32.totalorder %v4914_v9, 3 }
0x210c   : > { %v3378_v3 = vsel %vm3377_vm5, %v4628_v1, %v3374_v48  ;;  %v3381_v53 = vmul.f32 %v4630_v39, %v3380_v22  ;;  %vm6228_vm5 = vmmov %vm6223_vm4 }
0x210d   : > { %v3389_v38 = vmul.f32 %v3378_v3, %v3355_v5  ;;  %vm6231_vm15 = vmmov %vm6223_vm4 }
0x210e   : > { %v3382_v43 = vmul.f32 0.5, %v3381_v53 }
0x210f   : > { %v3393_v23 = vmul.f32 %v4474_v10, %v3389_v38 }
0x2110   : > { %v3383_v55 = vsub.f32 1.5, %v3382_v43 }
0x2111   : > { %v3397_v6 = vadd.f32 %v4475_v57, %v3393_v23 }
0x2112   : > { %v3384_v63 = vmul.f32 %v4630_v39, %v3383_v55 }
0x2113   : > { %4358 = vmatmul.msk.f32.vlgmr.msra.gmra.mxu3 %vm6223_vm4, %v3397_v6 }
0x2114   : > { %v3388_v19 = vsel %vm3387_vm3, %v4630_v39, %v3384_v63  ;;  %vm6232_vm3 = vcmask 80896  }
0x2115   : > { %v3390_v59 = vmul.f32 %v3388_v19, %v3356_v26 }
0x2117   : > { %v3394_v14 = vmul.f32 %v4474_v10, %v3390_v59 }
0x2119   : > { %v3398_v47 = vadd.f32 %v4475_v57, %v3394_v14 }
0x211b   : > { %4359 = vmatmul.msk.f32.gmra.mxu3 %vm6224_vm10, %v3398_v47  ;;  %vm6234_vm10 = vmmov %vm6232_vm3 }
0x2196   : > { %v3428_v56 = vpop.f32.mrf.mxu3 }
0x2197   : > { %v3429_v4 = vadd.f32 %v4476_v25, %v3428_v56 }
0x219e   : > { %v3431_v58 = vpop.f32.mrf.mxu3 }
0x219f   : > { %v3432_v20 = vadd.f32 %v4476_v25, %v3431_v58 }
0x21a1   : > { %4362 = vmatpush.msk.msra.mxu0 %vm1941_vm13, %v3432_v20  ;;  %vm6226_vm13 = vmmov %vm6223_vm4 }
0x21a3   : > { %3481 = vmatpush.msra.mxu0 %v3429_v4 }
0x21a4   : > { %4363 = vmatmul.msk.f32.vlgmr.msra.gmra.mxu0 %vm1925_vm8, %v4841_v54 }
0x21ac   : > { %4364 = vmatmul.msk.f32.gmra.mxu0 %vm1925_vm8, %v5324_v2 }
0x21b4   : > { %4365 = vmatmul.msk.f32.gmra.mxu0 %vm1925_vm8, %v5346_v29 }
0x21bc   : > { %4366 = vmatmul.msk.f32.gmra.mxu0 %vm1925_vm8, %v5359_v30 }
0x21c4   : > { %4367 = vmatmul.msk.f32.gmra.mxu0 %vm1925_vm8, %v5365_v11  ;;  %vm6229_vm8 = vmmov %vm6223_vm4 }
0x21c5   : > { %vm6233_vm4 = vmmov %vm6232_vm3 }
0x2221   : > { %v3483_v15 = vpop.f32.mrf.mxu0 }
0x2222   : > { %v3498_v45 = vsel %vm6225_vm7, %v3483_v15, 0.0  ;;  %vm6235_vm7 = vmmov %vm6232_vm3 }
0x2223   : > { %4370 = vmatmul.msk.f32.vlgmr.msra.gmra.mxu2 %vm6226_vm13, %v3498_v45  ;;  %vm6236_vm13 = vcmask 76800  }
0x2229   : > { %v3486_v5 = vpop.f32.mrf.mxu0 }
0x222a   : > { %v3499_v54 = vsel %vm5385_vm9, %v3486_v5, 0.0 }
0x222b   : > { %4371 = vmatmul.msk.f32.gmra.mxu2 %vm6227_vm11, %v3499_v54  ;;  %vm6237_vm11 = vmmov %vm6232_vm3 }
0x2231   : > { %v3489_v2 = vpop.f32.mrf.mxu0 }
0x2232   : > { %v3500_v29 = vsel %vm5395_vm2, %v3489_v2, 0.0 }
0x2233   : > { %4372 = vmatmul.msk.f32.gmra.mxu2 %vm6228_vm5, %v3500_v29  ;;  %vm6238_vm5 = vmmov %vm6232_vm3 }
0x2239   : > { %v3492_v30 = vpop.f32.mrf.mxu0 }
0x223a   : > { %v3501_v11 = vsel %vm5404_vm14, %v3492_v30, 0.0 }
0x223b   : > { %4373 = vmatmul.msk.f32.gmra.mxu2 %vm6229_vm8, %v3501_v11  ;;  %vm6239_vm8 = vmmov %vm6232_vm3 }
0x2241   : > { %v3495_v33 = vpop.f32.mrf.mxu0 }
0x2242   : > { %v3502_v37 = vsel %vm6230_vm0, %v3495_v33, 0.0  ;;  %vm6240_vm0 = vmmov %vm6232_vm3 }
0x2243   : > { %4374 = vmatmul.msk.f32.gmra.mxu2 %vm6231_vm15, %v3502_v37  ;;  %vm6241_vm15 = vmmov %vm6236_vm13 }
0x22a6   : > { %v3541_v61 = vpop.f32.mrf.mxu2 }
0x22a7   : > { %v3556_v7 = vmul.f32 0.35355338, %v3541_v61 }
0x22a9   : > { %v3561_v26 = vsel %vm4956_vm12, %v3556_v7, -3.4028235e+38 }
0x22aa   : > { %v3566_v49 = vsel %vm6232_vm3, %v3561_v26, -inf }
0x22ab   : > { %3567 = vmax.xlane.f32.xlu1 %v3566_v49 }
0x22ae   : > { %v3544_v12 = vpop.f32.mrf.mxu2 }
0x22af   : > { %v3557_v16 = vmul.f32 0.35355338, %v3544_v12 }
0x22b1   : > { %v3562_v35 = vsel %vm4956_vm12, %v3557_v16, -3.4028235e+38 }
0x22b2   : > { %v3569_v36 = vsel %vm6233_vm4, %v3562_v35, -inf }
0x22b3   : > { %3570 = vmax.xlane.f32.xlu1 %v3569_v36 }
0x22b6   : > { %v3547_v0 = vpop.f32.mrf.mxu2 }
0x22b7   : > { %v3558_v41 = vmul.f32 0.35355338, %v3547_v0 }
0x22b9   : > { %v3563_v21 = vsel %vm4956_vm12, %v3558_v41, -3.4028235e+38 }
0x22ba   : > { %v3572_v50 = vsel %vm6234_vm10, %v3563_v21, -inf }
0x22bb   : > { %3573 = vmax.xlane.f32.xlu0 %v3572_v50 }
0x22be   : > { %v3550_v28 = vpop.f32.mrf.mxu2 }
0x22bf   : > { %v3559_v51 = vmul.f32 0.35355338, %v3550_v28 }
0x22c1   : > { %v3564_v60 = vsel %vm4956_vm12, %v3559_v51, -3.4028235e+38 }
0x22c2   : > { %v3575_v1 = vsel %vm6235_vm7, %v3564_v60, -inf }
0x22c3   : > { %3576 = vmax.xlane.f32.xlu1 %v3575_v1 }
0x22c6   : > { %v3553_v44 = vpop.f32.mrf.mxu2 }
0x22c7   : > { %v3560_v52 = vmul.f32 0.35355338, %v3553_v44 }
0x22c9   : > { %v3565_v24 = vsel %vm4956_vm12, %v3560_v52, -3.4028235e+38 }
0x22ca   : > { %v3578_v62 = vsel %vm6236_vm13, %v3565_v24, -inf }
0x22cb   : > { %3579 = vmax.xlane.f32.xlu0 %v3578_v62 }
0x231e   : > { %v3568_v13 = vpop.xlane.xlu1 %3567 }
0x231f   : > { %v3581_v39 = vsub.f32 %v3561_v26, %v3568_v13 }
0x2321   : > { %v3586_v48 = vmul.f32 1.442695, %v3581_v39 }
0x2323   : > { %4631 = vpow2.f32 %v3586_v48 }
0x2326   : > { %v3571_v22 = vpop.xlane.xlu1 %3570 }
0x2327   : > { %v3582_v10 = vsub.f32 %v3562_v35, %v3571_v22 }
0x2329   : > { %v4632_v3 = vpop.eup %4631  ;;  %v3588_v53 = vmul.f32 1.442695, %v3582_v10 }
0x232a   : > { %v3596_v57 = vsel %vm6237_vm11, %v4632_v3, 0.0 }
0x232b   : > { %4633 = vpow2.f32 %v3588_v53  ;;  %3597 = vadd.xlane.f32.xlu1 %v3596_v57 }
0x232e   : > { %v3574_v38 = vpop.xlane.xlu0 %3573 }
0x232f   : > { %v3583_v43 = vsub.f32 %v3563_v21, %v3574_v38 }
0x2331   : > { %v5959_v23 = vpop.eup %4633  ;;  %v3590_v55 = vmul.f32 1.442695, %v3583_v43 }
0x2332   : > { %v3599_v6 = vsel %vm6238_vm5, %v5959_v23, 0.0 }
0x2333   : > { %4635 = vpow2.f32 %v3590_v55  ;;  %3600 = vadd.xlane.f32.xlu0 %v3599_v6 }
0x2336   : > { %v3577_v63 = vpop.xlane.xlu1 %3576 }
0x2337   : > { %v3584_v19 = vsub.f32 %v3564_v60, %v3577_v63 }
0x2339   : > { %v5963_v59 = vpop.eup %4635  ;;  %v3592_v14 = vmul.f32 1.442695, %v3584_v19 }
0x233a   : > { %v3602_v47 = vsel %vm6239_vm8, %v5963_v59, 0.0 }
0x233b   : > { %4637 = vpow2.f32 %v3592_v14  ;;  %3603 = vadd.xlane.f32.xlu1 %v3602_v47 }
0x233e   : > { %v3580_v56 = vpop.xlane.xlu0 %3579 }
0x233f   : > { %v3585_v25 = vsub.f32 %v3565_v24, %v3580_v56 }
0x2341   : > { %v5967_v58 = vpop.eup %4637  ;;  %v3594_v20 = vmul.f32 1.442695, %v3585_v25 }
0x2342   : > { %v3605_v4 = vsel %vm6240_vm0, %v5967_v58, 0.0 }
0x2343   : > { %4639 = vpow2.f32 %v3594_v20  ;;  %3606 = vadd.xlane.f32.xlu1 %v3605_v4 }
0x2347   : > { %3691 = vrot.lane.b32.xlu0 %v5901_v42, %s4730_s10 }
0x2349   : > { %v5973_v15 = vpop.eup %4639 }
0x234a   : > { %v3608_v45 = vsel %vm6241_vm15, %v5973_v15, 0.0 }
0x234b   : > { %3609 = vadd.xlane.f32.xlu1 %v3608_v45 }
0x239e   : > { %v3598_v5 = vpop.xlane.xlu1 %3597 }
0x239f   : > { %4641 = vrcp.f32 %v3598_v5  ;;  %v3622_v61 = vand.u32 2147483648, %v3598_v5  ;;  %vm3616_vm4 = vweird.f32 %v3598_v5  ;;  %v3620_v42 = vand.u32 2147483647, %v3598_v5 }
0x23a1   : > { %v3623_v16 = vor.u32 1.1754944e-38, %v3622_v61  ;;  %vm3621_vm7 = vcmp.eq.f32.partialorder %v3620_v42, 8.507059e+37 }
0x23a5   : > { %v4642_v54 = vpop.eup %4641 }
0x23a6   : > { %v3612_v2 = vmul.f32 %v4642_v54, %v3598_v5  ;;  %v3601_v29 = vpop.xlane.xlu0 %3600  ;;  %vm3617_vm3 = vweird.f32 %v4642_v54 }
0x23a7   : > { %4643 = vrcp.f32 %v3601_v29  ;;  %vm3618_vm10 = vmor %vm3616_vm4, %vm3617_vm3  ;;  %v3636_v21 = vand.u32 2147483648, %v3601_v29  ;;  %vm3630_vm11 = vweird.f32 %v3601_v29  ;;  %v3634_v50 = vand.u32 2147483647, %v3601_v29 }
0x23a8   : > { %v3613_v30 = vsub.f32 1.0, %v3612_v2 }
0x23a9   : > { %v3637_v52 = vor.u32 1.1754944e-38, %v3636_v21  ;;  %vm3635_vm8 = vcmp.eq.f32.partialorder %v3634_v50, 8.507059e+37  ;;  %v3777_v21 = vld [vmem:[#allocation4 + $0x438] sm:$0xff] }
0x23aa   : > { %v3614_v11 = vmul.f32 %v4642_v54, %v3613_v30 }
0x23ac   : > { %v3615_v33 = vadd.f32 %v4642_v54, %v3614_v11 }
0x23ad   : > { %v4644_v37 = vpop.eup %4643 }
0x23ae   : > { %v3626_v7 = vmul.f32 %v4644_v37, %v3601_v29  ;;  %v3604_v26 = vpop.xlane.xlu1 %3603  ;;  %v3619_v49 = vsel %vm3618_vm10, %v4642_v54, %v3615_v33  ;;  %vm3631_vm13 = vweird.f32 %v4644_v37 }
0x23af   : > { %4645 = vrcp.f32 %v3604_v26  ;;  %v3624_v36 = vsel %vm3621_vm7, %v3623_v16, %v3619_v49  ;;  %vm3632_vm5 = vmor %vm3630_vm11, %vm3631_vm13  ;;  %v3650_v10 = vand.u32 2147483648, %v3604_v26  ;;  %vm3644_vm3 = vweird.f32 %v3604_v26 }
0x23b0   : > { %v3627_v12 = vsub.f32 1.0, %v3626_v7  ;;  %v3681_v60 = vmul.f32 %v4632_v3, %v3624_v36  ;;  %v3648_v3 = vand.u32 2147483647, %v3604_v26  ;;  %vm6242_vm7 = vmmov %vm6240_vm0 }
0x23b1   : > { %v3651_v6 = vor.u32 1.1754944e-38, %v3650_v10 }
0x23b2   : > { %v3628_v35 = vmul.f32 %v4644_v37, %v3627_v12  ;;  %v3686_v13 = vsel %vm4956_vm12, %v3681_v60, 0.0  ;;  %vm3649_vm10 = vcmp.eq.f32.partialorder %v3648_v3, 8.507059e+37  ;;  %v3868_v3 = vld [vmem:[#allocation4 + $0x480] sm:$0xff] }
0x23b3   : > { %3889 = vmatpush.msrb.mxu0 %v3868_v3 }
0x23b4   : > { %v3629_v0 = vadd.f32 %v4644_v37, %v3628_v35 }
0x23b5   : > { %v4646_v41 = vpop.eup %4645 }
0x23b6   : > { %v3640_v28 = vmul.f32 %v4646_v41, %v3604_v26  ;;  %v3607_v51 = vpop.xlane.xlu1 %3606  ;;  %v3633_v44 = vsel %vm3632_vm5, %v4644_v37, %v3629_v0  ;;  %vm3645_vm15 = vweird.f32 %v4646_v41 }
0x23b7   : > { %4647 = vrcp.f32 %v3607_v51  ;;  %v3638_v39 = vsel %vm3635_vm8, %v3637_v52, %v3633_v44  ;;  %vm3646_vm4 = vmor %vm3644_vm3, %vm3645_vm15  ;;  %v3664_v25 = vand.u32 2147483648, %v3607_v51  ;;  %vm3658_vm11 = vweird.f32 %v3607_v51 }
0x23b8   : > { %v3641_v1 = vsub.f32 1.0, %v3640_v28  ;;  %v3682_v38 = vmul.f32 %v5959_v23, %v3638_v39  ;;  %v3662_v20 = vand.u32 2147483647, %v3607_v51 }
0x23b9   : > { %v3692_v24 = vpop.permute.xlu0 %3691  ;;  %v3665_v54 = vor.u32 1.1754944e-38, %v3664_v25  ;;  %v3906_v25 = vld [vmem:[#allocation4 + $0x4b0] sm:$0xff] }
0x23ba   : > { %v3642_v62 = vmul.f32 %v4646_v41, %v3641_v1  ;;  %3728 = vmatpush.msrb.mxu3 %v3692_v24  ;;  %v3687_v19 = vsel %vm4956_vm12, %v3682_v38, 0.0  ;;  %vm3663_vm8 = vcmp.eq.f32.partialorder %v3662_v20, 8.507059e+37  ;;  %v3865_v38 = vld [vmem:[#allocation4 + $0x468] sm:$0xff] }
0x23bb   : > { %4376 = vmatmul.msk.f32.vlgmr.msrb.gmra.mxu3 %vm6240_vm0, %v3686_v13 }
0x23bc   : > { %v3643_v48 = vadd.f32 %v4646_v41, %v3642_v62 }
0x23bd   : > { %v4648_v22 = vpop.eup %4647 }
0x23be   : > { %v3654_v53 = vmul.f32 %v4648_v22, %v3607_v51  ;;  %v3610_v57 = vpop.xlane.xlu1 %3609  ;;  %v3647_v55 = vsel %vm3646_vm4, %v4646_v41, %v3643_v48  ;;  %vm3659_vm13 = vweird.f32 %v4648_v22 }
0x23bf   : > { %4649 = vrcp.f32 %v3610_v57  ;;  %v3652_v14 = vsel %vm3649_vm10, %v3651_v6, %v3647_v55  ;;  %vm3660_vm5 = vmor %vm3658_vm11, %vm3659_vm13  ;;  %v3678_v33 = vand.u32 2147483648, %v3610_v57  ;;  %vm3672_vm3 = vweird.f32 %v3610_v57 }
0x23c0   : > { %v3655_v43 = vsub.f32 1.0, %v3654_v53  ;;  %v3683_v4 = vmul.f32 %v5963_v59, %v3652_v14  ;;  %v3676_v37 = vand.u32 2147483647, %v3610_v57  ;;  %vm6244_vm13 = vmmov %vm6240_vm0  ;;  %vm6245_vm11 = vcmp.eq.s32.totalorder %v4914_v9, 3  ;;  %v3867_v53 = vld [vmem:[#allocation4 + $0x478] sm:$0xff] }
0x23c1   : > { %v3679_v42 = vor.u32 1.1754944e-38, %v3678_v33  ;;  %3890 = vmatpush.msrb.mxu0 %v3867_v53  ;;  %v3907_v14 = vld [vmem:[#allocation4 + $0x4b8] sm:$0xff] }
0x23c2   : > { %v3656_v63 = vmul.f32 %v4648_v22, %v3655_v43  ;;  %v3688_v29 = vsel %vm4956_vm12, %v3683_v4, 0.0  ;;  %vm3677_vm10 = vcmp.eq.f32.partialorder %v3676_v37, 8.507059e+37  ;;  %v3905_v4 = vld [vmem:[#allocation4 + $0x4a8] sm:$0xff]  ;;  %v4478_v33 = vld [vmem:[#allocation4 + $0x458] ss:$0 sm:$0xff] }
0x23c3   : > { %4377 = vmatmul.msk.f32.gmra.mxu3 %vm6242_vm7, %v3687_v19  ;;  %vm6243_vm7 = vmmov %vm6240_vm0  ;;  %v3908_v19 = vld [vmem:[#allocation4 + $0x4c0] sm:$0xff] }
0x23c4   : > { %v3657_v47 = vadd.f32 %v4648_v22, %v3656_v63  ;;  %v3909_v63 = vld [vmem:[#allocation4 + $0x4c8] sm:$0xff] }
0x23c5   : > { %v4650_v56 = vpop.eup %4649  ;;  %3926 = vmatpush.msrb.mxu2 %v3909_v63 }
0x23c6   : > { %v3668_v23 = vmul.f32 %v4650_v56, %v3610_v57  ;;  %v3661_v5 = vsel %vm3660_vm5, %v4648_v22, %v3657_v47  ;;  %vm3673_vm15 = vweird.f32 %v4650_v56  ;;  %v3866_v57 = vld [vmem:[#allocation4 + $0x470] sm:$0xff] }
0x23c7   : > { %v3666_v30 = vsel %vm3663_vm8, %v3665_v54, %v3661_v5  ;;  %vm3674_vm4 = vmor %vm3672_vm3, %vm3673_vm15  ;;  %3891 = vmatpush.msrb.mxu0 %v3866_v57  ;;  %3927 = vmatpush.msrb.mxu2 %v3908_v19 }
0x23c8   : > { %v3669_v45 = vsub.f32 1.0, %v3668_v23  ;;  %v3684_v61 = vmul.f32 %v5967_v58, %v3666_v30 }
0x23c9   : > { %3892 = vmatpush.msrb.mxu0 %v3865_v38  ;;  %3928 = vmatpush.msrb.mxu2 %v3907_v14 }
0x23ca   : > { %v3670_v2 = vmul.f32 %v4650_v56, %v3669_v45  ;;  %v3689_v7 = vsel %vm4956_vm12, %v3684_v61, 0.0 }
0x23cb   : > { %4378 = vmatmul.msk.f32.gmra.mxu3 %vm6240_vm0, %v3688_v29  ;;  %3929 = vmatpush.msrb.mxu2 %v3906_v25 }
0x23cc   : > { %v3671_v11 = vadd.f32 %v4650_v56, %v3670_v2 }
0x23cd   : > { %3930 = vmatpush.msrb.mxu2 %v3905_v4 }
0x23ce   : > { %v3675_v59 = vsel %vm3674_vm4, %v4650_v56, %v3671_v11 }
0x23cf   : > { %v3680_v26 = vsel %vm3677_vm10, %v3679_v42, %v3675_v59  ;;  %v4479_v59 = vld [vmem:[#allocation4 + $0x460] ss:$0 sm:$0xff] }
0x23d0   : > { %v3685_v49 = vmul.f32 %v5973_v15, %v3680_v26  ;;  %v3778_v15 = vld [vmem:[#allocation4 + $0x440] sm:$0xff] }
0x23d2   : > { %v3690_v12 = vsel %vm4956_vm12, %v3685_v49, 0.0  ;;  %vm6246_vm12 = vcmp.eq.s32.totalorder %v4914_v9, 0  ;;  %v4477_v9 = vld [vmem:[#allocation4 + $0x450] ss:$0 sm:$0xff] }
0x23d3   : > { %4379 = vmatmul.msk.f32.gmra.mxu3 %vm6243_vm7, %v3689_v7 }
0x23db   : > { %4380 = vmatmul.msk.f32.gmra.mxu3 %vm6244_vm13, %v3690_v12 }
0x243e   : > { %v3730_v16 = vpop.f32.mrf.mxu3 }
0x2446   : > { %v3733_v35 = vpop.f32.mrf.mxu3 }
0x244e   : > { %v3736_v58 = vpop.f32.mrf.mxu3 }
0x2456   : > { %v3739_v36 = vpop.f32.mrf.mxu3 }
0x245e   : > { %v3742_v0 = vpop.f32.mrf.mxu3 }
0x245f   : > { %v3749_v41 = vsel %vm6245_vm11, %v3742_v0, 0.0  ;;  %vm6255_vm11 = vcmask 523264  }
0x2460   : > { %4381 = vmatpush.msk.msra.mxu1 %vm2240_vm6, %v3749_v41  ;;  %vm6250_vm6 = vcmask 253952   ;;  %v3904_v41 = vld [vmem:[#allocation4 + $0x4a0] sm:$0xff] }
0x2461   : > { %vm6252_vm5 = vmmov %vm6250_vm6  ;;  %3931 = vmatpush.msrb.mxu2 %v3904_v41 }
0x2462   : > { %4382 = vmatpush.msk.msra.mxu1 %vm5404_vm14, %v3739_v36 }
0x2464   : > { %4383 = vmatpush.msk.msra.mxu1 %vm5395_vm2, %v3736_v58  ;;  %vm6247_vm2 = vcmask 261120  }
0x2465   : > { %vm6249_vm14 = vmmov %vm6247_vm2 }
0x2466   : > { %4384 = vmatpush.msk.msra.mxu1 %vm5385_vm9, %v3733_v35  ;;  %vm6248_vm9 = vmmov %vm6247_vm2 }
0x2468   : > { %4385 = vmatpush.msk.msra.mxu1 %vm6246_vm12, %v3730_v16  ;;  %vm6256_vm12 = vmmov %vm6255_vm11 }
0x2469   : > { %4386 = vmatmul.msk.f32.vlgmr.msra.gmra.mxu1 %vm2233_vm1, %v5553_v40 }
0x246a   : > { %3800 = vmatpush.msrb.mxu1 %v3779_v31  ;;  %v3903_v31 = vld [vmem:[#allocation4 + $0x498] sm:$0xff] }
0x246b   : > { %3932 = vmatpush.msrb.mxu2 %v3903_v31 }
0x246c   : > { %3801 = vmatpush.msrb.mxu1 %v3778_v15  ;;  %v3902_v15 = vld [vmem:[#allocation4 + $0x490] sm:$0xff] }
0x246d   : > { %3933 = vmatpush.msrb.mxu2 %v3902_v15 }
0x246e   : > { %3802 = vmatpush.msrb.mxu1 %v3777_v21  ;;  %v4480_v21 = vld [vmem:[#allocation4 + $0x488] ss:$0 sm:$0xff] }
0x2470   : > { %3803 = vmatpush.msrb.mxu1 %v3776_v8 }
0x2471   : > { %4387 = vmatmul.msk.f32.gmra.mxu1 %vm2233_vm1, %v5561_v32  ;;  %vm6251_vm1 = vmmov %vm6247_vm2 }
0x2472   : > { %vm6253_vm7 = vmmov %vm6251_vm1 }
0x2473   : > { %vm6254_vm13 = vmmov %vm6251_vm1 }
0x24e6   : > { %v3770_v18 = vpop.f32.mrf.mxu1 }
0x24e7   : > { %4388 = vmatmul.msk.f32.vlgmr.msrb.gmra.mxu1 %vm6247_vm2, %v3770_v18  ;;  %vm6257_vm2 = vmmov %vm6251_vm1 }
0x24ee   : > { %v3773_v27 = vpop.f32.mrf.mxu1 }
0x24ef   : > { %4389 = vmatmul.msk.f32.gmra.mxu1 %vm6248_vm9, %v3773_v27  ;;  %vm6258_vm9 = vmmov %vm6252_vm5 }
0x2564   : > { %v3805_v50 = vpop.f32.mrf.mxu1 }
0x2565   : > { %v3806_v28 = vadd.f32 %v4477_v9, %v3805_v50 }
0x2567   : > { %v6014_v40 = vadd.f32 %v3806_v28, %v5891_v34 }
0x2569   : > { %v3813_v51 = vsel %vm6249_vm14, %v6014_v40, 0.0  ;;  %vm6259_vm14 = vmmov %vm6251_vm1 }
0x256a   : > { %3814 = vadd.xlane.f32.xlu1 %v3813_v51  ;;  %v4481_v51 = vld [vmem:[#allocation4 + $0x4d0] ss:$0 sm:$0xff] }
0x256c   : > { %v3808_v60 = vpop.f32.mrf.mxu1 }
0x256d   : > { %v3809_v32 = vadd.f32 %v4477_v9, %v3808_v60 }
0x256f   : > { %v6019_v1 = vadd.f32 %v3809_v32, %v5896_v46 }
0x2571   : > { %v3816_v44 = vsel %vm6250_vm6, %v6019_v1, 0.0  ;;  %vm6260_vm6 = vmmov %vm6252_vm5 }
0x2572   : > { %3817 = vadd.xlane.f32.xlu2 %v3816_v44 }
0x25dd   : > { %v3815_v52 = vpop.xlane.xlu1 %3814 }
0x25de   : > { %v3819_v24 = vmul.f32 %v3815_v52, %v4794_v17 }
0x25e0   : > { %v3821_v62 = vsub.f32 %v6014_v40, %v3819_v24 }
0x25e2   : > { %v3823_v34 = vmul.f32 %v3821_v62, %v3821_v62 }
0x25e4   : > { %v3825_v13 = vsel %vm6251_vm1, %v3823_v34, 0.0 }
0x25e5   : > { %v3818_v39 = vpop.xlane.xlu2 %3817  ;;  %3826 = vadd.xlane.f32.xlu0 %v3825_v13 }
0x25e6   : > { %v3820_v48 = vmul.f32 %v3818_v39, %v4794_v17 }
0x25e8   : > { %v3822_v22 = vsub.f32 %v6019_v1, %v3820_v48 }
0x25ea   : > { %v3824_v46 = vmul.f32 %v3822_v22, %v3822_v22 }
0x25ec   : > { %v3828_v10 = vsel %vm6252_vm5, %v3824_v46, 0.0 }
0x25ed   : > { %3829 = vadd.xlane.f32.xlu1 %v3828_v10 }
0x2658   : > { %v3827_v43 = vpop.xlane.xlu0 %3826 }
0x2659   : > { %v3831_v55 = vmul.f32 %v3827_v43, %v4794_v17  ;;  %v3997_v43 = vld [vmem:[#allocation4 + $0x4f8] sm:$0xff] }
0x265b   : > { %v3833_v6 = vadd.f32 1e-12, %v3831_v55  ;;  %v3996_v55 = vld [vmem:[#allocation4 + $0x4f0] sm:$0xff] }
0x265d   : > { %4651 = vrsqrt.f32 %v3833_v6  ;;  %vm3841_vm0 = vweird.f32 %v3833_v6 }
0x2660   : > { %v3830_v47 = vpop.xlane.xlu1 %3829 }
0x2661   : > { %v3832_v56 = vmul.f32 %v3830_v47, %v4794_v17 }
0x2663   : > { %v4652_v20 = vpop.eup %4651  ;;  %v3834_v23 = vadd.f32 1e-12, %v3832_v56 }
0x2664   : > { %v3836_v45 = vmul.f32 %v4652_v20, %v3833_v6  ;;  %vm3842_vm8 = vweird.f32 %v4652_v20  ;;  %v3995_v6 = vld [vmem:[#allocation4 + $0x4e8] sm:$0xff] }
0x2665   : > { %4653 = vrsqrt.f32 %v3834_v23  ;;  %vm3843_vm15 = vmor %vm3841_vm0, %vm3842_vm8  ;;  %vm3851_vm4 = vweird.f32 %v3834_v23 }
0x2666   : > { %v3837_v5 = vmul.f32 %v4652_v20, %v3836_v45 }
0x2668   : > { %v3838_v54 = vmul.f32 0.5, %v3837_v5 }
0x266a   : > { %v3839_v2 = vsub.f32 1.5, %v3838_v54 }
0x266b   : > { %v4654_v29 = vpop.eup %4653 }
0x266c   : > { %v3840_v30 = vmul.f32 %v4652_v20, %v3839_v2  ;;  %v3846_v11 = vmul.f32 %v4654_v29, %v3834_v23  ;;  %vm3852_vm3 = vweird.f32 %v4654_v29 }
0x266d   : > { %vm3853_vm10 = vmor %vm3851_vm4, %vm3852_vm3 }
0x266e   : > { %v3844_v37 = vsel %vm3843_vm15, %v4652_v20, %v3840_v30  ;;  %v3847_v61 = vmul.f32 %v4654_v29, %v3846_v11  ;;  %v4482_v30 = vld [vmem:[#allocation4 + $0x4d8] ss:$0 sm:$0xff]  ;;  %vm6261_vm4 = vmmov %vm6257_vm2 }
0x266f   : > { %v3855_v42 = vmul.f32 %v3844_v37, %v3821_v62  ;;  %v4483_v37 = vld [vmem:[#allocation4 + $0x4e0] ss:$0 sm:$0xff] }
0x2670   : > { %v3848_v7 = vmul.f32 0.5, %v3847_v61 }
0x2671   : > { %v3859_v26 = vmul.f32 %v4478_v33, %v3855_v42 }
0x2672   : > { %v3849_v49 = vsub.f32 1.5, %v3848_v7 }
0x2673   : > { %v3863_v12 = vadd.f32 %v4479_v59, %v3859_v26 }
0x2674   : > { %v3850_v16 = vmul.f32 %v4654_v29, %v3849_v49 }
0x2675   : > { %4390 = vmatmul.msk.f32.vlgmr.msrb.gmra.mxu0 %vm6253_vm7, %v3863_v12  ;;  %vm4032_vm7 = vcmask 97280  }
0x2676   : > { %v3854_v35 = vsel %vm3853_vm10, %v4654_v29, %v3850_v16  ;;  %vm6262_vm10 = vmmov %vm6257_vm2 }
0x2677   : > { %v3856_v58 = vmul.f32 %v3854_v35, %v3822_v22 }
0x2679   : > { %v3860_v36 = vmul.f32 %v4478_v33, %v3856_v58  ;;  %v4484_v58 = vld [vmem:[#allocation4 + $0x508] ss:$0 sm:$0xff] }
0x267b   : > { %v3864_v0 = vadd.f32 %v4479_v59, %v3860_v36 }
0x267d   : > { %4391 = vmatmul.msk.f32.gmra.mxu0 %vm6254_vm13, %v3864_v0  ;;  %vm4036_vm13 = vcmask 90112  }
0x26f2   : > { %v3894_v8 = vpop.f32.mrf.mxu0 }
0x26f3   : > { %v3895_v18 = vadd.f32 %v4480_v21, %v3894_v8 }
0x26f5   : > { %v3900_v27 = vmax.f32 %v3895_v18, 0.0 }
0x26f7   : > { %4392 = vmatmul.msk.f32.vlgmr.msrb.gmra.mxu2 %vm6255_vm11, %v3900_v27 }
0x26fa   : > { %v3897_v9 = vpop.f32.mrf.mxu0 }
0x26fb   : > { %v3898_v50 = vadd.f32 %v4480_v21, %v3897_v9 }
0x26fd   : > { %v3901_v28 = vmax.f32 %v3898_v50, 0.0 }
0x26ff   : > { %4393 = vmatmul.msk.f32.gmra.mxu2 %vm6256_vm12, %v3901_v28 }
0x277a   : > { %v3935_v60 = vpop.f32.mrf.mxu2 }
0x277b   : > { %v3936_v32 = vadd.f32 %v4481_v51, %v3935_v60 }
0x277d   : > { %v3941_v44 = vadd.f32 %v3936_v32, %v6014_v40 }
0x277f   : > { %v3943_v52 = vsel %vm6257_vm2, %v3941_v44, 0.0 }
0x2780   : > { %3944 = vadd.xlane.f32.xlu1 %v3943_v52 }
0x2782   : > { %v3938_v24 = vpop.f32.mrf.mxu2 }
0x2783   : > { %v3939_v62 = vadd.f32 %v4481_v51, %v3938_v24 }
0x2785   : > { %v3942_v34 = vadd.f32 %v3939_v62, %v6019_v1  ;;  %v3998_v1 = vld [vmem:[#allocation4 + $0x500] sm:$0xff] }
0x2786   : > { %4019 = vmatpush.msra.mxu1 %v3998_v1 }
0x2787   : > { %v3946_v13 = vsel %vm6258_vm9, %v3942_v34, 0.0 }
0x2788   : > { %3947 = vadd.xlane.f32.xlu1 %v3946_v13  ;;  %4020 = vmatpush.msra.mxu1 %v3997_v43 }
0x278a   : > { %4021 = vmatpush.msra.mxu1 %v3996_v55 }
0x278c   : > { %4022 = vmatpush.msra.mxu1 %v3995_v6 }
0x27f3   : > { %v3945_v39 = vpop.xlane.xlu1 %3944 }
0x27f4   : > { %v3949_v48 = vmul.f32 %v3945_v39, %v4794_v17 }
0x27f6   : > { %v3951_v22 = vsub.f32 %v3941_v44, %v3949_v48 }
0x27f8   : > { %v3953_v46 = vmul.f32 %v3951_v22, %v3951_v22 }
0x27fa   : > { %v3955_v10 = vsel %vm6259_vm14, %v3953_v46, 0.0  ;;  %v4030_v46 = vld [vmem:[%s256_s18] sm:$0xff] }
0x27fb   : > { %3956 = vadd.xlane.f32.xlu1 %v3955_v10  ;;  %v3948_v3 = vpop.xlane.xlu1 %3947 }
0x27fc   : > { %v3950_v40 = vmul.f32 %v3948_v3, %v4794_v17  ;;  %v4031_v3 = vld [vmem:[%s256_s18 + $0x8] sm:$0x1] }
0x27fe   : > { %v3952_v53 = vsub.f32 %v3942_v34, %v3950_v40 }
0x2800   : > { %v3954_v57 = vmul.f32 %v3952_v53, %v3952_v53 }
0x2802   : > { %v3958_v38 = vsel %vm6260_vm6, %v3954_v57, 0.0 }
0x2803   : > { %3959 = vadd.xlane.f32.xlu1 %v3958_v38 }
0x286e   : > { %v3957_v63 = vpop.xlane.xlu1 %3956 }
0x286f   : > { %v3961_v19 = vmul.f32 %v3957_v63, %v4794_v17 }
0x2871   : > { %v3963_v14 = vadd.f32 1e-12, %v3961_v19 }
0x2873   : > { %4655 = vrsqrt.f32 %v3963_v14  ;;  %vm3971_vm5 = vweird.f32 %v3963_v14 }
0x2876   : > { %v3960_v47 = vpop.xlane.xlu1 %3959 }
0x2877   : > { %v3962_v56 = vmul.f32 %v3960_v47, %v4794_v17 }
0x2879   : > { %v4656_v25 = vpop.eup %4655  ;;  %v3964_v20 = vadd.f32 1e-12, %v3962_v56 }
0x287a   : > { %v3966_v23 = vmul.f32 %v4656_v25, %v3963_v14  ;;  %vm3972_vm1 = vweird.f32 %v4656_v25 }
0x287b   : > { %4657 = vrsqrt.f32 %v3964_v20  ;;  %vm3973_vm8 = vmor %vm3971_vm5, %vm3972_vm1  ;;  %vm3981_vm15 = vweird.f32 %v3964_v20 }
0x287c   : > { %v3967_v4 = vmul.f32 %v4656_v25, %v3966_v23 }
0x287e   : > { %v3968_v45 = vmul.f32 0.5, %v3967_v4 }
0x2880   : > { %v3969_v5 = vsub.f32 1.5, %v3968_v45 }
0x2881   : > { %v4658_v54 = vpop.eup %4657 }
0x2882   : > { %v3970_v2 = vmul.f32 %v4656_v25, %v3969_v5  ;;  %v3976_v29 = vmul.f32 %v4658_v54, %v3964_v20  ;;  %vm3982_vm0 = vweird.f32 %v4658_v54 }
0x2883   : > { %vm3983_vm3 = vmor %vm3981_vm15, %vm3982_vm0 }
0x2884   : > { %v3974_v11 = vsel %vm3973_vm8, %v4656_v25, %v3970_v2  ;;  %v3977_v33 = vmul.f32 %v4658_v54, %v3976_v29 }
0x2885   : > { %v3985_v61 = vmul.f32 %v3974_v11, %v3951_v22 }
0x2886   : > { %v3978_v59 = vmul.f32 0.5, %v3977_v33 }
0x2887   : > { %v3989_v17 = vmul.f32 %v4482_v30, %v3985_v61 }
0x2888   : > { %v3979_v42 = vsub.f32 1.5, %v3978_v59 }
0x2889   : > { %v3993_v7 = vadd.f32 %v4483_v37, %v3989_v17 }
0x288a   : > { %v3980_v26 = vmul.f32 %v4658_v54, %v3979_v42 }
0x288b   : > { %4394 = vmatmul.msk.f32.vlgmr.msra.gmra.mxu1 %vm6261_vm4, %v3993_v7 }
0x288c   : > { %v3984_v49 = vsel %vm3983_vm3, %v4658_v54, %v3980_v26 }
0x288d   : > { %v3986_v12 = vmul.f32 %v3984_v49, %v3952_v53 }
0x288f   : > { %v3990_v16 = vmul.f32 %v4482_v30, %v3986_v12 }
0x2891   : > { %v3994_v35 = vadd.f32 %v4483_v37, %v3990_v16 }
0x2893   : > { %4395 = vmatmul.msk.f32.gmra.mxu1 %vm6262_vm10, %v3994_v35 }
0x2908   : > { %v4024_v36 = vpop.f32.mrf.mxu1 }
0x2909   : > { %v4025_v0 = vadd.f32 %v4484_v58, %v4024_v36 }
0x290b   : > { %v4033_v41 = vsel %vm4032_vm7, %v4025_v0, -inf }
0x290c   : > { %4034 = vmax.xlane.f32.xlu2 %v4033_v41 }
0x2910   : > { %v4027_v31 = vpop.f32.mrf.mxu1 }
0x2911   : > { %v4028_v15 = vadd.f32 %v4484_v58, %v4027_v31 }
0x2913   : > { %v4037_v21 = vsel %vm4036_vm13, %v4028_v15, -inf }
0x2914   : > { %4038 = vmax.xlane.f32.xlu0 %v4037_v21 }
0x297f   : > { %v4035_v8 = vpop.xlane.xlu2 %4034 }
0x2980   : > { %v4040_v18 = vsub.f32 %v4025_v0, %v4035_v8 }
0x2982   : > { %v4042_v27 = vmul.f32 1.442695, %v4040_v18 }
0x2984   : > { %4659 = vpow2.f32 %v4042_v27 }
0x2987   : > { %v4039_v9 = vpop.xlane.xlu0 %4038 }
0x2988   : > { %v4041_v50 = vsub.f32 %v4028_v15, %v4039_v9 }
0x298a   : > { %v4660_v28 = vpop.eup %4659  ;;  %v4044_v51 = vmul.f32 1.442695, %v4041_v50 }
0x298b   : > { %v4046_v60 = vsel %vm4032_vm7, %v4660_v28, 0.0 }
0x298c   : > { %4661 = vpow2.f32 %v4044_v51  ;;  %4047 = vadd.xlane.f32.xlu1 %v4046_v60 }
0x2992   : > { %v4662_v32 = vpop.eup %4661 }
0x2993   : > { %v4049_v44 = vsel %vm4036_vm13, %v4662_v32, 0.0 }
0x2994   : > { %4050 = vadd.xlane.f32.xlu2 %v4049_v44 }
0x29ff   : > { %v4048_v52 = vpop.xlane.xlu1 %4047 }
0x2a00   : > { %4663 = vlog2.f32 %v4048_v52 }
0x2a06   : > { %v4664_v24 = vpop.eup %4663 }
0x2a07   : > { %v4053_v62 = vmul.f32 0.6931472, %v4664_v24  ;;  %v4051_v34 = vpop.xlane.xlu2 %4050 }
0x2a08   : > { %4665 = vlog2.f32 %v4051_v34 }
0x2a09   : > { %v4056_v13 = vadd.f32 %v4053_v62, %v4035_v8 }
0x2a0b   : > { %v4058_v48 = vsub.f32 %v4025_v0, %v4056_v13 }
0x2a0d   : > { %v4060_v53 = vmul.f32 %v4058_v48, %v4030_v46 }
0x2a0e   : > { %v4666_v39 = vpop.eup %4665 }
0x2a0f   : > { %v4055_v22 = vmul.f32 0.6931472, %v4666_v39  ;;  %v4062_v38 = vsel %vm4032_vm7, %v4060_v53, 0.0 }
0x2a11   : > { %v4057_v10 = vadd.f32 %v4055_v22, %v4039_v9 }
0x2a13   : > { %v4059_v40 = vsub.f32 %v4028_v15, %v4057_v10 }
0x2a15   : > { %v4061_v57 = vmul.f32 %v4059_v40, %v4031_v3 }
0x2a17   : > { %v4063_v1 = vsel %vm4036_vm13, %v4061_v57, 0.0 }
0x2a18   : > { %v4064_v43 = vadd.f32 %v4063_v1, %v4062_v38 }
0x2a1a   : > { %4065 = vadd.xlane.f32.xlu0 %v4064_v43 }
0x2a8d   : > { %v4066_v55 = vpop.xlane.xlu0 %4065 }
0x2a8e   : > { %v4067_v6 = vrot.slane %v4066_v55, 4 }
0x2a90   : > { %v4068_v63 = vadd.f32 %v4067_v6, %v4066_v55 }
0x2a92   : > { %v4069_v19 = vrot.slane %v4068_v63, 2 }
0x2a94   : > { %v4070_v14 = vadd.f32 %v4069_v19, %v4068_v63 }
0x2a96   : > { %v4071_v47 = vrot.slane %v4070_v14, 1 }
0x2a98   : > { %v4072_v56 = vadd.f32 %v4071_v47, %v4070_v14 }
0x2a9a   : > { %4406 = vpush %v4072_v56 }
0x2acb   : > { %s4407_s19 = spop %4406 }
0x2acc   : > { %s4074_s24 = ssub.f32 0.0, %s4407_s19 }
0x2ace   : > { %v4075_v25 = vstv %s4074_s24 }
0x2acf   : > { %4076 = vst [vmem:[%s259_s23] sm:$0x1] %v4075_v25 }
0x2ad0 PF: > { %s24_s22 = sadd.s32 1, %s4723_s22  }
0x2ad1   : > { %p21_p7 = scmp.ge.s32.totalorder %s24_s22, 4  }
0x2ad3   :  { %23 = sbr.rel (!%p21_p7) target bundleno = 7 (0x7), region = 77 }
0x2ad8   :  { %4094 = vsyncpa [#allocation5], 1 }
0x2ad9   :  { %4096 = vsyncpa [#allocation5 + $0x1], 1 }

</bundles_post_ra>
